<compile_context>
chip_gen: v7x
topology: tpu7x:2x2x1
jax: 0.10.0
libtpu: 0.0.40
codegen_flags: <defaults>
</compile_context>

<pallas_src>
from functools import partial

import jax
import jax.numpy as jnp
from jax.experimental import pallas as pl
from jax.experimental.pallas import tpu as pltpu


def bottle_block_kernel(heads, lane_dense_out,
                        x_ref, wsc_ref, gsc_ref, bsc_ref,
                        w1_ref, g1_ref, b1_ref,
                        wqkv_ref, emb_ref,
                        g2_ref, b2_ref, w2_ref, g3_ref, b3_ref,
                        o_ref):
    bt, hw, c_in = x_ref.shape
    d = emb_ref.shape[1]
    inner = heads * d
    c_out = w2_ref.shape[1]
    n = bt * hw                                    # all tokens of this grid step

    # bf16 into the MXU, f32 accumulation + f32 VPU/EUP math everywhere else.
    x = x_ref[...].reshape(n, c_in).astype(jnp.bfloat16)

    # ---- shortcut: 1x1 conv -> folded BN -> ReLU ----
    sc = jnp.dot(x, wsc_ref[...], preferred_element_type=jnp.float32)
    sc = jnp.maximum(sc * gsc_ref[...] + bsc_ref[...], 0.0)

    # ---- net[0:3]: 1x1 conv -> BN -> ReLU ----
    t = jnp.dot(x, w1_ref[...], preferred_element_type=jnp.float32)
    t = jnp.maximum(t * g1_ref[...] + b1_ref[...], 0.0)           # (N, C_attn)

    # ---- fused q/k/v projection: ONE wide MXU matmul (q-scale pre-folded) ----
    qkv = jnp.dot(t.astype(jnp.bfloat16), wqkv_ref[...],
                  preferred_element_type=jnp.float32)             # (N, 3*inner)

    def heads_to_batch(col):
        # columns [col, col + inner) -> (heads*bt, hw, d); group index = h*bt + b
        parts = [qkv[:, col + h * d: col + (h + 1) * d].reshape(bt, hw, d)
                 for h in range(heads)]
        return parts[0] if heads == 1 else jnp.concatenate(parts, axis=0)

    q = heads_to_batch(0)
    # Absolute positional logits folded into K:  q@k^T + q@emb^T == q@(k+emb)^T
    k = heads_to_batch(inner) + emb_ref[...][None]
    v = heads_to_batch(2 * inner)

    # ---- attention, batched over (head, batch), contraction on last dims ----
    sim = jnp.einsum('gid,gjd->gij',
                     q.astype(jnp.bfloat16), k.astype(jnp.bfloat16),
                     preferred_element_type=jnp.float32)          # (G, HW, HW)
    sim = sim - jnp.max(sim, axis=-1, keepdims=True)
    p = jnp.exp(sim)
    attn = p * pl.reciprocal(jnp.sum(p, axis=-1, keepdims=True), approx=True)
    og = jnp.einsum('gij,gjd->gid',
                    attn.astype(jnp.bfloat16), v.astype(jnp.bfloat16),
                    preferred_element_type=jnp.float32)           # (G, HW, d)

    # heads back onto the channel (lane) axis: (heads*bt, hw, d) -> (N, heads*d)
    if heads == 1:
        att = og.reshape(n, d)
    else:
        att = jnp.concatenate(
            [og[h * bt:(h + 1) * bt].reshape(n, d) for h in range(heads)],
            axis=-1)

    # ---- net[5:9]: BN -> ReLU -> 1x1 conv (single matmul) -> BN ----
    att = jnp.maximum(att * g2_ref[...] + b2_ref[...], 0.0)
    t2 = jnp.dot(att.astype(jnp.bfloat16), w2_ref[...],
                 preferred_element_type=jnp.float32)              # (N, C_out)
    t2 = t2 * g3_ref[...] + b3_ref[...]

    # ---- residual add + final activation ----
    res = jnp.maximum(t2 + sc, 0.0)
    if lane_dense_out:
        # Lane-dense store: last dim HW*C_out is a multiple of 128 -> unmasked vst.
        o_ref[...] = res.reshape(bt, 1, hw * c_out)
    else:
        o_ref[...] = res.reshape(bt, hw, c_out)


def bottle_block(x_nchw, params, *, heads, dim_head, batch_tile=None):
    B, C_in, H, W = x_nchw.shape
    HW = H * W
    C_out = params["w_sc"].shape[1]
    C_attn = params["w1"].shape[1]
    inner = heads * dim_head
    scale = dim_head ** -0.5

    x_tok = jnp.transpose(x_nchw, (0, 2, 3, 1)).reshape(B, HW, C_in)

    # bf16 matmul weights (halves weight DMA / VMEM); q-scale folded into Wq.
    w_qkv = jnp.concatenate(
        [params["w_qkv"][:, :inner] * scale, params["w_qkv"][:, inner:]], axis=1)
    w_sc = params["w_sc"].astype(jnp.bfloat16)
    w1 = params["w1"].astype(jnp.bfloat16)
    w_qkv = w_qkv.astype(jnp.bfloat16)
    w2 = params["w2"].astype(jnp.bfloat16)

    # ---- generation-aware VMEM budget & batch-tile selection ----
    try:
        vmem_cap = int(pltpu.get_tpu_info().vmem_capacity_bytes)
    except Exception:                               # noqa: BLE001
        vmem_cap = 64 * 1024 * 1024                 # v7x-safe default
    vmem_budget = min(int(0.75 * vmem_cap), 100 * 1024 * 1024)

    def _vmem_bytes(bt):
        n, g = bt * HW, bt * heads
        io = 4 * 2 * n * (C_in + C_out)                              # 2x-buffered x/out tiles
        wb = 2 * 2 * (C_in * C_out + C_in * C_attn
                      + C_attn * 3 * inner + inner * C_out)          # bf16 weights (worst case 2 bufs)
        wb += 2 * 4 * (HW * dim_head + 4 * C_out + 2 * C_attn + 2 * inner)
        inter = 4 * (2 * n * C_out + n * C_attn + 2 * n * 3 * inner + n * inner
                     + 2 * g * HW * HW + g * HW * dim_head)
        return int(1.5 * (io + wb + inter))                          # relayout/regalloc headroom

    if batch_tile is None:
        batch_tile = 1
        for bt in range(1, B + 1):
            if B % bt:
                continue
            if B > 1 and B // bt < 2:        # keep >=2 grid steps: v7x megacore sharding
                break
            if _vmem_bytes(bt) > vmem_budget:
                break
            batch_tile = bt
            if bt * HW >= 128:               # MXU M dimension already filled
                break
    BT = batch_tile
    n_steps = B // BT

    operands = (x_tok, w_sc, params["g_sc"], params["b_sc"],
                w1, params["g1"], params["b1"],
                w_qkv, params["emb"],
                params["g2"], params["b2"],
                w2, params["g3"], params["b3"])

    flops = (2 * B * HW * (C_in * C_out + C_in * C_attn
                           + C_attn * 3 * inner + inner * C_out)
             + 4 * B * heads * HW * HW * dim_head)
    bytes_accessed = (sum(int(a.size) * a.dtype.itemsize for a in operands)
                      + B * HW * C_out * 4)
    cost = pl.CostEstimate(flops=flops,
                           transcendentals=B * heads * HW * HW,
                           bytes_accessed=bytes_accessed)

    def _call(single_buffer_weights, lane_dense_out):
        def inv(shape):
            # Grid-invariant operand: constant index map (DMA'd once); single
            # buffer is enough — saves VMEM, mostly relevant on v7x (64 MiB).
            if single_buffer_weights:
                return pl.BlockSpec(shape, lambda b: (0, 0),
                                    pipeline_mode=pl.Buffered(1))
            return pl.BlockSpec(shape, lambda b: (0, 0))

        in_specs = [
            pl.BlockSpec((BT, HW, C_in), lambda b: (b, 0, 0)),        # x tokens
            inv((C_in, C_out)), inv((1, C_out)), inv((1, C_out)),     # shortcut conv + BN
            inv((C_in, C_attn)), inv((1, C_attn)), inv((1, C_attn)),  # conv1 + BN1
            inv((C_attn, 3 * inner)),                                 # fused Wqkv (scale folded)
            inv((HW, dim_head)),                                      # abs pos emb
            inv((1, inner)), inv((1, inner)),                         # BN2
            inv((inner, C_out)), inv((1, C_out)), inv((1, C_out)),    # conv2 + BN3
        ]
        if lane_dense_out:
            out_shape = jax.ShapeDtypeStruct((B, 1, HW * C_out), jnp.float32)
            out_spec = pl.BlockSpec((BT, 1, HW * C_out), lambda b: (b, 0, 0))
        else:
            out_shape = jax.ShapeDtypeStruct((B, HW, C_out), jnp.float32)
            out_spec = pl.BlockSpec((BT, HW, C_out), lambda b: (b, 0, 0))

        kernel = partial(bottle_block_kernel, heads, lane_dense_out)
        out = pl.pallas_call(
            kernel,
            out_shape=out_shape,
            grid_spec=pltpu.PrefetchScalarGridSpec(
                num_scalar_prefetch=0,
                grid=(n_steps,),
                in_specs=in_specs,
                out_specs=out_spec,
            ),
            compiler_params=pltpu.CompilerParams(
                dimension_semantics=("parallel",),
                vmem_limit_bytes=vmem_budget,
            ),
            cost_estimate=cost,
        )(*operands)
        return out.reshape(B, HW, C_out)

    # Most optimized layout first; fall back if a Mosaic lowering path
    # (lane-dense reshape-store / single-buffered invariant operands) is not
    # available in the installed jax/libtpu version.
    last_err = None
    out_tok = None
    for cfg in ((True, True), (False, True), (True, False), (False, False)):
        try:
            out_tok = _call(*cfg)
            break
        except Exception as e:              # noqa: BLE001  (pragma: fallback path)
            last_err = e
    if out_tok is None:
        raise last_err

    return jnp.transpose(out_tok.reshape(B, H, W, C_out), (0, 3, 1, 2))


def _relu(x):
    return jnp.maximum(x, 0.0)


def bottle_block_reference_bf16(x_nchw, params, *, heads, dim_head):
    """Pure-JAX reference that mirrors the kernel's bf16-MXU / f32-accumulate math."""
    B, C_in, H, W = x_nchw.shape
    HW = H * W
    inner = heads * dim_head
    scale = dim_head ** -0.5
    bf = jnp.bfloat16

    def mm(a, b):
        return jnp.matmul(a.astype(bf), b.astype(bf),
                          preferred_element_type=jnp.float32)

    x = jnp.transpose(x_nchw, (0, 2, 3, 1)).reshape(B, HW, C_in)
    sc = _relu(mm(x, params["w_sc"]) * params["g_sc"] + params["b_sc"])
    t = _relu(mm(x, params["w1"]) * params["g1"] + params["b1"])
    w_qkv = jnp.concatenate(
        [params["w_qkv"][:, :inner] * scale, params["w_qkv"][:, inner:]], axis=1)
    qkv = mm(t, w_qkv)
    q = qkv[..., :inner].reshape(B, HW, heads, dim_head).transpose(0, 2, 1, 3)
    k = qkv[..., inner:2 * inner].reshape(B, HW, heads, dim_head).transpose(0, 2, 1, 3)
    v = qkv[..., 2 * inner:].reshape(B, HW, heads, dim_head).transpose(0, 2, 1, 3)
    k = k + params["emb"][None, None]
    sim = jnp.einsum("bhid,bhjd->bhij", q.astype(bf), k.astype(bf),
                     preferred_element_type=jnp.float32)
    attn = jax.nn.softmax(sim, axis=-1)
    o = jnp.einsum("bhij,bhjd->bhid", attn.astype(bf), v.astype(bf),
                   preferred_element_type=jnp.float32)
    o = o.transpose(0, 2, 1, 3).reshape(B, HW, inner)
    t2 = _relu(o * params["g2"] + params["b2"])
    t2 = mm(t2, params["w2"]) * params["g3"] + params["b3"]
    out = _relu(t2 + sc)
    return jnp.transpose(out.reshape(B, H, W, -1), (0, 3, 1, 2))


def bottle_block_reference_f32(x_nchw, params, *, heads, dim_head):
    """Module-faithful full-precision reference."""
    B, C_in, H, W = x_nchw.shape
    HW = H * W
    x = jnp.transpose(x_nchw, (0, 2, 3, 1)).reshape(B, HW, C_in)
    scale = dim_head ** -0.5
    inner = heads * dim_head
    sc = _relu(x @ params["w_sc"] * params["g_sc"] + params["b_sc"])
    t = _relu(x @ params["w1"] * params["g1"] + params["b1"])
    qkv = t @ params["w_qkv"]
    q = (qkv[..., :inner] * scale).reshape(B, HW, heads, dim_head).transpose(0, 2, 1, 3)
    k = qkv[..., inner:2 * inner].reshape(B, HW, heads, dim_head).transpose(0, 2, 1, 3)
    v = qkv[..., 2 * inner:].reshape(B, HW, heads, dim_head).transpose(0, 2, 1, 3)
    sim = (jnp.einsum("bhid,bhjd->bhij", q, k)
           + jnp.einsum("bhid,jd->bhij", q, params["emb"]))
    attn = jax.nn.softmax(sim, axis=-1)
    o = jnp.einsum("bhij,bhjd->bhid", attn, v)
    o = o.transpose(0, 2, 1, 3).reshape(B, HW, inner)
    t2 = _relu(o * params["g2"] + params["b2"])
    t2 = t2 @ params["w2"] * params["g3"] + params["b3"]
    out = _relu(t2 + sc)
    return jnp.transpose(out.reshape(B, H, W, -1), (0, 3, 1, 2))


def _folded_bn(kg, kb, km, kv, c, eps=1e-5):
    gamma = 1.0 + 0.1 * jax.random.normal(kg, (1, c), jnp.float32)
    beta = 0.1 * jax.random.normal(kb, (1, c), jnp.float32)
    mean = 0.1 * jax.random.normal(km, (1, c), jnp.float32)
    var = jax.random.uniform(kv, (1, c), jnp.float32, minval=0.5, maxval=1.5)
    s = gamma / jnp.sqrt(var + eps)
    return s, beta - mean * s


if __name__ == "__main__":
    # BottleBlock(dim=8, fmap_size=8, dim_out=32, proj_factor=2, downsample=False,
    #             heads=2, dim_head=8, rel_pos_emb=False)
    # attention_dim = dim_out // proj_factor = 16 = heads * dim_head
    B, dim, dim_out, fmap = 2, 8, 32, 8
    heads, dim_head = 2, 8
    attn_dim = heads * dim_head
    HW = fmap * fmap

    keys = jax.random.split(jax.random.PRNGKey(0), 23)
    (kx, kwsc, kg0, kb0, km0, kv0,
     kw1, kg1, kb1, km1, kv1,
     kqkv, kh, kw,
     kg2, kb2, km2, kv2,
     kw2, kg3, kb3, km3, kv3) = keys

    x = jax.random.normal(kx, (B, dim, fmap, fmap), jnp.float32)

    pos_scale = dim_head ** -0.5
    height = pos_scale * jax.random.normal(kh, (fmap, dim_head), jnp.float32)
    width = pos_scale * jax.random.normal(kw, (fmap, dim_head), jnp.float32)
    emb = (height[:, None, :] + width[None, :, :]).reshape(HW, dim_head)

    g_sc, b_sc = _folded_bn(kg0, kb0, km0, kv0, dim_out)
    g1, b1 = _folded_bn(kg1, kb1, km1, kv1, attn_dim)
    g2, b2 = _folded_bn(kg2, kb2, km2, kv2, attn_dim)
    g3, b3 = _folded_bn(kg3, kb3, km3, kv3, dim_out)

    params = {
        # 1x1 conv weights stored directly in (C_in, C_out) matmul layout
        "w_sc": 0.2 * jax.random.normal(kwsc, (dim, dim_out), jnp.float32),
        "g_sc": g_sc, "b_sc": b_sc,
        "w1": 0.2 * jax.random.normal(kw1, (dim, attn_dim), jnp.float32),
        "g1": g1, "b1": b1,
        "w_qkv": 0.2 * jax.random.normal(kqkv, (attn_dim, 3 * attn_dim), jnp.float32),
        "emb": emb,
        "g2": g2, "b2": b2,
        "w2": 0.2 * jax.random.normal(kw2, (attn_dim, dim_out), jnp.float32),
        "g3": g3, "b3": b3,
    }

    out = bottle_block(x, params, heads=heads, dim_head=dim_head)
    out = jax.block_until_ready(out)

    ref_bf16 = bottle_block_reference_bf16(x, params, heads=heads, dim_head=dim_head)
    ref_f32 = bottle_block_reference_f32(x, params, heads=heads, dim_head=dim_head)

    assert out.shape == (B, dim_out, fmap, fmap), out.shape
    # Tight check against a reference with identical bf16-MXU semantics.
    assert jnp.allclose(out, ref_bf16, atol=1e-2, rtol=1e-2), \
        float(jnp.max(jnp.abs(out - ref_bf16)))
    # Loose check against the full-precision module-faithful reference
    # (difference is only bf16 rounding of MXU operands + approx reciprocal).
    assert jnp.allclose(out, ref_f32, atol=5e-2, rtol=5e-2), \
        float(jnp.max(jnp.abs(out - ref_f32)))

    print("KERNEL_OK")
</pallas_src>

<mosaic_0001>
module attributes {stable_mosaic.version = 11 : i64} {
  func.func @bottle_block_kernel(%arg0: i32, %arg1: memref<1x64x8xf32, #tpu.memory_space<vmem>>, %arg2: memref<8x32xbf16, #tpu.memory_space<vmem>>, %arg3: memref<1x32xf32, #tpu.memory_space<vmem>>, %arg4: memref<1x32xf32, #tpu.memory_space<vmem>>, %arg5: memref<8x16xbf16, #tpu.memory_space<vmem>>, %arg6: memref<1x16xf32, #tpu.memory_space<vmem>>, %arg7: memref<1x16xf32, #tpu.memory_space<vmem>>, %arg8: memref<16x48xbf16, #tpu.memory_space<vmem>>, %arg9: memref<64x8xf32, #tpu.memory_space<vmem>>, %arg10: memref<1x16xf32, #tpu.memory_space<vmem>>, %arg11: memref<1x16xf32, #tpu.memory_space<vmem>>, %arg12: memref<16x32xbf16, #tpu.memory_space<vmem>>, %arg13: memref<1x32xf32, #tpu.memory_space<vmem>>, %arg14: memref<1x32xf32, #tpu.memory_space<vmem>>, %arg15: memref<1x1x2048xf32, #tpu.memory_space<vmem>>) attributes {dimension_semantics = [#tpu.dimension_semantics<parallel>], iteration_bounds = array<i64: 2>, scalar_prefetch = 0 : i64, scratch_operands = 0 : i64, tpu.core_type = #tpu.core_type<tc>, window_params = [{transform_indices = @transform_0, window_bounds = array<i64: 1, 64, 8>}, {pipeline_mode = #tpu.pipeline_mode<synchronous>, transform_indices = @transform_1, window_bounds = array<i64: 8, 32>}, {pipeline_mode = #tpu.pipeline_mode<synchronous>, transform_indices = @transform_2, window_bounds = array<i64: 1, 32>}, {pipeline_mode = #tpu.pipeline_mode<synchronous>, transform_indices = @transform_3, window_bounds = array<i64: 1, 32>}, {pipeline_mode = #tpu.pipeline_mode<synchronous>, transform_indices = @transform_4, window_bounds = array<i64: 8, 16>}, {pipeline_mode = #tpu.pipeline_mode<synchronous>, transform_indices = @transform_5, window_bounds = array<i64: 1, 16>}, {pipeline_mode = #tpu.pipeline_mode<synchronous>, transform_indices = @transform_6, window_bounds = array<i64: 1, 16>}, {pipeline_mode = #tpu.pipeline_mode<synchronous>, transform_indices = @transform_7, window_bounds = array<i64: 16, 48>}, {pipeline_mode = #tpu.pipeline_mode<synchronous>, transform_indices = @transform_8, window_bounds = array<i64: 64, 8>}, {pipeline_mode = #tpu.pipeline_mode<synchronous>, transform_indices = @transform_9, window_bounds = array<i64: 1, 16>}, {pipeline_mode = #tpu.pipeline_mode<synchronous>, transform_indices = @transform_10, window_bounds = array<i64: 1, 16>}, {pipeline_mode = #tpu.pipeline_mode<synchronous>, transform_indices = @transform_11, window_bounds = array<i64: 16, 32>}, {pipeline_mode = #tpu.pipeline_mode<synchronous>, transform_indices = @transform_12, window_bounds = array<i64: 1, 32>}, {pipeline_mode = #tpu.pipeline_mode<synchronous>, transform_indices = @transform_13, window_bounds = array<i64: 1, 32>}, {transform_indices = @transform_14, window_bounds = array<i64: 1, 1, 2048>}]} {
    %c0 = arith.constant 0 : index
    %c0_0 = arith.constant 0 : index
    %c0_1 = arith.constant 0 : index
    %0 = vector.load %arg1[%c0, %c0_0, %c0_1] : memref<1x64x8xf32, #tpu.memory_space<vmem>>, vector<1x64x8xf32>
    %1 = vector.shape_cast %0 : vector<1x64x8xf32> to vector<64x8xf32>
    %2 = arith.truncf %1 : vector<64x8xf32> to vector<64x8xbf16>
    %c0_2 = arith.constant 0 : index
    %c0_3 = arith.constant 0 : index
    %3 = vector.load %arg2[%c0_2, %c0_3] : memref<8x32xbf16, #tpu.memory_space<vmem>>, vector<8x32xbf16>
    %cst = arith.constant dense<0.000000e+00> : vector<64x32xf32>
    %4 = tpu.matmul %2, %3, %cst {dimension_numbers = #tpu.dot_dimension_numbers<[1], [0], [0], [1], [0, 0, 1, 1], [], []>} : vector<64x8xbf16>, vector<8x32xbf16>, vector<64x32xf32> -> vector<64x32xf32>
    %c0_4 = arith.constant 0 : index
    %c0_5 = arith.constant 0 : index
    %5 = vector.load %arg3[%c0_4, %c0_5] : memref<1x32xf32, #tpu.memory_space<vmem>>, vector<1x32xf32>
    %6 = vector.broadcast %5 : vector<1x32xf32> to vector<64x32xf32>
    %7 = arith.mulf %4, %6 : vector<64x32xf32>
    %c0_6 = arith.constant 0 : index
    %c0_7 = arith.constant 0 : index
    %8 = vector.load %arg4[%c0_6, %c0_7] : memref<1x32xf32, #tpu.memory_space<vmem>>, vector<1x32xf32>
    %9 = vector.broadcast %8 : vector<1x32xf32> to vector<64x32xf32>
    %10 = arith.addf %7, %9 : vector<64x32xf32>
    %cst_8 = arith.constant 0.000000e+00 : f32
    %11 = vector.broadcast %cst_8 : f32 to vector<64x32xf32>
    %12 = arith.maximumf %10, %11 : vector<64x32xf32>
    %c0_9 = arith.constant 0 : index
    %c0_10 = arith.constant 0 : index
    %13 = vector.load %arg5[%c0_9, %c0_10] : memref<8x16xbf16, #tpu.memory_space<vmem>>, vector<8x16xbf16>
    %cst_11 = arith.constant dense<0.000000e+00> : vector<64x16xf32>
    %14 = tpu.matmul %2, %13, %cst_11 {dimension_numbers = #tpu.dot_dimension_numbers<[1], [0], [0], [1], [0, 0, 1, 1], [], []>} : vector<64x8xbf16>, vector<8x16xbf16>, vector<64x16xf32> -> vector<64x16xf32>
    %c0_12 = arith.constant 0 : index
    %c0_13 = arith.constant 0 : index
    %15 = vector.load %arg6[%c0_12, %c0_13] : memref<1x16xf32, #tpu.memory_space<vmem>>, vector<1x16xf32>
    %16 = vector.broadcast %15 : vector<1x16xf32> to vector<64x16xf32>
    %17 = arith.mulf %14, %16 : vector<64x16xf32>
    %c0_14 = arith.constant 0 : index
    %c0_15 = arith.constant 0 : index
    %18 = vector.load %arg7[%c0_14, %c0_15] : memref<1x16xf32, #tpu.memory_space<vmem>>, vector<1x16xf32>
    %19 = vector.broadcast %18 : vector<1x16xf32> to vector<64x16xf32>
    %20 = arith.addf %17, %19 : vector<64x16xf32>
    %cst_16 = arith.constant 0.000000e+00 : f32
    %21 = vector.broadcast %cst_16 : f32 to vector<64x16xf32>
    %22 = arith.maximumf %20, %21 : vector<64x16xf32>
    %23 = arith.truncf %22 : vector<64x16xf32> to vector<64x16xbf16>
    %c0_17 = arith.constant 0 : index
    %c0_18 = arith.constant 0 : index
    %24 = vector.load %arg8[%c0_17, %c0_18] : memref<16x48xbf16, #tpu.memory_space<vmem>>, vector<16x48xbf16>
    %cst_19 = arith.constant dense<0.000000e+00> : vector<64x48xf32>
    %25 = tpu.matmul %23, %24, %cst_19 {dimension_numbers = #tpu.dot_dimension_numbers<[1], [0], [0], [1], [0, 0, 1, 1], [], []>} : vector<64x16xbf16>, vector<16x48xbf16>, vector<64x48xf32> -> vector<64x48xf32>
    %26 = vector.extract_strided_slice %25 {offsets = [0, 0], sizes = [64, 8], strides = [1, 1]} : vector<64x48xf32> to vector<64x8xf32>
    %27 = vector.shape_cast %26 : vector<64x8xf32> to vector<1x64x8xf32>
    %28 = vector.extract_strided_slice %25 {offsets = [0, 8], sizes = [64, 8], strides = [1, 1]} : vector<64x48xf32> to vector<64x8xf32>
    %29 = vector.shape_cast %28 : vector<64x8xf32> to vector<1x64x8xf32>
    %30 = tpu.concatenate %27, %29 in 0 : vector<1x64x8xf32>, vector<1x64x8xf32> -> vector<2x64x8xf32>
    %31 = vector.extract_strided_slice %25 {offsets = [0, 16], sizes = [64, 8], strides = [1, 1]} : vector<64x48xf32> to vector<64x8xf32>
    %32 = vector.shape_cast %31 : vector<64x8xf32> to vector<1x64x8xf32>
    %33 = vector.extract_strided_slice %25 {offsets = [0, 24], sizes = [64, 8], strides = [1, 1]} : vector<64x48xf32> to vector<64x8xf32>
    %34 = vector.shape_cast %33 : vector<64x8xf32> to vector<1x64x8xf32>
    %35 = tpu.concatenate %32, %34 in 0 : vector<1x64x8xf32>, vector<1x64x8xf32> -> vector<2x64x8xf32>
    %c0_20 = arith.constant 0 : index
    %c0_21 = arith.constant 0 : index
    %36 = vector.load %arg9[%c0_20, %c0_21] : memref<64x8xf32, #tpu.memory_space<vmem>>, vector<64x8xf32>
    %37 = vector.shape_cast %36 : vector<64x8xf32> to vector<1x64x8xf32>
    %38 = vector.broadcast %37 : vector<1x64x8xf32> to vector<2x64x8xf32>
    %39 = arith.addf %35, %38 : vector<2x64x8xf32>
    %40 = vector.extract_strided_slice %25 {offsets = [0, 32], sizes = [64, 8], strides = [1, 1]} : vector<64x48xf32> to vector<64x8xf32>
    %41 = vector.shape_cast %40 : vector<64x8xf32> to vector<1x64x8xf32>
    %42 = vector.extract_strided_slice %25 {offsets = [0, 40], sizes = [64, 8], strides = [1, 1]} : vector<64x48xf32> to vector<64x8xf32>
    %43 = vector.shape_cast %42 : vector<64x8xf32> to vector<1x64x8xf32>
    %44 = tpu.concatenate %41, %43 in 0 : vector<1x64x8xf32>, vector<1x64x8xf32> -> vector<2x64x8xf32>
    %45 = arith.truncf %30 : vector<2x64x8xf32> to vector<2x64x8xbf16>
    %46 = arith.truncf %39 : vector<2x64x8xf32> to vector<2x64x8xbf16>
    "tpu.trace_start"() <{level = 10 : i32, message = "gid,gjd->gij"}> : () -> ()
    %cst_22 = arith.constant dense<0.000000e+00> : vector<2x64x64xf32>
    %47 = tpu.matmul %45, %46, %cst_22 {dimension_numbers = #tpu.dot_dimension_numbers<[2], [2], [1], [1], [0, 0, 0, 1, 1, 1], [0], [0]>} : vector<2x64x8xbf16>, vector<2x64x8xbf16>, vector<2x64x64xf32> -> vector<2x64x64xf32>
    "tpu.trace_stop"() : () -> ()
    %cst_23 = arith.constant dense<0xFF800000> : vector<2x64xf32>
    %48 = vector.multi_reduction <maximumf>, %47, %cst_23 [2] : vector<2x64x64xf32> to vector<2x64xf32>
    %49 = vector.shape_cast %48 : vector<2x64xf32> to vector<2x64x1xf32>
    %50 = vector.broadcast %49 : vector<2x64x1xf32> to vector<2x64x64xf32>
    %51 = arith.subf %47, %50 : vector<2x64x64xf32>
    %52 = math.exp %51 : vector<2x64x64xf32>
    %cst_24 = arith.constant dense<0.000000e+00> : vector<2x64xf32>
    %53 = vector.multi_reduction <add>, %52, %cst_24 [2] : vector<2x64x64xf32> to vector<2x64xf32>
    %54 = vector.shape_cast %53 : vector<2x64xf32> to vector<2x64x1xf32>
    %55 = tpu.reciprocal %54 {approx = true} : vector<2x64x1xf32> -> vector<2x64x1xf32>
    %56 = vector.broadcast %55 : vector<2x64x1xf32> to vector<2x64x64xf32>
    %57 = arith.mulf %52, %56 : vector<2x64x64xf32>
    %58 = arith.truncf %57 : vector<2x64x64xf32> to vector<2x64x64xbf16>
    %59 = arith.truncf %44 : vector<2x64x8xf32> to vector<2x64x8xbf16>
    "tpu.trace_start"() <{level = 10 : i32, message = "gij,gjd->gid"}> : () -> ()
    %cst_25 = arith.constant dense<0.000000e+00> : vector<2x64x8xf32>
    %60 = tpu.matmul %58, %59, %cst_25 {dimension_numbers = #tpu.dot_dimension_numbers<[2], [1], [1], [2], [0, 0, 0, 1, 1, 2], [0], [0]>} : vector<2x64x64xbf16>, vector<2x64x8xbf16>, vector<2x64x8xf32> -> vector<2x64x8xf32>
    "tpu.trace_stop"() : () -> ()
    %61 = vector.extract_strided_slice %60 {offsets = [0, 0, 0], sizes = [1, 64, 8], strides = [1, 1, 1]} : vector<2x64x8xf32> to vector<1x64x8xf32>
    %62 = vector.shape_cast %61 : vector<1x64x8xf32> to vector<64x8xf32>
    %63 = vector.extract_strided_slice %60 {offsets = [1, 0, 0], sizes = [1, 64, 8], strides = [1, 1, 1]} : vector<2x64x8xf32> to vector<1x64x8xf32>
    %64 = vector.shape_cast %63 : vector<1x64x8xf32> to vector<64x8xf32>
    %65 = tpu.concatenate %62, %64 in 1 : vector<64x8xf32>, vector<64x8xf32> -> vector<64x16xf32>
    %c0_26 = arith.constant 0 : index
    %c0_27 = arith.constant 0 : index
    %66 = vector.load %arg10[%c0_26, %c0_27] : memref<1x16xf32, #tpu.memory_space<vmem>>, vector<1x16xf32>
    %67 = vector.broadcast %66 : vector<1x16xf32> to vector<64x16xf32>
    %68 = arith.mulf %65, %67 : vector<64x16xf32>
    %c0_28 = arith.constant 0 : index
    %c0_29 = arith.constant 0 : index
    %69 = vector.load %arg11[%c0_28, %c0_29] : memref<1x16xf32, #tpu.memory_space<vmem>>, vector<1x16xf32>
    %70 = vector.broadcast %69 : vector<1x16xf32> to vector<64x16xf32>
    %71 = arith.addf %68, %70 : vector<64x16xf32>
    %cst_30 = arith.constant 0.000000e+00 : f32
    %72 = vector.broadcast %cst_30 : f32 to vector<64x16xf32>
    %73 = arith.maximumf %71, %72 : vector<64x16xf32>
    %74 = arith.truncf %73 : vector<64x16xf32> to vector<64x16xbf16>
    %c0_31 = arith.constant 0 : index
    %c0_32 = arith.constant 0 : index
    %75 = vector.load %arg12[%c0_31, %c0_32] : memref<16x32xbf16, #tpu.memory_space<vmem>>, vector<16x32xbf16>
    %cst_33 = arith.constant dense<0.000000e+00> : vector<64x32xf32>
    %76 = tpu.matmul %74, %75, %cst_33 {dimension_numbers = #tpu.dot_dimension_numbers<[1], [0], [0], [1], [0, 0, 1, 1], [], []>} : vector<64x16xbf16>, vector<16x32xbf16>, vector<64x32xf32> -> vector<64x32xf32>
    %c0_34 = arith.constant 0 : index
    %c0_35 = arith.constant 0 : index
    %77 = vector.load %arg13[%c0_34, %c0_35] : memref<1x32xf32, #tpu.memory_space<vmem>>, vector<1x32xf32>
    %78 = vector.broadcast %77 : vector<1x32xf32> to vector<64x32xf32>
    %79 = arith.mulf %76, %78 : vector<64x32xf32>
    %c0_36 = arith.constant 0 : index
    %c0_37 = arith.constant 0 : index
    %80 = vector.load %arg14[%c0_36, %c0_37] : memref<1x32xf32, #tpu.memory_space<vmem>>, vector<1x32xf32>
    %81 = vector.broadcast %80 : vector<1x32xf32> to vector<64x32xf32>
    %82 = arith.addf %79, %81 : vector<64x32xf32>
    %83 = arith.addf %82, %12 : vector<64x32xf32>
    %cst_38 = arith.constant 0.000000e+00 : f32
    %84 = vector.broadcast %cst_38 : f32 to vector<64x32xf32>
    %85 = arith.maximumf %83, %84 : vector<64x32xf32>
    %86 = vector.shape_cast %85 : vector<64x32xf32> to vector<1x1x2048xf32>
    %c0_39 = arith.constant 0 : index
    %c0_40 = arith.constant 0 : index
    %c0_41 = arith.constant 0 : index
    %87 = vector.load %arg15[%c0_39, %c0_40, %c0_41] : memref<1x1x2048xf32, #tpu.memory_space<vmem>>, vector<1x1x2048xf32>
    tpu.vector_store %arg15[%c0_39, %c0_40, %c0_41], %86 {strides = array<i32>} : memref<1x1x2048xf32, #tpu.memory_space<vmem>>, vector<1x1x2048xf32>,
    return
  }
  func.func @transform_0(%arg0: i32) -> (i32, i32, i32) {
    %c0_i32 = arith.constant 0 : i32
    %c0_i32_0 = arith.constant 0 : i32
    %c0_i32_1 = arith.constant 0 : i32
    return %arg0, %c0_i32, %c0_i32_0 : i32, i32, i32
  }
  func.func @transform_1(%arg0: i32) -> (i32, i32) {
    %c0_i32 = arith.constant 0 : i32
    %c0_i32_0 = arith.constant 0 : i32
    %c0_i32_1 = arith.constant 0 : i32
    return %c0_i32, %c0_i32_0 : i32, i32
  }
  func.func @transform_2(%arg0: i32) -> (i32, i32) {
    %c0_i32 = arith.constant 0 : i32
    %c0_i32_0 = arith.constant 0 : i32
    %c0_i32_1 = arith.constant 0 : i32
    return %c0_i32, %c0_i32_0 : i32, i32
  }
  func.func @transform_3(%arg0: i32) -> (i32, i32) {
    %c0_i32 = arith.constant 0 : i32
    %c0_i32_0 = arith.constant 0 : i32
    %c0_i32_1 = arith.constant 0 : i32
    return %c0_i32, %c0_i32_0 : i32, i32
  }
  func.func @transform_4(%arg0: i32) -> (i32, i32) {
    %c0_i32 = arith.constant 0 : i32
    %c0_i32_0 = arith.constant 0 : i32
    %c0_i32_1 = arith.constant 0 : i32
    return %c0_i32, %c0_i32_0 : i32, i32
  }
  func.func @transform_5(%arg0: i32) -> (i32, i32) {
    %c0_i32 = arith.constant 0 : i32
    %c0_i32_0 = arith.constant 0 : i32
    %c0_i32_1 = arith.constant 0 : i32
    return %c0_i32, %c0_i32_0 : i32, i32
  }
  func.func @transform_6(%arg0: i32) -> (i32, i32) {
    %c0_i32 = arith.constant 0 : i32
    %c0_i32_0 = arith.constant 0 : i32
    %c0_i32_1 = arith.constant 0 : i32
    return %c0_i32, %c0_i32_0 : i32, i32
  }
  func.func @transform_7(%arg0: i32) -> (i32, i32) {
    %c0_i32 = arith.constant 0 : i32
    %c0_i32_0 = arith.constant 0 : i32
    %c0_i32_1 = arith.constant 0 : i32
    return %c0_i32, %c0_i32_0 : i32, i32
  }
  func.func @transform_8(%arg0: i32) -> (i32, i32) {
    %c0_i32 = arith.constant 0 : i32
    %c0_i32_0 = arith.constant 0 : i32
    %c0_i32_1 = arith.constant 0 : i32
    return %c0_i32, %c0_i32_0 : i32, i32
  }
  func.func @transform_9(%arg0: i32) -> (i32, i32) {
    %c0_i32 = arith.constant 0 : i32
    %c0_i32_0 = arith.constant 0 : i32
    %c0_i32_1 = arith.constant 0 : i32
    return %c0_i32, %c0_i32_0 : i32, i32
  }
  func.func @transform_10(%arg0: i32) -> (i32, i32) {
    %c0_i32 = arith.constant 0 : i32
    %c0_i32_0 = arith.constant 0 : i32
    %c0_i32_1 = arith.constant 0 : i32
    return %c0_i32, %c0_i32_0 : i32, i32
  }
  func.func @transform_11(%arg0: i32) -> (i32, i32) {
    %c0_i32 = arith.constant 0 : i32
    %c0_i32_0 = arith.constant 0 : i32
    %c0_i32_1 = arith.constant 0 : i32
    return %c0_i32, %c0_i32_0 : i32, i32
  }
  func.func @transform_12(%arg0: i32) -> (i32, i32) {
    %c0_i32 = arith.constant 0 : i32
    %c0_i32_0 = arith.constant 0 : i32
    %c0_i32_1 = arith.constant 0 : i32
    return %c0_i32, %c0_i32_0 : i32, i32
  }
  func.func @transform_13(%arg0: i32) -> (i32, i32) {
    %c0_i32 = arith.constant 0 : i32
    %c0_i32_0 = arith.constant 0 : i32
    %c0_i32_1 = arith.constant 0 : i32
    return %c0_i32, %c0_i32_0 : i32, i32
  }
  func.func @transform_14(%arg0: i32) -> (i32, i32, i32) {
    %c0_i32 = arith.constant 0 : i32
    %c0_i32_0 = arith.constant 0 : i32
    %c0_i32_1 = arith.constant 0 : i32
    return %arg0, %c0_i32, %c0_i32_0 : i32, i32, i32
  }
}

module attributes {stable_mosaic.version = 11 : i64} {
  func.func @bottle_block_kernel(%arg0: i32, %arg1: memref<1x64x8xf32, #tpu.memory_space<vmem>>, %arg2: memref<8x32xbf16, #tpu.memory_space<vmem>>, %arg3: memref<1x32xf32, #tpu.memory_space<vmem>>, %arg4: memref<1x32xf32, #tpu.memory_space<vmem>>, %arg5: memref<8x16xbf16, #tpu.memory_space<vmem>>, %arg6: memref<1x16xf32, #tpu.memory_space<vmem>>, %arg7: memref<1x16xf32, #tpu.memory_space<vmem>>, %arg8: memref<16x48xbf16, #tpu.memory_space<vmem>>, %arg9: memref<64x8xf32, #tpu.memory_space<vmem>>, %arg10: memref<1x16xf32, #tpu.memory_space<vmem>>, %arg11: memref<1x16xf32, #tpu.memory_space<vmem>>, %arg12: memref<16x32xbf16, #tpu.memory_space<vmem>>, %arg13: memref<1x32xf32, #tpu.memory_space<vmem>>, %arg14: memref<1x32xf32, #tpu.memory_space<vmem>>, %arg15: memref<1x1x2048xf32, #tpu.memory_space<vmem>>) attributes {dimension_semantics = [#tpu.dimension_semantics<parallel>], iteration_bounds = array<i64: 2>, scalar_prefetch = 0 : i64, scratch_operands = 0 : i64, tpu.core_type = #tpu.core_type<tc>, window_params = [{transform_indices = @transform_0, window_bounds = array<i64: 1, 64, 8>}, {pipeline_mode = #tpu.pipeline_mode<synchronous>, transform_indices = @transform_1, window_bounds = array<i64: 8, 32>}, {pipeline_mode = #tpu.pipeline_mode<synchronous>, transform_indices = @transform_2, window_bounds = array<i64: 1, 32>}, {pipeline_mode = #tpu.pipeline_mode<synchronous>, transform_indices = @transform_3, window_bounds = array<i64: 1, 32>}, {pipeline_mode = #tpu.pipeline_mode<synchronous>, transform_indices = @transform_4, window_bounds = array<i64: 8, 16>}, {pipeline_mode = #tpu.pipeline_mode<synchronous>, transform_indices = @transform_5, window_bounds = array<i64: 1, 16>}, {pipeline_mode = #tpu.pipeline_mode<synchronous>, transform_indices = @transform_6, window_bounds = array<i64: 1, 16>}, {pipeline_mode = #tpu.pipeline_mode<synchronous>, transform_indices = @transform_7, window_bounds = array<i64: 16, 48>}, {pipeline_mode = #tpu.pipeline_mode<synchronous>, transform_indices = @transform_8, window_bounds = array<i64: 64, 8>}, {pipeline_mode = #tpu.pipeline_mode<synchronous>, transform_indices = @transform_9, window_bounds = array<i64: 1, 16>}, {pipeline_mode = #tpu.pipeline_mode<synchronous>, transform_indices = @transform_10, window_bounds = array<i64: 1, 16>}, {pipeline_mode = #tpu.pipeline_mode<synchronous>, transform_indices = @transform_11, window_bounds = array<i64: 16, 32>}, {pipeline_mode = #tpu.pipeline_mode<synchronous>, transform_indices = @transform_12, window_bounds = array<i64: 1, 32>}, {pipeline_mode = #tpu.pipeline_mode<synchronous>, transform_indices = @transform_13, window_bounds = array<i64: 1, 32>}, {transform_indices = @transform_14, window_bounds = array<i64: 1, 1, 2048>}]} {
    %c0 = arith.constant 0 : index
    %c0_0 = arith.constant 0 : index
    %c0_1 = arith.constant 0 : index
    %0 = vector.load %arg1[%c0, %c0_0, %c0_1] : memref<1x64x8xf32, #tpu.memory_space<vmem>>, vector<1x64x8xf32>
    %1 = vector.shape_cast %0 : vector<1x64x8xf32> to vector<64x8xf32>
    %2 = arith.truncf %1 : vector<64x8xf32> to vector<64x8xbf16>
    %c0_2 = arith.constant 0 : index
    %c0_3 = arith.constant 0 : index
    %3 = vector.load %arg2[%c0_2, %c0_3] : memref<8x32xbf16, #tpu.memory_space<vmem>>, vector<8x32xbf16>
    %cst = arith.constant dense<0.000000e+00> : vector<64x32xf32>
    %4 = tpu.matmul %2, %3, %cst {dimension_numbers = #tpu.dot_dimension_numbers<[1], [0], [0], [1], [0, 0, 1, 1], [], []>} : vector<64x8xbf16>, vector<8x32xbf16>, vector<64x32xf32> -> vector<64x32xf32>
    %c0_4 = arith.constant 0 : index
    %c0_5 = arith.constant 0 : index
    %5 = vector.load %arg3[%c0_4, %c0_5] : memref<1x32xf32, #tpu.memory_space<vmem>>, vector<1x32xf32>
    %6 = vector.broadcast %5 : vector<1x32xf32> to vector<64x32xf32>
    %7 = arith.mulf %4, %6 : vector<64x32xf32>
    %c0_6 = arith.constant 0 : index
    %c0_7 = arith.constant 0 : index
    %8 = vector.load %arg4[%c0_6, %c0_7] : memref<1x32xf32, #tpu.memory_space<vmem>>, vector<1x32xf32>
    %9 = vector.broadcast %8 : vector<1x32xf32> to vector<64x32xf32>
    %10 = arith.addf %7, %9 : vector<64x32xf32>
    %cst_8 = arith.constant 0.000000e+00 : f32
    %11 = vector.broadcast %cst_8 : f32 to vector<64x32xf32>
    %12 = arith.maximumf %10, %11 : vector<64x32xf32>
    %c0_9 = arith.constant 0 : index
    %c0_10 = arith.constant 0 : index
    %13 = vector.load %arg5[%c0_9, %c0_10] : memref<8x16xbf16, #tpu.memory_space<vmem>>, vector<8x16xbf16>
    %cst_11 = arith.constant dense<0.000000e+00> : vector<64x16xf32>
    %14 = tpu.matmul %2, %13, %cst_11 {dimension_numbers = #tpu.dot_dimension_numbers<[1], [0], [0], [1], [0, 0, 1, 1], [], []>} : vector<64x8xbf16>, vector<8x16xbf16>, vector<64x16xf32> -> vector<64x16xf32>
    %c0_12 = arith.constant 0 : index
    %c0_13 = arith.constant 0 : index
    %15 = vector.load %arg6[%c0_12, %c0_13] : memref<1x16xf32, #tpu.memory_space<vmem>>, vector<1x16xf32>
    %16 = vector.broadcast %15 : vector<1x16xf32> to vector<64x16xf32>
    %17 = arith.mulf %14, %16 : vector<64x16xf32>
    %c0_14 = arith.constant 0 : index
    %c0_15 = arith.constant 0 : index
    %18 = vector.load %arg7[%c0_14, %c0_15] : memref<1x16xf32, #tpu.memory_space<vmem>>, vector<1x16xf32>
    %19 = vector.broadcast %18 : vector<1x16xf32> to vector<64x16xf32>
    %20 = arith.addf %17, %19 : vector<64x16xf32>
    %cst_16 = arith.constant 0.000000e+00 : f32
    %21 = vector.broadcast %cst_16 : f32 to vector<64x16xf32>
    %22 = arith.maximumf %20, %21 : vector<64x16xf32>
    %23 = arith.truncf %22 : vector<64x16xf32> to vector<64x16xbf16>
    %c0_17 = arith.constant 0 : index
    %c0_18 = arith.constant 0 : index
    %24 = vector.load %arg8[%c0_17, %c0_18] : memref<16x48xbf16, #tpu.memory_space<vmem>>, vector<16x48xbf16>
    %cst_19 = arith.constant dense<0.000000e+00> : vector<64x48xf32>
    %25 = tpu.matmul %23, %24, %cst_19 {dimension_numbers = #tpu.dot_dimension_numbers<[1], [0], [0], [1], [0, 0, 1, 1], [], []>} : vector<64x16xbf16>, vector<16x48xbf16>, vector<64x48xf32> -> vector<64x48xf32>
    %26 = vector.extract_strided_slice %25 {offsets = [0, 0], sizes = [64, 8], strides = [1, 1]} : vector<64x48xf32> to vector<64x8xf32>
    %27 = vector.shape_cast %26 : vector<64x8xf32> to vector<1x64x8xf32>
    %28 = vector.extract_strided_slice %25 {offsets = [0, 8], sizes = [64, 8], strides = [1, 1]} : vector<64x48xf32> to vector<64x8xf32>
    %29 = vector.shape_cast %28 : vector<64x8xf32> to vector<1x64x8xf32>
    %30 = tpu.concatenate %27, %29 in 0 : vector<1x64x8xf32>, vector<1x64x8xf32> -> vector<2x64x8xf32>
    %31 = vector.extract_strided_slice %25 {offsets = [0, 16], sizes = [64, 8], strides = [1, 1]} : vector<64x48xf32> to vector<64x8xf32>
    %32 = vector.shape_cast %31 : vector<64x8xf32> to vector<1x64x8xf32>
    %33 = vector.extract_strided_slice %25 {offsets = [0, 24], sizes = [64, 8], strides = [1, 1]} : vector<64x48xf32> to vector<64x8xf32>
    %34 = vector.shape_cast %33 : vector<64x8xf32> to vector<1x64x8xf32>
    %35 = tpu.concatenate %32, %34 in 0 : vector<1x64x8xf32>, vector<1x64x8xf32> -> vector<2x64x8xf32>
    %c0_20 = arith.constant 0 : index
    %c0_21 = arith.constant 0 : index
    %36 = vector.load %arg9[%c0_20, %c0_21] : memref<64x8xf32, #tpu.memory_space<vmem>>, vector<64x8xf32>
    %37 = vector.shape_cast %36 : vector<64x8xf32> to vector<1x64x8xf32>
    %38 = vector.broadcast %37 : vector<1x64x8xf32> to vector<2x64x8xf32>
    %39 = arith.addf %35, %38 : vector<2x64x8xf32>
    %40 = vector.extract_strided_slice %25 {offsets = [0, 32], sizes = [64, 8], strides = [1, 1]} : vector<64x48xf32> to vector<64x8xf32>
    %41 = vector.shape_cast %40 : vector<64x8xf32> to vector<1x64x8xf32>
    %42 = vector.extract_strided_slice %25 {offsets = [0, 40], sizes = [64, 8], strides = [1, 1]} : vector<64x48xf32> to vector<64x8xf32>
    %43 = vector.shape_cast %42 : vector<64x8xf32> to vector<1x64x8xf32>
    %44 = tpu.concatenate %41, %43 in 0 : vector<1x64x8xf32>, vector<1x64x8xf32> -> vector<2x64x8xf32>
    %45 = arith.truncf %30 : vector<2x64x8xf32> to vector<2x64x8xbf16>
    %46 = arith.truncf %39 : vector<2x64x8xf32> to vector<2x64x8xbf16>
    "tpu.trace_start"() <{level = 10 : i32, message = "gid,gjd->gij"}> : () -> ()
    %cst_22 = arith.constant dense<0.000000e+00> : vector<2x64x64xf32>
    %47 = tpu.matmul %45, %46, %cst_22 {dimension_numbers = #tpu.dot_dimension_numbers<[2], [2], [1], [1], [0, 0, 0, 1, 1, 1], [0], [0]>} : vector<2x64x8xbf16>, vector<2x64x8xbf16>, vector<2x64x64xf32> -> vector<2x64x64xf32>
    "tpu.trace_stop"() : () -> ()
    %cst_23 = arith.constant dense<0xFF800000> : vector<2x64xf32>
    %48 = vector.multi_reduction <maximumf>, %47, %cst_23 [2] : vector<2x64x64xf32> to vector<2x64xf32>
    %49 = vector.shape_cast %48 : vector<2x64xf32> to vector<2x64x1xf32>
    %50 = vector.broadcast %49 : vector<2x64x1xf32> to vector<2x64x64xf32>
    %51 = arith.subf %47, %50 : vector<2x64x64xf32>
    %52 = math.exp %51 : vector<2x64x64xf32>
    %cst_24 = arith.constant dense<0.000000e+00> : vector<2x64xf32>
    %53 = vector.multi_reduction <add>, %52, %cst_24 [2] : vector<2x64x64xf32> to vector<2x64xf32>
    %54 = vector.shape_cast %53 : vector<2x64xf32> to vector<2x64x1xf32>
    %55 = tpu.reciprocal %54 {approx = true} : vector<2x64x1xf32> -> vector<2x64x1xf32>
    %56 = vector.broadcast %55 : vector<2x64x1xf32> to vector<2x64x64xf32>
    %57 = arith.mulf %52, %56 : vector<2x64x64xf32>
    %58 = arith.truncf %57 : vector<2x64x64xf32> to vector<2x64x64xbf16>
    %59 = arith.truncf %44 : vector<2x64x8xf32> to vector<2x64x8xbf16>
    "tpu.trace_start"() <{level = 10 : i32, message = "gij,gjd->gid"}> : () -> ()
    %cst_25 = arith.constant dense<0.000000e+00> : vector<2x64x8xf32>
    %60 = tpu.matmul %58, %59, %cst_25 {dimension_numbers = #tpu.dot_dimension_numbers<[2], [1], [1], [2], [0, 0, 0, 1, 1, 2], [0], [0]>} : vector<2x64x64xbf16>, vector<2x64x8xbf16>, vector<2x64x8xf32> -> vector<2x64x8xf32>
    "tpu.trace_stop"() : () -> ()
    %61 = vector.extract_strided_slice %60 {offsets = [0, 0, 0], sizes = [1, 64, 8], strides = [1, 1, 1]} : vector<2x64x8xf32> to vector<1x64x8xf32>
    %62 = vector.shape_cast %61 : vector<1x64x8xf32> to vector<64x8xf32>
    %63 = vector.extract_strided_slice %60 {offsets = [1, 0, 0], sizes = [1, 64, 8], strides = [1, 1, 1]} : vector<2x64x8xf32> to vector<1x64x8xf32>
    %64 = vector.shape_cast %63 : vector<1x64x8xf32> to vector<64x8xf32>
    %65 = tpu.concatenate %62, %64 in 1 : vector<64x8xf32>, vector<64x8xf32> -> vector<64x16xf32>
    %c0_26 = arith.constant 0 : index
    %c0_27 = arith.constant 0 : index
    %66 = vector.load %arg10[%c0_26, %c0_27] : memref<1x16xf32, #tpu.memory_space<vmem>>, vector<1x16xf32>
    %67 = vector.broadcast %66 : vector<1x16xf32> to vector<64x16xf32>
    %68 = arith.mulf %65, %67 : vector<64x16xf32>
    %c0_28 = arith.constant 0 : index
    %c0_29 = arith.constant 0 : index
    %69 = vector.load %arg11[%c0_28, %c0_29] : memref<1x16xf32, #tpu.memory_space<vmem>>, vector<1x16xf32>
    %70 = vector.broadcast %69 : vector<1x16xf32> to vector<64x16xf32>
    %71 = arith.addf %68, %70 : vector<64x16xf32>
    %cst_30 = arith.constant 0.000000e+00 : f32
    %72 = vector.broadcast %cst_30 : f32 to vector<64x16xf32>
    %73 = arith.maximumf %71, %72 : vector<64x16xf32>
    %74 = arith.truncf %73 : vector<64x16xf32> to vector<64x16xbf16>
    %c0_31 = arith.constant 0 : index
    %c0_32 = arith.constant 0 : index
    %75 = vector.load %arg12[%c0_31, %c0_32] : memref<16x32xbf16, #tpu.memory_space<vmem>>, vector<16x32xbf16>
    %cst_33 = arith.constant dense<0.000000e+00> : vector<64x32xf32>
    %76 = tpu.matmul %74, %75, %cst_33 {dimension_numbers = #tpu.dot_dimension_numbers<[1], [0], [0], [1], [0, 0, 1, 1], [], []>} : vector<64x16xbf16>, vector<16x32xbf16>, vector<64x32xf32> -> vector<64x32xf32>
    %c0_34 = arith.constant 0 : index
    %c0_35 = arith.constant 0 : index
    %77 = vector.load %arg13[%c0_34, %c0_35] : memref<1x32xf32, #tpu.memory_space<vmem>>, vector<1x32xf32>
    %78 = vector.broadcast %77 : vector<1x32xf32> to vector<64x32xf32>
    %79 = arith.mulf %76, %78 : vector<64x32xf32>
    %c0_36 = arith.constant 0 : index
    %c0_37 = arith.constant 0 : index
    %80 = vector.load %arg14[%c0_36, %c0_37] : memref<1x32xf32, #tpu.memory_space<vmem>>, vector<1x32xf32>
    %81 = vector.broadcast %80 : vector<1x32xf32> to vector<64x32xf32>
    %82 = arith.addf %79, %81 : vector<64x32xf32>
    %83 = arith.addf %82, %12 : vector<64x32xf32>
    %cst_38 = arith.constant 0.000000e+00 : f32
    %84 = vector.broadcast %cst_38 : f32 to vector<64x32xf32>
    %85 = arith.maximumf %83, %84 : vector<64x32xf32>
    %86 = vector.shape_cast %85 : vector<64x32xf32> to vector<1x1x2048xf32>
    %c0_39 = arith.constant 0 : index
    %c0_40 = arith.constant 0 : index
    %c0_41 = arith.constant 0 : index
    %87 = vector.load %arg15[%c0_39, %c0_40, %c0_41] : memref<1x1x2048xf32, #tpu.memory_space<vmem>>, vector<1x1x2048xf32>
    tpu.vector_store %arg15[%c0_39, %c0_40, %c0_41], %86 {strides = array<i32>} : memref<1x1x2048xf32, #tpu.memory_space<vmem>>, vector<1x1x2048xf32>,
    return
  }
  func.func @transform_0(%arg0: i32) -> (i32, i32, i32) {
    %c0_i32 = arith.constant 0 : i32
    %c0_i32_0 = arith.constant 0 : i32
    %c0_i32_1 = arith.constant 0 : i32
    return %arg0, %c0_i32, %c0_i32_0 : i32, i32, i32
  }
  func.func @transform_1(%arg0: i32) -> (i32, i32) {
    %c0_i32 = arith.constant 0 : i32
    %c0_i32_0 = arith.constant 0 : i32
    %c0_i32_1 = arith.constant 0 : i32
    return %c0_i32, %c0_i32_0 : i32, i32
  }
  func.func @transform_2(%arg0: i32) -> (i32, i32) {
    %c0_i32 = arith.constant 0 : i32
    %c0_i32_0 = arith.constant 0 : i32
    %c0_i32_1 = arith.constant 0 : i32
    return %c0_i32, %c0_i32_0 : i32, i32
  }
  func.func @transform_3(%arg0: i32) -> (i32, i32) {
    %c0_i32 = arith.constant 0 : i32
    %c0_i32_0 = arith.constant 0 : i32
    %c0_i32_1 = arith.constant 0 : i32
    return %c0_i32, %c0_i32_0 : i32, i32
  }
  func.func @transform_4(%arg0: i32) -> (i32, i32) {
    %c0_i32 = arith.constant 0 : i32
    %c0_i32_0 = arith.constant 0 : i32
    %c0_i32_1 = arith.constant 0 : i32
    return %c0_i32, %c0_i32_0 : i32, i32
  }
  func.func @transform_5(%arg0: i32) -> (i32, i32) {
    %c0_i32 = arith.constant 0 : i32
    %c0_i32_0 = arith.constant 0 : i32
    %c0_i32_1 = arith.constant 0 : i32
    return %c0_i32, %c0_i32_0 : i32, i32
  }
  func.func @transform_6(%arg0: i32) -> (i32, i32) {
    %c0_i32 = arith.constant 0 : i32
    %c0_i32_0 = arith.constant 0 : i32
    %c0_i32_1 = arith.constant 0 : i32
    return %c0_i32, %c0_i32_0 : i32, i32
  }
  func.func @transform_7(%arg0: i32) -> (i32, i32) {
    %c0_i32 = arith.constant 0 : i32
    %c0_i32_0 = arith.constant 0 : i32
    %c0_i32_1 = arith.constant 0 : i32
    return %c0_i32, %c0_i32_0 : i32, i32
  }
  func.func @transform_8(%arg0: i32) -> (i32, i32) {
    %c0_i32 = arith.constant 0 : i32
    %c0_i32_0 = arith.constant 0 : i32
    %c0_i32_1 = arith.constant 0 : i32
    return %c0_i32, %c0_i32_0 : i32, i32
  }
  func.func @transform_9(%arg0: i32) -> (i32, i32) {
    %c0_i32 = arith.constant 0 : i32
    %c0_i32_0 = arith.constant 0 : i32
    %c0_i32_1 = arith.constant 0 : i32
    return %c0_i32, %c0_i32_0 : i32, i32
  }
  func.func @transform_10(%arg0: i32) -> (i32, i32) {
    %c0_i32 = arith.constant 0 : i32
    %c0_i32_0 = arith.constant 0 : i32
    %c0_i32_1 = arith.constant 0 : i32
    return %c0_i32, %c0_i32_0 : i32, i32
  }
  func.func @transform_11(%arg0: i32) -> (i32, i32) {
    %c0_i32 = arith.constant 0 : i32
    %c0_i32_0 = arith.constant 0 : i32
    %c0_i32_1 = arith.constant 0 : i32
    return %c0_i32, %c0_i32_0 : i32, i32
  }
  func.func @transform_12(%arg0: i32) -> (i32, i32) {
    %c0_i32 = arith.constant 0 : i32
    %c0_i32_0 = arith.constant 0 : i32
    %c0_i32_1 = arith.constant 0 : i32
    return %c0_i32, %c0_i32_0 : i32, i32
  }
  func.func @transform_13(%arg0: i32) -> (i32, i32) {
    %c0_i32 = arith.constant 0 : i32
    %c0_i32_0 = arith.constant 0 : i32
    %c0_i32_1 = arith.constant 0 : i32
    return %c0_i32, %c0_i32_0 : i32, i32
  }
  func.func @transform_14(%arg0: i32) -> (i32, i32, i32) {
    %c0_i32 = arith.constant 0 : i32
    %c0_i32_0 = arith.constant 0 : i32
    %c0_i32_1 = arith.constant 0 : i32
    return %arg0, %c0_i32, %c0_i32_0 : i32, i32, i32
  }
}

module attributes {stable_mosaic.version = 11 : i64} {
  func.func @bottle_block_kernel(%arg0: i32, %arg1: memref<1x64x8xf32, #tpu.memory_space<vmem>>, %arg2: memref<8x32xbf16, #tpu.memory_space<vmem>>, %arg3: memref<1x32xf32, #tpu.memory_space<vmem>>, %arg4: memref<1x32xf32, #tpu.memory_space<vmem>>, %arg5: memref<8x16xbf16, #tpu.memory_space<vmem>>, %arg6: memref<1x16xf32, #tpu.memory_space<vmem>>, %arg7: memref<1x16xf32, #tpu.memory_space<vmem>>, %arg8: memref<16x48xbf16, #tpu.memory_space<vmem>>, %arg9: memref<64x8xf32, #tpu.memory_space<vmem>>, %arg10: memref<1x16xf32, #tpu.memory_space<vmem>>, %arg11: memref<1x16xf32, #tpu.memory_space<vmem>>, %arg12: memref<16x32xbf16, #tpu.memory_space<vmem>>, %arg13: memref<1x32xf32, #tpu.memory_space<vmem>>, %arg14: memref<1x32xf32, #tpu.memory_space<vmem>>, %arg15: memref<1x64x32xf32, #tpu.memory_space<vmem>>) attributes {dimension_semantics = [#tpu.dimension_semantics<parallel>], iteration_bounds = array<i64: 2>, scalar_prefetch = 0 : i64, scratch_operands = 0 : i64, tpu.core_type = #tpu.core_type<tc>, window_params = [{transform_indices = @transform_0, window_bounds = array<i64: 1, 64, 8>}, {pipeline_mode = #tpu.pipeline_mode<synchronous>, transform_indices = @transform_1, window_bounds = array<i64: 8, 32>}, {pipeline_mode = #tpu.pipeline_mode<synchronous>, transform_indices = @transform_2, window_bounds = array<i64: 1, 32>}, {pipeline_mode = #tpu.pipeline_mode<synchronous>, transform_indices = @transform_3, window_bounds = array<i64: 1, 32>}, {pipeline_mode = #tpu.pipeline_mode<synchronous>, transform_indices = @transform_4, window_bounds = array<i64: 8, 16>}, {pipeline_mode = #tpu.pipeline_mode<synchronous>, transform_indices = @transform_5, window_bounds = array<i64: 1, 16>}, {pipeline_mode = #tpu.pipeline_mode<synchronous>, transform_indices = @transform_6, window_bounds = array<i64: 1, 16>}, {pipeline_mode = #tpu.pipeline_mode<synchronous>, transform_indices = @transform_7, window_bounds = array<i64: 16, 48>}, {pipeline_mode = #tpu.pipeline_mode<synchronous>, transform_indices = @transform_8, window_bounds = array<i64: 64, 8>}, {pipeline_mode = #tpu.pipeline_mode<synchronous>, transform_indices = @transform_9, window_bounds = array<i64: 1, 16>}, {pipeline_mode = #tpu.pipeline_mode<synchronous>, transform_indices = @transform_10, window_bounds = array<i64: 1, 16>}, {pipeline_mode = #tpu.pipeline_mode<synchronous>, transform_indices = @transform_11, window_bounds = array<i64: 16, 32>}, {pipeline_mode = #tpu.pipeline_mode<synchronous>, transform_indices = @transform_12, window_bounds = array<i64: 1, 32>}, {pipeline_mode = #tpu.pipeline_mode<synchronous>, transform_indices = @transform_13, window_bounds = array<i64: 1, 32>}, {transform_indices = @transform_14, window_bounds = array<i64: 1, 64, 32>}]} {
    %c0 = arith.constant 0 : index
    %c0_0 = arith.constant 0 : index
    %c0_1 = arith.constant 0 : index
    %0 = vector.load %arg1[%c0, %c0_0, %c0_1] : memref<1x64x8xf32, #tpu.memory_space<vmem>>, vector<1x64x8xf32>
    %1 = vector.shape_cast %0 : vector<1x64x8xf32> to vector<64x8xf32>
    %2 = arith.truncf %1 : vector<64x8xf32> to vector<64x8xbf16>
    %c0_2 = arith.constant 0 : index
    %c0_3 = arith.constant 0 : index
    %3 = vector.load %arg2[%c0_2, %c0_3] : memref<8x32xbf16, #tpu.memory_space<vmem>>, vector<8x32xbf16>
    %cst = arith.constant dense<0.000000e+00> : vector<64x32xf32>
    %4 = tpu.matmul %2, %3, %cst {dimension_numbers = #tpu.dot_dimension_numbers<[1], [0], [0], [1], [0, 0, 1, 1], [], []>} : vector<64x8xbf16>, vector<8x32xbf16>, vector<64x32xf32> -> vector<64x32xf32>
    %c0_4 = arith.constant 0 : index
    %c0_5 = arith.constant 0 : index
    %5 = vector.load %arg3[%c0_4, %c0_5] : memref<1x32xf32, #tpu.memory_space<vmem>>, vector<1x32xf32>
    %6 = vector.broadcast %5 : vector<1x32xf32> to vector<64x32xf32>
    %7 = arith.mulf %4, %6 : vector<64x32xf32>
    %c0_6 = arith.constant 0 : index
    %c0_7 = arith.constant 0 : index
    %8 = vector.load %arg4[%c0_6, %c0_7] : memref<1x32xf32, #tpu.memory_space<vmem>>, vector<1x32xf32>
    %9 = vector.broadcast %8 : vector<1x32xf32> to vector<64x32xf32>
    %10 = arith.addf %7, %9 : vector<64x32xf32>
    %cst_8 = arith.constant 0.000000e+00 : f32
    %11 = vector.broadcast %cst_8 : f32 to vector<64x32xf32>
    %12 = arith.maximumf %10, %11 : vector<64x32xf32>
    %c0_9 = arith.constant 0 : index
    %c0_10 = arith.constant 0 : index
    %13 = vector.load %arg5[%c0_9, %c0_10] : memref<8x16xbf16, #tpu.memory_space<vmem>>, vector<8x16xbf16>
    %cst_11 = arith.constant dense<0.000000e+00> : vector<64x16xf32>
    %14 = tpu.matmul %2, %13, %cst_11 {dimension_numbers = #tpu.dot_dimension_numbers<[1], [0], [0], [1], [0, 0, 1, 1], [], []>} : vector<64x8xbf16>, vector<8x16xbf16>, vector<64x16xf32> -> vector<64x16xf32>
    %c0_12 = arith.constant 0 : index
    %c0_13 = arith.constant 0 : index
    %15 = vector.load %arg6[%c0_12, %c0_13] : memref<1x16xf32, #tpu.memory_space<vmem>>, vector<1x16xf32>
    %16 = vector.broadcast %15 : vector<1x16xf32> to vector<64x16xf32>
    %17 = arith.mulf %14, %16 : vector<64x16xf32>
    %c0_14 = arith.constant 0 : index
    %c0_15 = arith.constant 0 : index
    %18 = vector.load %arg7[%c0_14, %c0_15] : memref<1x16xf32, #tpu.memory_space<vmem>>, vector<1x16xf32>
    %19 = vector.broadcast %18 : vector<1x16xf32> to vector<64x16xf32>
    %20 = arith.addf %17, %19 : vector<64x16xf32>
    %cst_16 = arith.constant 0.000000e+00 : f32
    %21 = vector.broadcast %cst_16 : f32 to vector<64x16xf32>
    %22 = arith.maximumf %20, %21 : vector<64x16xf32>
    %23 = arith.truncf %22 : vector<64x16xf32> to vector<64x16xbf16>
    %c0_17 = arith.constant 0 : index
    %c0_18 = arith.constant 0 : index
    %24 = vector.load %arg8[%c0_17, %c0_18] : memref<16x48xbf16, #tpu.memory_space<vmem>>, vector<16x48xbf16>
    %cst_19 = arith.constant dense<0.000000e+00> : vector<64x48xf32>
    %25 = tpu.matmul %23, %24, %cst_19 {dimension_numbers = #tpu.dot_dimension_numbers<[1], [0], [0], [1], [0, 0, 1, 1], [], []>} : vector<64x16xbf16>, vector<16x48xbf16>, vector<64x48xf32> -> vector<64x48xf32>
    %26 = vector.extract_strided_slice %25 {offsets = [0, 0], sizes = [64, 8], strides = [1, 1]} : vector<64x48xf32> to vector<64x8xf32>
    %27 = vector.shape_cast %26 : vector<64x8xf32> to vector<1x64x8xf32>
    %28 = vector.extract_strided_slice %25 {offsets = [0, 8], sizes = [64, 8], strides = [1, 1]} : vector<64x48xf32> to vector<64x8xf32>
    %29 = vector.shape_cast %28 : vector<64x8xf32> to vector<1x64x8xf32>
    %30 = tpu.concatenate %27, %29 in 0 : vector<1x64x8xf32>, vector<1x64x8xf32> -> vector<2x64x8xf32>
    %31 = vector.extract_strided_slice %25 {offsets = [0, 16], sizes = [64, 8], strides = [1, 1]} : vector<64x48xf32> to vector<64x8xf32>
    %32 = vector.shape_cast %31 : vector<64x8xf32> to vector<1x64x8xf32>
    %33 = vector.extract_strided_slice %25 {offsets = [0, 24], sizes = [64, 8], strides = [1, 1]} : vector<64x48xf32> to vector<64x8xf32>
    %34 = vector.shape_cast %33 : vector<64x8xf32> to vector<1x64x8xf32>
    %35 = tpu.concatenate %32, %34 in 0 : vector<1x64x8xf32>, vector<1x64x8xf32> -> vector<2x64x8xf32>
    %c0_20 = arith.constant 0 : index
    %c0_21 = arith.constant 0 : index
    %36 = vector.load %arg9[%c0_20, %c0_21] : memref<64x8xf32, #tpu.memory_space<vmem>>, vector<64x8xf32>
    %37 = vector.shape_cast %36 : vector<64x8xf32> to vector<1x64x8xf32>
    %38 = vector.broadcast %37 : vector<1x64x8xf32> to vector<2x64x8xf32>
    %39 = arith.addf %35, %38 : vector<2x64x8xf32>
    %40 = vector.extract_strided_slice %25 {offsets = [0, 32], sizes = [64, 8], strides = [1, 1]} : vector<64x48xf32> to vector<64x8xf32>
    %41 = vector.shape_cast %40 : vector<64x8xf32> to vector<1x64x8xf32>
    %42 = vector.extract_strided_slice %25 {offsets = [0, 40], sizes = [64, 8], strides = [1, 1]} : vector<64x48xf32> to vector<64x8xf32>
    %43 = vector.shape_cast %42 : vector<64x8xf32> to vector<1x64x8xf32>
    %44 = tpu.concatenate %41, %43 in 0 : vector<1x64x8xf32>, vector<1x64x8xf32> -> vector<2x64x8xf32>
    %45 = arith.truncf %30 : vector<2x64x8xf32> to vector<2x64x8xbf16>
    %46 = arith.truncf %39 : vector<2x64x8xf32> to vector<2x64x8xbf16>
    "tpu.trace_start"() <{level = 10 : i32, message = "gid,gjd->gij"}> : () -> ()
    %cst_22 = arith.constant dense<0.000000e+00> : vector<2x64x64xf32>
    %47 = tpu.matmul %45, %46, %cst_22 {dimension_numbers = #tpu.dot_dimension_numbers<[2], [2], [1], [1], [0, 0, 0, 1, 1, 1], [0], [0]>} : vector<2x64x8xbf16>, vector<2x64x8xbf16>, vector<2x64x64xf32> -> vector<2x64x64xf32>
    "tpu.trace_stop"() : () -> ()
    %cst_23 = arith.constant dense<0xFF800000> : vector<2x64xf32>
    %48 = vector.multi_reduction <maximumf>, %47, %cst_23 [2] : vector<2x64x64xf32> to vector<2x64xf32>
    %49 = vector.shape_cast %48 : vector<2x64xf32> to vector<2x64x1xf32>
    %50 = vector.broadcast %49 : vector<2x64x1xf32> to vector<2x64x64xf32>
    %51 = arith.subf %47, %50 : vector<2x64x64xf32>
    %52 = math.exp %51 : vector<2x64x64xf32>
    %cst_24 = arith.constant dense<0.000000e+00> : vector<2x64xf32>
    %53 = vector.multi_reduction <add>, %52, %cst_24 [2] : vector<2x64x64xf32> to vector<2x64xf32>
    %54 = vector.shape_cast %53 : vector<2x64xf32> to vector<2x64x1xf32>
    %55 = tpu.reciprocal %54 {approx = true} : vector<2x64x1xf32> -> vector<2x64x1xf32>
    %56 = vector.broadcast %55 : vector<2x64x1xf32> to vector<2x64x64xf32>
    %57 = arith.mulf %52, %56 : vector<2x64x64xf32>
    %58 = arith.truncf %57 : vector<2x64x64xf32> to vector<2x64x64xbf16>
    %59 = arith.truncf %44 : vector<2x64x8xf32> to vector<2x64x8xbf16>
    "tpu.trace_start"() <{level = 10 : i32, message = "gij,gjd->gid"}> : () -> ()
    %cst_25 = arith.constant dense<0.000000e+00> : vector<2x64x8xf32>
    %60 = tpu.matmul %58, %59, %cst_25 {dimension_numbers = #tpu.dot_dimension_numbers<[2], [1], [1], [2], [0, 0, 0, 1, 1, 2], [0], [0]>} : vector<2x64x64xbf16>, vector<2x64x8xbf16>, vector<2x64x8xf32> -> vector<2x64x8xf32>
    "tpu.trace_stop"() : () -> ()
    %61 = vector.extract_strided_slice %60 {offsets = [0, 0, 0], sizes = [1, 64, 8], strides = [1, 1, 1]} : vector<2x64x8xf32> to vector<1x64x8xf32>
    %62 = vector.shape_cast %61 : vector<1x64x8xf32> to vector<64x8xf32>
    %63 = vector.extract_strided_slice %60 {offsets = [1, 0, 0], sizes = [1, 64, 8], strides = [1, 1, 1]} : vector<2x64x8xf32> to vector<1x64x8xf32>
    %64 = vector.shape_cast %63 : vector<1x64x8xf32> to vector<64x8xf32>
    %65 = tpu.concatenate %62, %64 in 1 : vector<64x8xf32>, vector<64x8xf32> -> vector<64x16xf32>
    %c0_26 = arith.constant 0 : index
    %c0_27 = arith.constant 0 : index
    %66 = vector.load %arg10[%c0_26, %c0_27] : memref<1x16xf32, #tpu.memory_space<vmem>>, vector<1x16xf32>
    %67 = vector.broadcast %66 : vector<1x16xf32> to vector<64x16xf32>
    %68 = arith.mulf %65, %67 : vector<64x16xf32>
    %c0_28 = arith.constant 0 : index
    %c0_29 = arith.constant 0 : index
    %69 = vector.load %arg11[%c0_28, %c0_29] : memref<1x16xf32, #tpu.memory_space<vmem>>, vector<1x16xf32>
    %70 = vector.broadcast %69 : vector<1x16xf32> to vector<64x16xf32>
    %71 = arith.addf %68, %70 : vector<64x16xf32>
    %cst_30 = arith.constant 0.000000e+00 : f32
    %72 = vector.broadcast %cst_30 : f32 to vector<64x16xf32>
    %73 = arith.maximumf %71, %72 : vector<64x16xf32>
    %74 = arith.truncf %73 : vector<64x16xf32> to vector<64x16xbf16>
    %c0_31 = arith.constant 0 : index
    %c0_32 = arith.constant 0 : index
    %75 = vector.load %arg12[%c0_31, %c0_32] : memref<16x32xbf16, #tpu.memory_space<vmem>>, vector<16x32xbf16>
    %cst_33 = arith.constant dense<0.000000e+00> : vector<64x32xf32>
    %76 = tpu.matmul %74, %75, %cst_33 {dimension_numbers = #tpu.dot_dimension_numbers<[1], [0], [0], [1], [0, 0, 1, 1], [], []>} : vector<64x16xbf16>, vector<16x32xbf16>, vector<64x32xf32> -> vector<64x32xf32>
    %c0_34 = arith.constant 0 : index
    %c0_35 = arith.constant 0 : index
    %77 = vector.load %arg13[%c0_34, %c0_35] : memref<1x32xf32, #tpu.memory_space<vmem>>, vector<1x32xf32>
    %78 = vector.broadcast %77 : vector<1x32xf32> to vector<64x32xf32>
    %79 = arith.mulf %76, %78 : vector<64x32xf32>
    %c0_36 = arith.constant 0 : index
    %c0_37 = arith.constant 0 : index
    %80 = vector.load %arg14[%c0_36, %c0_37] : memref<1x32xf32, #tpu.memory_space<vmem>>, vector<1x32xf32>
    %81 = vector.broadcast %80 : vector<1x32xf32> to vector<64x32xf32>
    %82 = arith.addf %79, %81 : vector<64x32xf32>
    %83 = arith.addf %82, %12 : vector<64x32xf32>
    %cst_38 = arith.constant 0.000000e+00 : f32
    %84 = vector.broadcast %cst_38 : f32 to vector<64x32xf32>
    %85 = arith.maximumf %83, %84 : vector<64x32xf32>
    %86 = vector.shape_cast %85 : vector<64x32xf32> to vector<1x64x32xf32>
    %c0_39 = arith.constant 0 : index
    %c0_40 = arith.constant 0 : index
    %c0_41 = arith.constant 0 : index
    %87 = vector.load %arg15[%c0_39, %c0_40, %c0_41] : memref<1x64x32xf32, #tpu.memory_space<vmem>>, vector<1x64x32xf32>
    tpu.vector_store %arg15[%c0_39, %c0_40, %c0_41], %86 {strides = array<i32>} : memref<1x64x32xf32, #tpu.memory_space<vmem>>, vector<1x64x32xf32>,
    return
  }
  func.func @transform_0(%arg0: i32) -> (i32, i32, i32) {
    %c0_i32 = arith.constant 0 : i32
    %c0_i32_0 = arith.constant 0 : i32
    %c0_i32_1 = arith.constant 0 : i32
    return %arg0, %c0_i32, %c0_i32_0 : i32, i32, i32
  }
  func.func @transform_1(%arg0: i32) -> (i32, i32) {
    %c0_i32 = arith.constant 0 : i32
    %c0_i32_0 = arith.constant 0 : i32
    %c0_i32_1 = arith.constant 0 : i32
    return %c0_i32, %c0_i32_0 : i32, i32
  }
  func.func @transform_2(%arg0: i32) -> (i32, i32) {
    %c0_i32 = arith.constant 0 : i32
    %c0_i32_0 = arith.constant 0 : i32
    %c0_i32_1 = arith.constant 0 : i32
    return %c0_i32, %c0_i32_0 : i32, i32
  }
  func.func @transform_3(%arg0: i32) -> (i32, i32) {
    %c0_i32 = arith.constant 0 : i32
    %c0_i32_0 = arith.constant 0 : i32
    %c0_i32_1 = arith.constant 0 : i32
    return %c0_i32, %c0_i32_0 : i32, i32
  }
  func.func @transform_4(%arg0: i32) -> (i32, i32) {
    %c0_i32 = arith.constant 0 : i32
    %c0_i32_0 = arith.constant 0 : i32
    %c0_i32_1 = arith.constant 0 : i32
    return %c0_i32, %c0_i32_0 : i32, i32
  }
  func.func @transform_5(%arg0: i32) -> (i32, i32) {
    %c0_i32 = arith.constant 0 : i32
    %c0_i32_0 = arith.constant 0 : i32
    %c0_i32_1 = arith.constant 0 : i32
    return %c0_i32, %c0_i32_0 : i32, i32
  }
  func.func @transform_6(%arg0: i32) -> (i32, i32) {
    %c0_i32 = arith.constant 0 : i32
    %c0_i32_0 = arith.constant 0 : i32
    %c0_i32_1 = arith.constant 0 : i32
    return %c0_i32, %c0_i32_0 : i32, i32
  }
  func.func @transform_7(%arg0: i32) -> (i32, i32) {
    %c0_i32 = arith.constant 0 : i32
    %c0_i32_0 = arith.constant 0 : i32
    %c0_i32_1 = arith.constant 0 : i32
    return %c0_i32, %c0_i32_0 : i32, i32
  }
  func.func @transform_8(%arg0: i32) -> (i32, i32) {
    %c0_i32 = arith.constant 0 : i32
    %c0_i32_0 = arith.constant 0 : i32
    %c0_i32_1 = arith.constant 0 : i32
    return %c0_i32, %c0_i32_0 : i32, i32
  }
  func.func @transform_9(%arg0: i32) -> (i32, i32) {
    %c0_i32 = arith.constant 0 : i32
    %c0_i32_0 = arith.constant 0 : i32
    %c0_i32_1 = arith.constant 0 : i32
    return %c0_i32, %c0_i32_0 : i32, i32
  }
  func.func @transform_10(%arg0: i32) -> (i32, i32) {
    %c0_i32 = arith.constant 0 : i32
    %c0_i32_0 = arith.constant 0 : i32
    %c0_i32_1 = arith.constant 0 : i32
    return %c0_i32, %c0_i32_0 : i32, i32
  }
  func.func @transform_11(%arg0: i32) -> (i32, i32) {
    %c0_i32 = arith.constant 0 : i32
    %c0_i32_0 = arith.constant 0 : i32
    %c0_i32_1 = arith.constant 0 : i32
    return %c0_i32, %c0_i32_0 : i32, i32
  }
  func.func @transform_12(%arg0: i32) -> (i32, i32) {
    %c0_i32 = arith.constant 0 : i32
    %c0_i32_0 = arith.constant 0 : i32
    %c0_i32_1 = arith.constant 0 : i32
    return %c0_i32, %c0_i32_0 : i32, i32
  }
  func.func @transform_13(%arg0: i32) -> (i32, i32) {
    %c0_i32 = arith.constant 0 : i32
    %c0_i32_0 = arith.constant 0 : i32
    %c0_i32_1 = arith.constant 0 : i32
    return %c0_i32, %c0_i32_0 : i32, i32
  }
  func.func @transform_14(%arg0: i32) -> (i32, i32, i32) {
    %c0_i32 = arith.constant 0 : i32
    %c0_i32_0 = arith.constant 0 : i32
    %c0_i32_1 = arith.constant 0 : i32
    return %arg0, %c0_i32, %c0_i32_0 : i32, i32, i32
  }
}

module attributes {stable_mosaic.version = 11 : i64} {
  func.func @bottle_block_kernel(%arg0: i32, %arg1: memref<1x64x8xf32, #tpu.memory_space<vmem>>, %arg2: memref<8x32xbf16, #tpu.memory_space<vmem>>, %arg3: memref<1x32xf32, #tpu.memory_space<vmem>>, %arg4: memref<1x32xf32, #tpu.memory_space<vmem>>, %arg5: memref<8x16xbf16, #tpu.memory_space<vmem>>, %arg6: memref<1x16xf32, #tpu.memory_space<vmem>>, %arg7: memref<1x16xf32, #tpu.memory_space<vmem>>, %arg8: memref<16x48xbf16, #tpu.memory_space<vmem>>, %arg9: memref<64x8xf32, #tpu.memory_space<vmem>>, %arg10: memref<1x16xf32, #tpu.memory_space<vmem>>, %arg11: memref<1x16xf32, #tpu.memory_space<vmem>>, %arg12: memref<16x32xbf16, #tpu.memory_space<vmem>>, %arg13: memref<1x32xf32, #tpu.memory_space<vmem>>, %arg14: memref<1x32xf32, #tpu.memory_space<vmem>>, %arg15: memref<1x64x32xf32, #tpu.memory_space<vmem>>) attributes {dimension_semantics = [#tpu.dimension_semantics<parallel>], iteration_bounds = array<i64: 2>, scalar_prefetch = 0 : i64, scratch_operands = 0 : i64, tpu.core_type = #tpu.core_type<tc>, window_params = [{transform_indices = @transform_0, window_bounds = array<i64: 1, 64, 8>}, {pipeline_mode = #tpu.pipeline_mode<synchronous>, transform_indices = @transform_1, window_bounds = array<i64: 8, 32>}, {pipeline_mode = #tpu.pipeline_mode<synchronous>, transform_indices = @transform_2, window_bounds = array<i64: 1, 32>}, {pipeline_mode = #tpu.pipeline_mode<synchronous>, transform_indices = @transform_3, window_bounds = array<i64: 1, 32>}, {pipeline_mode = #tpu.pipeline_mode<synchronous>, transform_indices = @transform_4, window_bounds = array<i64: 8, 16>}, {pipeline_mode = #tpu.pipeline_mode<synchronous>, transform_indices = @transform_5, window_bounds = array<i64: 1, 16>}, {pipeline_mode = #tpu.pipeline_mode<synchronous>, transform_indices = @transform_6, window_bounds = array<i64: 1, 16>}, {pipeline_mode = #tpu.pipeline_mode<synchronous>, transform_indices = @transform_7, window_bounds = array<i64: 16, 48>}, {pipeline_mode = #tpu.pipeline_mode<synchronous>, transform_indices = @transform_8, window_bounds = array<i64: 64, 8>}, {pipeline_mode = #tpu.pipeline_mode<synchronous>, transform_indices = @transform_9, window_bounds = array<i64: 1, 16>}, {pipeline_mode = #tpu.pipeline_mode<synchronous>, transform_indices = @transform_10, window_bounds = array<i64: 1, 16>}, {pipeline_mode = #tpu.pipeline_mode<synchronous>, transform_indices = @transform_11, window_bounds = array<i64: 16, 32>}, {pipeline_mode = #tpu.pipeline_mode<synchronous>, transform_indices = @transform_12, window_bounds = array<i64: 1, 32>}, {pipeline_mode = #tpu.pipeline_mode<synchronous>, transform_indices = @transform_13, window_bounds = array<i64: 1, 32>}, {transform_indices = @transform_14, window_bounds = array<i64: 1, 64, 32>}]} {
    %c0 = arith.constant 0 : index
    %c0_0 = arith.constant 0 : index
    %c0_1 = arith.constant 0 : index
    %0 = vector.load %arg1[%c0, %c0_0, %c0_1] : memref<1x64x8xf32, #tpu.memory_space<vmem>>, vector<1x64x8xf32>
    %1 = vector.shape_cast %0 : vector<1x64x8xf32> to vector<64x8xf32>
    %2 = arith.truncf %1 : vector<64x8xf32> to vector<64x8xbf16>
    %c0_2 = arith.constant 0 : index
    %c0_3 = arith.constant 0 : index
    %3 = vector.load %arg2[%c0_2, %c0_3] : memref<8x32xbf16, #tpu.memory_space<vmem>>, vector<8x32xbf16>
    %cst = arith.constant dense<0.000000e+00> : vector<64x32xf32>
    %4 = tpu.matmul %2, %3, %cst {dimension_numbers = #tpu.dot_dimension_numbers<[1], [0], [0], [1], [0, 0, 1, 1], [], []>} : vector<64x8xbf16>, vector<8x32xbf16>, vector<64x32xf32> -> vector<64x32xf32>
    %c0_4 = arith.constant 0 : index
    %c0_5 = arith.constant 0 : index
    %5 = vector.load %arg3[%c0_4, %c0_5] : memref<1x32xf32, #tpu.memory_space<vmem>>, vector<1x32xf32>
    %6 = vector.broadcast %5 : vector<1x32xf32> to vector<64x32xf32>
    %7 = arith.mulf %4, %6 : vector<64x32xf32>
    %c0_6 = arith.constant 0 : index
    %c0_7 = arith.constant 0 : index
    %8 = vector.load %arg4[%c0_6, %c0_7] : memref<1x32xf32, #tpu.memory_space<vmem>>, vector<1x32xf32>
    %9 = vector.broadcast %8 : vector<1x32xf32> to vector<64x32xf32>
    %10 = arith.addf %7, %9 : vector<64x32xf32>
    %cst_8 = arith.constant 0.000000e+00 : f32
    %11 = vector.broadcast %cst_8 : f32 to vector<64x32xf32>
    %12 = arith.maximumf %10, %11 : vector<64x32xf32>
    %c0_9 = arith.constant 0 : index
    %c0_10 = arith.constant 0 : index
    %13 = vector.load %arg5[%c0_9, %c0_10] : memref<8x16xbf16, #tpu.memory_space<vmem>>, vector<8x16xbf16>
    %cst_11 = arith.constant dense<0.000000e+00> : vector<64x16xf32>
    %14 = tpu.matmul %2, %13, %cst_11 {dimension_numbers = #tpu.dot_dimension_numbers<[1], [0], [0], [1], [0, 0, 1, 1], [], []>} : vector<64x8xbf16>, vector<8x16xbf16>, vector<64x16xf32> -> vector<64x16xf32>
    %c0_12 = arith.constant 0 : index
    %c0_13 = arith.constant 0 : index
    %15 = vector.load %arg6[%c0_12, %c0_13] : memref<1x16xf32, #tpu.memory_space<vmem>>, vector<1x16xf32>
    %16 = vector.broadcast %15 : vector<1x16xf32> to vector<64x16xf32>
    %17 = arith.mulf %14, %16 : vector<64x16xf32>
    %c0_14 = arith.constant 0 : index
    %c0_15 = arith.constant 0 : index
    %18 = vector.load %arg7[%c0_14, %c0_15] : memref<1x16xf32, #tpu.memory_space<vmem>>, vector<1x16xf32>
    %19 = vector.broadcast %18 : vector<1x16xf32> to vector<64x16xf32>
    %20 = arith.addf %17, %19 : vector<64x16xf32>
    %cst_16 = arith.constant 0.000000e+00 : f32
    %21 = vector.broadcast %cst_16 : f32 to vector<64x16xf32>
    %22 = arith.maximumf %20, %21 : vector<64x16xf32>
    %23 = arith.truncf %22 : vector<64x16xf32> to vector<64x16xbf16>
    %c0_17 = arith.constant 0 : index
    %c0_18 = arith.constant 0 : index
    %24 = vector.load %arg8[%c0_17, %c0_18] : memref<16x48xbf16, #tpu.memory_space<vmem>>, vector<16x48xbf16>
    %cst_19 = arith.constant dense<0.000000e+00> : vector<64x48xf32>
    %25 = tpu.matmul %23, %24, %cst_19 {dimension_numbers = #tpu.dot_dimension_numbers<[1], [0], [0], [1], [0, 0, 1, 1], [], []>} : vector<64x16xbf16>, vector<16x48xbf16>, vector<64x48xf32> -> vector<64x48xf32>
    %26 = vector.extract_strided_slice %25 {offsets = [0, 0], sizes = [64, 8], strides = [1, 1]} : vector<64x48xf32> to vector<64x8xf32>
    %27 = vector.shape_cast %26 : vector<64x8xf32> to vector<1x64x8xf32>
    %28 = vector.extract_strided_slice %25 {offsets = [0, 8], sizes = [64, 8], strides = [1, 1]} : vector<64x48xf32> to vector<64x8xf32>
    %29 = vector.shape_cast %28 : vector<64x8xf32> to vector<1x64x8xf32>
    %30 = tpu.concatenate %27, %29 in 0 : vector<1x64x8xf32>, vector<1x64x8xf32> -> vector<2x64x8xf32>
    %31 = vector.extract_strided_slice %25 {offsets = [0, 16], sizes = [64, 8], strides = [1, 1]} : vector<64x48xf32> to vector<64x8xf32>
    %32 = vector.shape_cast %31 : vector<64x8xf32> to vector<1x64x8xf32>
    %33 = vector.extract_strided_slice %25 {offsets = [0, 24], sizes = [64, 8], strides = [1, 1]} : vector<64x48xf32> to vector<64x8xf32>
    %34 = vector.shape_cast %33 : vector<64x8xf32> to vector<1x64x8xf32>
    %35 = tpu.concatenate %32, %34 in 0 : vector<1x64x8xf32>, vector<1x64x8xf32> -> vector<2x64x8xf32>
    %c0_20 = arith.constant 0 : index
    %c0_21 = arith.constant 0 : index
    %36 = vector.load %arg9[%c0_20, %c0_21] : memref<64x8xf32, #tpu.memory_space<vmem>>, vector<64x8xf32>
    %37 = vector.shape_cast %36 : vector<64x8xf32> to vector<1x64x8xf32>
    %38 = vector.broadcast %37 : vector<1x64x8xf32> to vector<2x64x8xf32>
    %39 = arith.addf %35, %38 : vector<2x64x8xf32>
    %40 = vector.extract_strided_slice %25 {offsets = [0, 32], sizes = [64, 8], strides = [1, 1]} : vector<64x48xf32> to vector<64x8xf32>
    %41 = vector.shape_cast %40 : vector<64x8xf32> to vector<1x64x8xf32>
    %42 = vector.extract_strided_slice %25 {offsets = [0, 40], sizes = [64, 8], strides = [1, 1]} : vector<64x48xf32> to vector<64x8xf32>
    %43 = vector.shape_cast %42 : vector<64x8xf32> to vector<1x64x8xf32>
    %44 = tpu.concatenate %41, %43 in 0 : vector<1x64x8xf32>, vector<1x64x8xf32> -> vector<2x64x8xf32>
    %45 = arith.truncf %30 : vector<2x64x8xf32> to vector<2x64x8xbf16>
    %46 = arith.truncf %39 : vector<2x64x8xf32> to vector<2x64x8xbf16>
    "tpu.trace_start"() <{level = 10 : i32, message = "gid,gjd->gij"}> : () -> ()
    %cst_22 = arith.constant dense<0.000000e+00> : vector<2x64x64xf32>
    %47 = tpu.matmul %45, %46, %cst_22 {dimension_numbers = #tpu.dot_dimension_numbers<[2], [2], [1], [1], [0, 0, 0, 1, 1, 1], [0], [0]>} : vector<2x64x8xbf16>, vector<2x64x8xbf16>, vector<2x64x64xf32> -> vector<2x64x64xf32>
    "tpu.trace_stop"() : () -> ()
    %cst_23 = arith.constant dense<0xFF800000> : vector<2x64xf32>
    %48 = vector.multi_reduction <maximumf>, %47, %cst_23 [2] : vector<2x64x64xf32> to vector<2x64xf32>
    %49 = vector.shape_cast %48 : vector<2x64xf32> to vector<2x64x1xf32>
    %50 = vector.broadcast %49 : vector<2x64x1xf32> to vector<2x64x64xf32>
    %51 = arith.subf %47, %50 : vector<2x64x64xf32>
    %52 = math.exp %51 : vector<2x64x64xf32>
    %cst_24 = arith.constant dense<0.000000e+00> : vector<2x64xf32>
    %53 = vector.multi_reduction <add>, %52, %cst_24 [2] : vector<2x64x64xf32> to vector<2x64xf32>
    %54 = vector.shape_cast %53 : vector<2x64xf32> to vector<2x64x1xf32>
    %55 = tpu.reciprocal %54 {approx = true} : vector<2x64x1xf32> -> vector<2x64x1xf32>
    %56 = vector.broadcast %55 : vector<2x64x1xf32> to vector<2x64x64xf32>
    %57 = arith.mulf %52, %56 : vector<2x64x64xf32>
    %58 = arith.truncf %57 : vector<2x64x64xf32> to vector<2x64x64xbf16>
    %59 = arith.truncf %44 : vector<2x64x8xf32> to vector<2x64x8xbf16>
    "tpu.trace_start"() <{level = 10 : i32, message = "gij,gjd->gid"}> : () -> ()
    %cst_25 = arith.constant dense<0.000000e+00> : vector<2x64x8xf32>
    %60 = tpu.matmul %58, %59, %cst_25 {dimension_numbers = #tpu.dot_dimension_numbers<[2], [1], [1], [2], [0, 0, 0, 1, 1, 2], [0], [0]>} : vector<2x64x64xbf16>, vector<2x64x8xbf16>, vector<2x64x8xf32> -> vector<2x64x8xf32>
    "tpu.trace_stop"() : () -> ()
    %61 = vector.extract_strided_slice %60 {offsets = [0, 0, 0], sizes = [1, 64, 8], strides = [1, 1, 1]} : vector<2x64x8xf32> to vector<1x64x8xf32>
    %62 = vector.shape_cast %61 : vector<1x64x8xf32> to vector<64x8xf32>
    %63 = vector.extract_strided_slice %60 {offsets = [1, 0, 0], sizes = [1, 64, 8], strides = [1, 1, 1]} : vector<2x64x8xf32> to vector<1x64x8xf32>
    %64 = vector.shape_cast %63 : vector<1x64x8xf32> to vector<64x8xf32>
    %65 = tpu.concatenate %62, %64 in 1 : vector<64x8xf32>, vector<64x8xf32> -> vector<64x16xf32>
    %c0_26 = arith.constant 0 : index
    %c0_27 = arith.constant 0 : index
    %66 = vector.load %arg10[%c0_26, %c0_27] : memref<1x16xf32, #tpu.memory_space<vmem>>, vector<1x16xf32>
    %67 = vector.broadcast %66 : vector<1x16xf32> to vector<64x16xf32>
    %68 = arith.mulf %65, %67 : vector<64x16xf32>
    %c0_28 = arith.constant 0 : index
    %c0_29 = arith.constant 0 : index
    %69 = vector.load %arg11[%c0_28, %c0_29] : memref<1x16xf32, #tpu.memory_space<vmem>>, vector<1x16xf32>
    %70 = vector.broadcast %69 : vector<1x16xf32> to vector<64x16xf32>
    %71 = arith.addf %68, %70 : vector<64x16xf32>
    %cst_30 = arith.constant 0.000000e+00 : f32
    %72 = vector.broadcast %cst_30 : f32 to vector<64x16xf32>
    %73 = arith.maximumf %71, %72 : vector<64x16xf32>
    %74 = arith.truncf %73 : vector<64x16xf32> to vector<64x16xbf16>
    %c0_31 = arith.constant 0 : index
    %c0_32 = arith.constant 0 : index
    %75 = vector.load %arg12[%c0_31, %c0_32] : memref<16x32xbf16, #tpu.memory_space<vmem>>, vector<16x32xbf16>
    %cst_33 = arith.constant dense<0.000000e+00> : vector<64x32xf32>
    %76 = tpu.matmul %74, %75, %cst_33 {dimension_numbers = #tpu.dot_dimension_numbers<[1], [0], [0], [1], [0, 0, 1, 1], [], []>} : vector<64x16xbf16>, vector<16x32xbf16>, vector<64x32xf32> -> vector<64x32xf32>
    %c0_34 = arith.constant 0 : index
    %c0_35 = arith.constant 0 : index
    %77 = vector.load %arg13[%c0_34, %c0_35] : memref<1x32xf32, #tpu.memory_space<vmem>>, vector<1x32xf32>
    %78 = vector.broadcast %77 : vector<1x32xf32> to vector<64x32xf32>
    %79 = arith.mulf %76, %78 : vector<64x32xf32>
    %c0_36 = arith.constant 0 : index
    %c0_37 = arith.constant 0 : index
    %80 = vector.load %arg14[%c0_36, %c0_37] : memref<1x32xf32, #tpu.memory_space<vmem>>, vector<1x32xf32>
    %81 = vector.broadcast %80 : vector<1x32xf32> to vector<64x32xf32>
    %82 = arith.addf %79, %81 : vector<64x32xf32>
    %83 = arith.addf %82, %12 : vector<64x32xf32>
    %cst_38 = arith.constant 0.000000e+00 : f32
    %84 = vector.broadcast %cst_38 : f32 to vector<64x32xf32>
    %85 = arith.maximumf %83, %84 : vector<64x32xf32>
    %86 = vector.shape_cast %85 : vector<64x32xf32> to vector<1x64x32xf32>
    %c0_39 = arith.constant 0 : index
    %c0_40 = arith.constant 0 : index
    %c0_41 = arith.constant 0 : index
    %87 = vector.load %arg15[%c0_39, %c0_40, %c0_41] : memref<1x64x32xf32, #tpu.memory_space<vmem>>, vector<1x64x32xf32>
    tpu.vector_store %arg15[%c0_39, %c0_40, %c0_41], %86 {strides = array<i32>} : memref<1x64x32xf32, #tpu.memory_space<vmem>>, vector<1x64x32xf32>,
    return
  }
  func.func @transform_0(%arg0: i32) -> (i32, i32, i32) {
    %c0_i32 = arith.constant 0 : i32
    %c0_i32_0 = arith.constant 0 : i32
    %c0_i32_1 = arith.constant 0 : i32
    return %arg0, %c0_i32, %c0_i32_0 : i32, i32, i32
  }
  func.func @transform_1(%arg0: i32) -> (i32, i32) {
    %c0_i32 = arith.constant 0 : i32
    %c0_i32_0 = arith.constant 0 : i32
    %c0_i32_1 = arith.constant 0 : i32
    return %c0_i32, %c0_i32_0 : i32, i32
  }
  func.func @transform_2(%arg0: i32) -> (i32, i32) {
    %c0_i32 = arith.constant 0 : i32
    %c0_i32_0 = arith.constant 0 : i32
    %c0_i32_1 = arith.constant 0 : i32
    return %c0_i32, %c0_i32_0 : i32, i32
  }
  func.func @transform_3(%arg0: i32) -> (i32, i32) {
    %c0_i32 = arith.constant 0 : i32
    %c0_i32_0 = arith.constant 0 : i32
    %c0_i32_1 = arith.constant 0 : i32
    return %c0_i32, %c0_i32_0 : i32, i32
  }
  func.func @transform_4(%arg0: i32) -> (i32, i32) {
    %c0_i32 = arith.constant 0 : i32
    %c0_i32_0 = arith.constant 0 : i32
    %c0_i32_1 = arith.constant 0 : i32
    return %c0_i32, %c0_i32_0 : i32, i32
  }
  func.func @transform_5(%arg0: i32) -> (i32, i32) {
    %c0_i32 = arith.constant 0 : i32
    %c0_i32_0 = arith.constant 0 : i32
    %c0_i32_1 = arith.constant 0 : i32
    return %c0_i32, %c0_i32_0 : i32, i32
  }
  func.func @transform_6(%arg0: i32) -> (i32, i32) {
    %c0_i32 = arith.constant 0 : i32
    %c0_i32_0 = arith.constant 0 : i32
    %c0_i32_1 = arith.constant 0 : i32
    return %c0_i32, %c0_i32_0 : i32, i32
  }
  func.func @transform_7(%arg0: i32) -> (i32, i32) {
    %c0_i32 = arith.constant 0 : i32
    %c0_i32_0 = arith.constant 0 : i32
    %c0_i32_1 = arith.constant 0 : i32
    return %c0_i32, %c0_i32_0 : i32, i32
  }
  func.func @transform_8(%arg0: i32) -> (i32, i32) {
    %c0_i32 = arith.constant 0 : i32
    %c0_i32_0 = arith.constant 0 : i32
    %c0_i32_1 = arith.constant 0 : i32
    return %c0_i32, %c0_i32_0 : i32, i32
  }
  func.func @transform_9(%arg0: i32) -> (i32, i32) {
    %c0_i32 = arith.constant 0 : i32
    %c0_i32_0 = arith.constant 0 : i32
    %c0_i32_1 = arith.constant 0 : i32
    return %c0_i32, %c0_i32_0 : i32, i32
  }
  func.func @transform_10(%arg0: i32) -> (i32, i32) {
    %c0_i32 = arith.constant 0 : i32
    %c0_i32_0 = arith.constant 0 : i32
    %c0_i32_1 = arith.constant 0 : i32
    return %c0_i32, %c0_i32_0 : i32, i32
  }
  func.func @transform_11(%arg0: i32) -> (i32, i32) {
    %c0_i32 = arith.constant 0 : i32
    %c0_i32_0 = arith.constant 0 : i32
    %c0_i32_1 = arith.constant 0 : i32
    return %c0_i32, %c0_i32_0 : i32, i32
  }
  func.func @transform_12(%arg0: i32) -> (i32, i32) {
    %c0_i32 = arith.constant 0 : i32
    %c0_i32_0 = arith.constant 0 : i32
    %c0_i32_1 = arith.constant 0 : i32
    return %c0_i32, %c0_i32_0 : i32, i32
  }
  func.func @transform_13(%arg0: i32) -> (i32, i32) {
    %c0_i32 = arith.constant 0 : i32
    %c0_i32_0 = arith.constant 0 : i32
    %c0_i32_1 = arith.constant 0 : i32
    return %c0_i32, %c0_i32_0 : i32, i32
  }
  func.func @transform_14(%arg0: i32) -> (i32, i32, i32) {
    %c0_i32 = arith.constant 0 : i32
    %c0_i32_0 = arith.constant 0 : i32
    %c0_i32_1 = arith.constant 0 : i32
    return %arg0, %c0_i32, %c0_i32_0 : i32, i32, i32
  }
}

</mosaic_0001>

<bundles_post_ra>
// kernel: tpu_custom_call.1
= control target key start
LH: loop header
LB: loop body
LE: loop exit
PB: predicated region body
PF: predicated region fallthrough
CT: control target
= control target key end

     0   :  { %s2141_s29 = smov 0   ;;  %s2532_s0 = inlined_call_operand.vmem [shape: f32[2,64,8], index: 0, kind: input, shape index: {}]   ;;  %s2533_s1 = inlined_call_operand.vmem [shape: bf16[8,32], index: 1, kind: input, shape index: {}]   ;;  %s2534_s2 = inlined_call_operand.vmem [shape: f32[1,32], index: 2, kind: input, shape index: {}]   ;;  %s2535_s3 = inlined_call_operand.vmem [shape: f32[1,32], index: 3, kind: input, shape index: {}]   ;;  %s2536_s4 = inlined_call_operand.vmem [shape: bf16[8,16], index: 4, kind: input, shape index: {}]   ;;  %s2537_s5 = inlined_call_operand.vmem [shape: f32[1,16], index: 5, kind: input, shape index: {}]   ;;  %s2538_s6 = inlined_call_operand.vmem [shape: f32[1,16], index: 6, kind: input, shape index: {}]   ;;  %s2539_s7 = inlined_call_operand.vmem [shape: bf16[16,48], index: 7, kind: input, shape index: {}]   ;;  %s2540_s8 = inlined_call_operand.vmem [shape: f32[64,8], index: 8, kind: input, shape index: {}]   ;;  %s2541_s9 = inlined_call_operand.vmem [shape: f32[1,16], index: 9, kind: input, shape index: {}]   ;;  %s2542_s10 = inlined_call_operand.vmem [shape: f32[1,16], index: 10, kind: input, shape index: {}]   ;;  %s2543_s11 = inlined_call_operand.vmem [shape: bf16[16,32], index: 11, kind: input, shape index: {}]   ;;  %s2544_s12 = inlined_call_operand.vmem [shape: f32[1,32], index: 12, kind: input, shape index: {}]   ;;  %s2545_s13 = inlined_call_operand.vmem [shape: f32[1,32], index: 13, kind: input, shape index: {}]   ;;  %s2546_s14 = inlined_call_operand.vmem [shape: f32[2,64,32], index: 14, kind: output, shape index: {}]  }
   0x1 LB: > { %s1753_s30 = sadd.s32 4294967295, %s2059_s29   ;;  %p1757_p0 = scmp.ge.s32.totalorder %s2059_s29, 1  ;;  %s2059_s29 = sphi %s2141_s29, %s24_s29  }
   0x2   : > { %p412_p1 = scmp.lt.s32.totalorder %s2059_s29, 3 }
   0x4   : > { %p413_p2 = pnand %p1757_p0, %p412_p1 }
   0x5   : > { %vm495_vm0 = vcmask (!%p413_p2), 1043456   ;;  %v602_v0 = vld [vmem:[%s2536_s4] sm:$0xf] (!%p413_p2)  ;;  %p458_p3 = scmp.lt.s32.totalorder (!%p413_p2), %s1753_s30, 1  ;;  %vm482_vm1 = vcmask (!%p413_p2), 64512   ;;  %s2061_s27 = smov (!%p413_p2), 16  }
   0x6   : > { %416 = sbr.rel (%p413_p2) target bundleno = 1852 (0x73c), region = 76  ;;  %v1987_v1 = vld [vmem:[%s2539_s7] sm:$0xff] (!%p413_p2)   ;;  %1965 = vmatprep.subr.msk.bf16.mxu1 (!%p413_p2), %vm495_vm0, %v602_v0  ;;  %v604_v2 = vsel (!%p413_p2), %vm495_vm0, %v602_v0, 0  ;;  %v832_v18 = vld [vmem:[%s2540_s8 + $0x8] sm:$0xff] (!%p413_p2)  ;;  %vm721_vm2 = vcmask (!%p413_p2), 130048   ;;  %s2062_s20 = smov (!%p413_p2), 120  }
   0x7   : > { %v481_v3 = vld [vmem:[%s2533_s1] sm:$0xf] (!%p413_p2)  ;;  %1871 = vmatpush3.bf16.msra.mxu1 (!%p413_p2), %v604_v2  ;;  %vm1105_vm3 = vcmask (!%p413_p2), 523264   ;;  %s2065_s25 = smov (!%p413_p2), 8   ;;  %vm1689_vm4 = vcmask (!%p413_p2), 261120  }
   0x8   : > { %1964 = vmatprep.subr.msk.bf16.mxu0 (!%p413_p2), %vm495_vm0, %v481_v3  ;;  %v497_v4 = vsel (!%p413_p2), %vm495_vm0, %v481_v3, 0  ;;  %v831_v17 = vld [vmem:[%s2540_s8] sm:$0xff] (!%p413_p2) }
   0x9   : > { %1861 = vmatpush3.bf16.msra.mxu0 (!%p413_p2), %v497_v4  ;;  %847 = vrot.lane.b32.xlu1 (!%p413_p2), %v831_v17, %s2061_s27  ;;  %v1772_v19 = vld [vmem:[%s2537_s5] ss:$0 sm:$0xff] (!%p413_p2) }
   0xa   : > { %1880 = vmatprep.subr.bf16.mxu0 (!%p413_p2), %v1987_v1  ;;  %v1773_v21 = vld [vmem:[%s2538_s6] ss:$0 sm:$0xff] (!%p413_p2) }
   0xd   : > { %s2548_s30 = smov (!%p458_p3, %s1753_s30), 1  ;;  %849 = vrot.lane.b32.xlu1 %v832_v18, %s2061_s27  ;;  %v833_v18 = vld [vmem:[%s2540_s8 + $0x10] sm:$0xff] }
   0xe   : > { %s1806_s21 = sshll.u32 %s2548_s30, 6 }
   0xf   : > { %s462_s24 = scalar_lea.vmem %s2532_s0, %s1806_s21  ;;  %s2510_s28 = scalar_lea.vmem %s2546_s14, %s1806_s21 }
  0x10   : > { %v469_v5 = vld [vmem:[%s462_s24] sm:$0xff]  ;;  %v470_v6 = vld [vmem:[%s462_s24 + $0x8] sm:$0xff]  ;;  %v471_v7 = vld [vmem:[%s462_s24 + $0x10] sm:$0xff] }
  0x11   : > { %v477_v8 = vpack.c.bf16 %v470_v6, %v469_v5  ;;  %v472_v9 = vld [vmem:[%s462_s24 + $0x18] sm:$0xff]  ;;  %v473_v10 = vld [vmem:[%s462_s24 + $0x20] sm:$0xff]  ;;  %v474_v11 = vld [vmem:[%s462_s24 + $0x28] sm:$0xff] }
  0x12   : > { %v478_v12 = vpack.c.bf16 %v472_v9, %v471_v7  ;;  %v479_v13 = vpack.c.bf16 %v474_v11, %v473_v10  ;;  %v475_v14 = vld [vmem:[%s462_s24 + $0x30] sm:$0xff]  ;;  %v476_v15 = vld [vmem:[%s462_s24 + $0x38] sm:$0xff] }
  0x13   : > { %1872 = vmatprep.mubr.msk.bf16.mxu1 %vm482_vm1, %v477_v8  ;;  %1862 = vmatprep.mubr.msk.bf16.mxu0 %vm482_vm1, %v477_v8  ;;  %v480_v16 = vpack.c.bf16 %v476_v15, %v475_v14  ;;  %v834_v11 = vld [vmem:[%s2540_s8 + $0x18] sm:$0xff] }
  0x14   : > { %1873 = vmatmul.mubr.msk.bf16.vlgmr.msra.gmra.mrb[0].mxu1 %vm482_vm1, %v478_v12  ;;  %1863 = vmatmul.mubr.msk.bf16.vlgmr.msra.gmra.mrb[0].mxu0 %vm482_vm1, %v478_v12 }
  0x15   : > { %1876 = vmatprep.mubr.msk.bf16.mxu1 %vm482_vm1, %v479_v13  ;;  %1881 = vmatpush3.bf16.msra.mxu0 %v1987_v1 }
  0x16   : > { %1866 = vmatprep.mubr.msk.bf16.mxu0 %vm482_vm1, %v479_v13  ;;  %v836_v13 = vld [vmem:[%s2540_s8 + $0x28] sm:$0xff] }
  0x1c   : > { %1877 = vmatmul.mubr.msk.bf16.gmra.mrb[4].mxu1 %vm482_vm1, %v480_v16  ;;  %1867 = vmatmul.mubr.msk.bf16.gmra.mrb[4].mxu0 %vm482_vm1, %v480_v16 }
  0x7b   : > { %v848_v1 = vpop.permute.xlu1 %847 }
  0x7f   : > { %v850_v4 = vpop.permute.xlu1 %849 }
  0xe7   : > { %v1874_v20 = vpop.f32.mrb[0].mxu1  ;;  %v2188_v22 = vpop.f32.mrb[0].mxu0 }
  0xe8   : > { %v680_v23 = vmul.f32 %v1874_v20, %v1772_v19  ;;  %v640_v24 = vpop.f32.mrb[1].mxu1  ;;  %v2190_v25 = vpop.f32.mrb[1].mxu0 }
  0xe9   : > { %v678_v26 = vmul.f32 %v1772_v19, %v640_v24  ;;  %v1875_v27 = vpop.f32.mrb[2].mxu1  ;;  %v2192_v28 = vpop.f32.mrb[2].mxu0  ;;  %v837_v24 = vld [vmem:[%s2540_s8 + $0x30] sm:$0xff] }
  0xea   : > { %v695_v29 = vadd.f32 %v1773_v21, %v680_v23  ;;  %v681_v30 = vmul.f32 %v1875_v27, %v1772_v19  ;;  %v643_v31 = vpop.f32.mrb[3].mxu1  ;;  %v2194_v32 = vpop.f32.mrb[3].mxu0  ;;  %v838_v23 = vld [vmem:[%s2540_s8 + $0x38] sm:$0xff] }
  0xeb   : > { %v693_v33 = vadd.f32 %v1773_v21, %v678_v26  ;;  %v679_v34 = vmul.f32 %v1772_v19, %v643_v31 }
  0xec   : > { %v696_v35 = vadd.f32 %v1773_v21, %v681_v30  ;;  %v703_v37 = vmax.f32 %v695_v29, 0.0 }
  0xed   : > { %v694_v36 = vadd.f32 %v1773_v21, %v679_v34  ;;  %v701_v39 = vmax.f32 %v693_v33, 0.0 }
  0xee   : > { %v704_v38 = vmax.f32 %v696_v35, 0.0 }
  0xef   : > { %v702_v40 = vmax.f32 %v694_v36, 0.0  ;;  %v1878_v41 = vpop.f32.mrb[4].mxu1  ;;  %v2196_v42 = vpop.f32.mrb[4].mxu0 }
  0xf0   : > { %v710_v43 = vpack.c.bf16 %v704_v38, %v703_v37  ;;  %v684_v44 = vmul.f32 %v1878_v41, %v1772_v19  ;;  %v656_v45 = vpop.f32.mrb[5].mxu1  ;;  %v2198_v46 = vpop.f32.mrb[5].mxu0 }
  0xf1   : > { %v709_v47 = vpack.c.bf16 %v702_v40, %v701_v39  ;;  %v682_v48 = vmul.f32 %v1772_v19, %v656_v45  ;;  %v1879_v49 = vpop.f32.mrb[6].mxu1  ;;  %v2200_v50 = vpop.f32.mrb[6].mxu0 }
  0xf2   : > { %v699_v51 = vadd.f32 %v1773_v21, %v684_v44  ;;  %v685_v52 = vmul.f32 %v1879_v49, %v1772_v19  ;;  %v659_v53 = vpop.f32.mrb[7].mxu1  ;;  %v2202_v54 = vpop.f32.mrb[7].mxu0 }
  0xf3   : > { %v697_v55 = vadd.f32 %v1773_v21, %v682_v48  ;;  %1882 = vmatprep.mubr.msk.bf16.mxu0 %vm721_vm2, %v709_v47  ;;  %v683_v56 = vmul.f32 %v1772_v19, %v659_v53 }
  0xf4   : > { %v707_v57 = vmax.f32 %v699_v51, 0.0  ;;  %v700_v58 = vadd.f32 %v1773_v21, %v685_v52  ;;  %1883 = vmatmul.mubr.msk.bf16.vlgmr.msra.gmra.mrb[8].mxu0 %vm721_vm2, %v710_v43 }
  0xf5   : > { %v705_v59 = vmax.f32 %v697_v55, 0.0  ;;  %v698_v60 = vadd.f32 %v1773_v21, %v683_v56  ;;  %v835_v21 = vld [vmem:[%s2540_s8 + $0x20] sm:$0xff] }
  0xf6   : > { %v708_v61 = vmax.f32 %v700_v58, 0.0 }
  0xf7   : > { %v706_v62 = vmax.f32 %v698_v60, 0.0 }
  0xf8   : > { %v712_v63 = vpack.c.bf16 %v708_v61, %v707_v57 }
  0xf9   : > { %v711_v0 = vpack.c.bf16 %v706_v62, %v705_v59 }
  0xfb   : > { %1886 = vmatprep.mubr.msk.bf16.mxu0 %vm721_vm2, %v711_v0 }
  0xfc   : > { %1887 = vmatmul.mubr.msk.bf16.gmra.mrb[12].mxu0 %vm721_vm2, %v712_v63 }
 0x1c7   : > { %v1884_v2 = vpop.f32.mrb[8].mxu0 }
 0x1c8   : > { %v768_v3 = vpop.f32.mrb[9].mxu0 }
 0x1c9   : > { %807 = vrot.lane.b32.xlu0 %v768_v3, %s2062_s20  ;;  %v1885_v5 = vpop.f32.mrb[10].mxu0  ;;  %v2212_v8 = vadd.f32 %v848_v1, %v768_v3 }
 0x1ca   : > { %v2209_v6 = vpack.c.bf16 %v1885_v5, %v1884_v2  ;;  %813 = vrot.lane.b32.xlu1 %v1885_v5, %s2062_s20  ;;  %v771_v7 = vpop.f32.mrb[11].mxu0 }
 0x1cb   : > { %v2214_v9 = vadd.f32 %v850_v4, %v771_v7  ;;  %v2216_v10 = vpack.c.bf16 %v771_v7, %v768_v3 }
 0x1cd   : > { %809 = vrot.lane.b32.xlu0 %v771_v7, %s2062_s20  ;;  %1898 = vmatprep.mubr.msk.bf16.mxu1 %vm482_vm1, %v2216_v10  ;;  %v895_v12 = vpack.c.bf16 %v2214_v9, %v2212_v8 }
 0x1ce   : > { %853 = vrot.lane.b32.xlu1 %v834_v11, %s2061_s27 }
 0x1cf   : > { %v1888_v14 = vpop.f32.mrb[12].mxu0 }
 0x1d0   : > { %v784_v15 = vpop.f32.mrb[13].mxu0 }
 0x1d1   : > { %811 = vrot.lane.b32.xlu0 %v1884_v2, %s2062_s20  ;;  %v1889_v16 = vpop.f32.mrb[14].mxu0 }
 0x1d2   : > { %857 = vrot.lane.b32.xlu1 %v836_v13, %s2061_s27  ;;  %v2232_v17 = vpack.c.bf16 %v1889_v16, %v1888_v14  ;;  %v787_v19 = vpop.f32.mrb[15].mxu0 }
 0x1d3   : > { %v2237_v20 = vpack.c.bf16 %v787_v19, %v784_v15 }
 0x1d5   : > { %851 = vrot.lane.b32.xlu0 %v833_v18, %s2061_s27 }
 0x1d6   : > { %817 = vrot.lane.b32.xlu1 %v787_v19, %s2062_s20 }
 0x1d9   : > { %855 = vrot.lane.b32.xlu0 %v835_v21, %s2061_s27 }
 0x1da   : > { %821 = vrot.lane.b32.xlu1 %v1889_v16, %s2062_s20 }
 0x1dd   : > { %815 = vrot.lane.b32.xlu0 %v784_v15, %s2062_s20 }
 0x1de   : > { %861 = vrot.lane.b32.xlu1 %v838_v23, %s2061_s27 }
 0x1e1   : > { %819 = vrot.lane.b32.xlu0 %v1888_v14, %s2062_s20  ;;  %s2063_s20 = smov 112  }
 0x1e5   : > { %859 = vrot.lane.b32.xlu0 %v837_v24, %s2061_s27  ;;  %s2064_s27 = smov 96  }
 0x23b   : > { %v808_v26 = vpop.permute.xlu0 %807 }
 0x23c   : > { %v814_v27 = vpop.permute.xlu1 %813  ;;  %v879_v30 = vadd.f32 %v848_v1, %v808_v26 }
 0x23f   : > { %v810_v29 = vpop.permute.xlu0 %809 }
 0x240   : > { %v880_v31 = vadd.f32 %v850_v4, %v810_v29  ;;  %v2256_v33 = vpack.c.bf16 %v810_v29, %v808_v26  ;;  %v854_v34 = vpop.permute.xlu1 %853 }
 0x241   : > { %v874_v40 = vadd.f32 %v1885_v5, %v854_v34  ;;  %v882_v41 = vadd.f32 %v854_v34, %v814_v27 }
 0x242   : > { %v899_v35 = vpack.c.bf16 %v880_v31, %v879_v30  ;;  %1914 = vmatprep.mubr.msk.bf16.mxu0 %vm482_vm1, %v2256_v33 }
 0x243   : > { %v812_v36 = vpop.permute.xlu0 %811 }
 0x244   : > { %v2260_v37 = vpack.c.bf16 %v814_v27, %v812_v36  ;;  %v858_v38 = vpop.permute.xlu1 %857  ;;  %1008 = vrot.lane.b32.xlu0 %v899_v35, %s2063_s20 }
 0x245   : > { %v876_v51 = vadd.f32 %v858_v38, %v787_v19 }
 0x247   : > { %v852_v39 = vpop.permute.xlu0 %851 }
 0x248   : > { %v873_v43 = vadd.f32 %v1884_v2, %v852_v39  ;;  %v881_v44 = vadd.f32 %v852_v39, %v812_v36  ;;  %v818_v45 = vpop.permute.xlu1 %817 }
 0x249   : > { %v884_v57 = vadd.f32 %v858_v38, %v818_v45 }
 0x24a   : > { %v896_v47 = vpack.c.bf16 %v874_v40, %v873_v43  ;;  %v900_v48 = vpack.c.bf16 %v882_v41, %v881_v44 }
 0x24b   : > { %v856_v49 = vpop.permute.xlu0 %855 }
 0x24c   : > { %v875_v52 = vadd.f32 %v856_v49, %v784_v15  ;;  %1010 = vrot.lane.b32.xlu1 %v900_v48, %s2063_s20  ;;  %v822_v55 = vpop.permute.xlu1 %821 }
 0x24e   : > { %v897_v53 = vpack.c.bf16 %v876_v51, %v875_v52 }
 0x24f   : > { %v816_v56 = vpop.permute.xlu0 %815 }
 0x250   : > { %v883_v58 = vadd.f32 %v856_v49, %v816_v56  ;;  %v2264_v59 = vpack.c.bf16 %v818_v45, %v816_v56  ;;  %v862_v63 = vpop.permute.xlu1 %861 }
 0x251   : > { %v878_v1 = vadd.f32 %v1889_v16, %v862_v63  ;;  %v886_v2 = vadd.f32 %v862_v63, %v822_v55 }
 0x252   : > { %v901_v60 = vpack.c.bf16 %v884_v57, %v883_v58 }
 0x253   : > { %v820_v61 = vpop.permute.xlu0 %819 }
 0x254   : > { %v2266_v62 = vpack.c.bf16 %v822_v55, %v820_v61  ;;  %1012 = vrot.lane.b32.xlu0 %v901_v60, %s2063_s20 }
 0x257   : > { %v860_v0 = vpop.permute.xlu0 %859 }
 0x258   : > { %v877_v3 = vadd.f32 %v1888_v14, %v860_v0  ;;  %v885_v4 = vadd.f32 %v860_v0, %v820_v61  ;;  %907 = vrot.lane.b32.xlu0 %v895_v12, %s2063_s20 }
 0x25a   : > { %v898_v5 = vpack.c.bf16 %v878_v1, %v877_v3  ;;  %v902_v7 = vpack.c.bf16 %v886_v2, %v885_v4 }
 0x25c   : > { %1014 = vrot.lane.b32.xlu1 %v902_v7, %s2063_s20  ;;  %911 = vrot.lane.b32.xlu0 %v897_v53, %s2063_s20 }
 0x260   : > { %909 = vrot.lane.b32.xlu1 %v896_v47, %s2063_s20 }
 0x264   : > { %913 = vrot.lane.b32.xlu1 %v898_v5, %s2063_s20 }
 0x2b6   : > { %v1009_v11 = vpop.permute.xlu0 %1008 }
 0x2b7   : > { %v1029_v13 = vsel %vm482_vm1, %v1009_v11, 0  ;;  %1970 = vmatprep.subr.msk.bf16.mxu0 %vm482_vm1, %v1009_v11 }
 0x2b8   : > { %1907 = vmatpush3.bf16.xpose.msra.mxu0 %v1029_v13 }
 0x2be   : > { %v1011_v14 = vpop.permute.xlu1 %1010 }
 0x2bf   : > { %v1032_v8 = vsel %vm482_vm1, %v1011_v14, 0  ;;  %1971 = vmatprep.subr.msk.bf16.mxu0 %vm482_vm1, %v1011_v14 }
 0x2c0   : > { %1909 = vmatpush3.bf16.xpose.msra.mxu0 %v1032_v8 }
 0x2c6   : > { %v1013_v9 = vpop.permute.xlu0 %1012 }
 0x2c7   : > { %v1035_v12 = vsel %vm482_vm1, %v1013_v9, 0  ;;  %1972 = vmatprep.subr.msk.bf16.mxu0 %vm482_vm1, %v1013_v9 }
 0x2c8   : > { %1911 = vmatpush3.bf16.xpose.msra.mxu0 %v1035_v12 }
 0x2ca   : > { %v908_v15 = vpop.permute.xlu0 %907 }
 0x2cb   : > { %v928_v16 = vsel %vm482_vm1, %v908_v15, 0  ;;  %1966 = vmatprep.subr.msk.bf16.mxu1 %vm482_vm1, %v908_v15 }
 0x2cc   : > { %1891 = vmatpush3.bf16.xpose.msra.mxu1 %v928_v16 }
 0x2ce   : > { %v1015_v18 = vpop.permute.xlu1 %1014  ;;  %v912_v24 = vpop.permute.xlu0 %911 }
 0x2cf   : > { %v1038_v19 = vsel %vm482_vm1, %v1015_v18, 0  ;;  %1973 = vmatprep.subr.msk.bf16.mxu0 %vm482_vm1, %v1015_v18  ;;  %v934_v26 = vsel %vm482_vm1, %v912_v24, 0 }
 0x2d0   : > { %1913 = vmatpush3.bf16.xpose.msra.mxu0 %v1038_v19 }
 0x2d2   : > { %v910_v21 = vpop.permute.xlu1 %909 }
 0x2d3   : > { %v931_v23 = vsel %vm482_vm1, %v910_v21, 0  ;;  %1967 = vmatprep.subr.msk.bf16.mxu1 %vm482_vm1, %v910_v21 }
 0x2d4   : > { %1893 = vmatpush3.bf16.xpose.msra.mxu1 %v931_v23 }
 0x2d5   : > { %1968 = vmatprep.subr.msk.bf16.mxu1 %vm482_vm1, %v912_v24 }
 0x2d6   : > { %v914_v27 = vpop.permute.xlu1 %913 }
 0x2d7   : > { %1915 = vmatmul.mubr.msk.bf16.vlgmr.msra.gmra.mrb[16].mxu0 %vm482_vm1, %v2260_v37  ;;  %v937_v29 = vsel %vm482_vm1, %v914_v27, 0 }
 0x2d8   : > { %1918 = vmatprep.mubr.msk.bf16.mxu0 %vm482_vm1, %v2264_v59 }
 0x2dc   : > { %1895 = vmatpush3.bf16.xpose.msra.mxu1 %v934_v26 }
 0x2dd   : > { %1969 = vmatprep.subr.msk.bf16.mxu1 %vm482_vm1, %v914_v27 }
 0x2df   : > { %1919 = vmatmul.mubr.msk.bf16.gmra.mrb[20].mxu0 %vm482_vm1, %v2266_v62 }
 0x2e4   : > { %1897 = vmatpush3.bf16.xpose.msra.mxu1 %v937_v29 }
 0x2eb   : > { %1899 = vmatmul.mubr.msk.bf16.vlgmr.msra.gmra.mrb[8].mxu1 %vm482_vm1, %v2209_v6 }
 0x2ec   : > { %1902 = vmatprep.mubr.msk.bf16.mxu1 %vm482_vm1, %v2237_v20 }
 0x2f3   : > { %1903 = vmatmul.mubr.msk.bf16.gmra.mrb[12].mxu1 %vm482_vm1, %v2232_v17 }
 0x3aa   : > { %v1916_v30 = vpop.f32.mrb[16].mxu0 }
 0x3ab   : > { %v1074_v31 = vpop.f32.mrb[17].mxu0  ;;  %v1136_v34 = vsel %vm1105_vm3, %v1916_v30, -inf }
 0x3ac   : > { %v1917_v35 = vpop.f32.mrb[18].mxu0  ;;  %1137 = vmax.xlane.f32.xlu0 %v1136_v34  ;;  %v1130_v39 = vsel %vm1105_vm3, %v1074_v31, -inf }
 0x3ad   : > { %v1077_v36 = vpop.f32.mrb[19].mxu0  ;;  %v1139_v44 = vsel %vm1105_vm3, %v1917_v35, -inf }
 0x3ae   : > { %v1133_v38 = vsel %vm1105_vm3, %v1077_v36, -inf }
 0x3af   : > { %1134 = vmax.xlane.f32.xlu1 %v1133_v38 }
 0x3b0   : > { %1131 = vmax.xlane.f32.xlu0 %v1130_v39 }
 0x3b2   : > { %v1920_v40 = vpop.f32.mrb[20].mxu0 }
 0x3b3   : > { %v1090_v41 = vpop.f32.mrb[21].mxu0  ;;  %v1148_v43 = vsel %vm1105_vm3, %v1920_v40, -inf }
 0x3b4   : > { %1149 = vmax.xlane.f32.xlu1 %v1148_v43  ;;  %v2310_v45 = vpop.f32.mrb[22].mxu0  ;;  %1140 = vmax.xlane.f32.xlu0 %v1139_v44  ;;  %v1142_v49 = vsel %vm1105_vm3, %v1090_v41, -inf }
 0x3b5   : > { %v2312_v47 = vpop.f32.mrb[23].mxu0  ;;  %v1151_v51 = vsel %vm1105_vm3, %v2310_v45, -inf }
 0x3b6   : > { %v1145_v48 = vsel %vm1105_vm3, %v2312_v47, -inf }
 0x3b8   : > { %1143 = vmax.xlane.f32.xlu1 %v1142_v49  ;;  %1146 = vmax.xlane.f32.xlu0 %v1145_v48 }
 0x3bc   : > { %1152 = vmax.xlane.f32.xlu0 %v1151_v51 }
 0x3be   : > { %v2319_v52 = vpop.f32.mrb[8].mxu1 }
 0x3bf   : > { %v2321_v53 = vpop.f32.mrb[9].mxu1  ;;  %v1112_v60 = vsel %vm1105_vm3, %v2319_v52, -inf }
 0x3c0   : > { %v2323_v55 = vpop.f32.mrb[10].mxu1  ;;  %v1106_v56 = vsel %vm1105_vm3, %v2321_v53, -inf }
 0x3c1   : > { %1107 = vmax.xlane.f32.xlu1 %v1106_v56  ;;  %v2327_v57 = vpop.f32.mrb[11].mxu1  ;;  %v1115_v63 = vsel %vm1105_vm3, %v2323_v55, -inf }
 0x3c2   : > { %v1109_v58 = vsel %vm1105_vm3, %v2327_v57, -inf }
 0x3c3   : > { %1110 = vmax.xlane.f32.xlu0 %v1109_v58 }
 0x3c5   : > { %1113 = vmax.xlane.f32.xlu1 %v1112_v60 }
 0x3c6   : > { %v2333_v61 = vpop.f32.mrb[12].mxu1 }
 0x3c7   : > { %1116 = vmax.xlane.f32.xlu0 %v1115_v63  ;;  %v2337_v0 = vpop.f32.mrb[13].mxu1  ;;  %v1124_v5 = vsel %vm1105_vm3, %v2333_v61, -inf }
 0x3c8   : > { %v2339_v1 = vpop.f32.mrb[14].mxu1  ;;  %v1118_v2 = vsel %vm1105_vm3, %v2337_v0, -inf }
 0x3c9   : > { %1119 = vmax.xlane.f32.xlu1 %v1118_v2  ;;  %v2343_v3 = vpop.f32.mrb[15].mxu1  ;;  %v1127_v7 = vsel %vm1105_vm3, %v2339_v1, -inf }
 0x3ca   : > { %v1121_v4 = vsel %vm1105_vm3, %v2343_v3, -inf }
 0x3cb   : > { %1122 = vmax.xlane.f32.xlu0 %v1121_v4 }
 0x3cd   : > { %1125 = vmax.xlane.f32.xlu1 %v1124_v5 }
 0x3cf   : > { %1128 = vmax.xlane.f32.xlu0 %v1127_v7 }
 0x3de   : > { %1387 = vrot.lane.b32.xlu1 %v2256_v33, %s2064_s27 }
 0x439   : > { %v1138_v11 = vpop.xlane.xlu0 %1137 }
 0x43a   : > { %v1164_v13 = vsub.f32 %v1916_v30, %v1138_v11 }
 0x43c   : > { %v1190_v14 = vmul.f32 1.442695, %v1164_v13  ;;  %v1135_v8 = vpop.xlane.xlu1 %1134 }
 0x43d   : > { %v1132_v9 = vpop.xlane.xlu0 %1131  ;;  %v1163_v16 = vsub.f32 %v1077_v36, %v1135_v8 }
 0x43e   : > { %1989 = vpow2.f32 %v1190_v14  ;;  %v1162_v12 = vsub.f32 %v1074_v31, %v1132_v9 }
 0x43f   : > { %v1188_v27 = vmul.f32 1.442695, %v1163_v16 }
 0x440   : > { %v1186_v15 = vmul.f32 1.442695, %v1162_v12 }
 0x441   : > { %v1150_v18 = vpop.xlane.xlu1 %1149  ;;  %v1141_v19 = vpop.xlane.xlu0 %1140 }
 0x442   : > { %1991 = vpow2.f32 %v1186_v15  ;;  %v1168_v21 = vsub.f32 %v1920_v40, %v1150_v18  ;;  %v1165_v23 = vsub.f32 %v1917_v35, %v1141_v19 }
 0x444   : > { %v1198_v24 = vmul.f32 1.442695, %v1168_v21  ;;  %v1192_v26 = vmul.f32 1.442695, %v1165_v23 }
 0x445   : > { %v1144_v29 = vpop.xlane.xlu1 %1143  ;;  %v1147_v34 = vpop.xlane.xlu0 %1146 }
 0x446   : > { %1993 = vpow2.f32 %v1198_v24  ;;  %v1166_v33 = vsub.f32 %v1090_v41, %v1144_v29  ;;  %v1167_v31 = vsub.f32 %v2312_v47, %v1147_v34 }
 0x447   : > { %1995 = vpow2.f32 %v1192_v26 }
 0x448   : > { %v2353_v30 = vpop.eup %1989  ;;  %v1194_v38 = vmul.f32 1.442695, %v1166_v33  ;;  %1997 = vpow2.f32 %v1188_v27  ;;  %v1196_v44 = vmul.f32 1.442695, %v1167_v31 }
 0x449   : > { %v1153_v36 = vpop.xlane.xlu0 %1152  ;;  %v1232_v39 = vsel %vm1105_vm3, %v2353_v30, 0.0 }
 0x44a   : > { %1999 = vpow2.f32 %v1194_v38  ;;  %v1169_v35 = vsub.f32 %v2310_v45, %v1153_v36  ;;  %1233 = vadd.xlane.f32.xlu1 %v1232_v39 }
 0x44c   : > { %v2359_v40 = vpop.eup %1991  ;;  %v1200_v43 = vmul.f32 1.442695, %v1169_v35 }
 0x44d   : > { %v1226_v41 = vsel %vm1105_vm3, %v2359_v40, 0.0 }
 0x44e   : > { %2001 = vpow2.f32 %v1200_v43  ;;  %v1108_v48 = vpop.xlane.xlu1 %1107  ;;  %1227 = vadd.xlane.f32.xlu1 %v1226_v41 }
 0x44f   : > { %2003 = vpow2.f32 %v1196_v44  ;;  %v1154_v18 = vsub.f32 %v2321_v53, %v1108_v48 }
 0x450   : > { %v2363_v49 = vpop.eup %1993  ;;  %v1111_v9 = vpop.xlane.xlu0 %1110 }
 0x451   : > { %v2365_v47 = vpop.eup %1995  ;;  %v1244_v51 = vsel %vm1105_vm3, %v2363_v49, 0.0  ;;  %v1155_v12 = vsub.f32 %v2327_v57, %v1111_v9 }
 0x452   : > { %v1114_v45 = vpop.xlane.xlu1 %1113  ;;  %1245 = vadd.xlane.f32.xlu1 %v1244_v51  ;;  %v1235_v56 = vsel %vm1105_vm3, %v2365_v47, 0.0  ;;  %v2371_v58 = vpop.eup %1997 }
 0x453   : > { %1236 = vadd.xlane.f32.xlu0 %v1235_v56  ;;  %v1229_v4 = vsel %vm1105_vm3, %v2371_v58, 0.0  ;;  %v1172_v15 = vmul.f32 1.442695, %v1155_v12  ;;  %v1156_v24 = vsub.f32 %v2319_v52, %v1114_v45 }
 0x454   : > { %v2373_v60 = vpop.eup %1999  ;;  %v1117_v19 = vpop.xlane.xlu0 %1116 }
 0x455   : > { %v1238_v63 = vsel %vm1105_vm3, %v2373_v60, 0.0  ;;  %2005 = vpow2.f32 %v1172_v15  ;;  %v1157_v57 = vsub.f32 %v2323_v55, %v1117_v19 }
 0x456   : > { %v1120_v2 = vpop.xlane.xlu1 %1119  ;;  %1239 = vadd.xlane.f32.xlu1 %v1238_v63 }
 0x457   : > { %1230 = vadd.xlane.f32.xlu0 %v1229_v4  ;;  %v1158_v16 = vsub.f32 %v2337_v0, %v1120_v2  ;;  %v1176_v0 = vmul.f32 1.442695, %v1157_v57 }
 0x458   : > { %v2379_v5 = vpop.eup %2001 }
 0x459   : > { %v1247_v7 = vsel %vm1105_vm3, %v2379_v5, 0.0  ;;  %v2383_v13 = vpop.eup %2003  ;;  %v1178_v21 = vmul.f32 1.442695, %v1158_v16 }
 0x45a   : > { %v1126_v11 = vpop.xlane.xlu1 %1125  ;;  %v1241_v8 = vsel %vm1105_vm3, %v2383_v13, 0.0 }
 0x45b   : > { %1248 = vadd.xlane.f32.xlu0 %v1247_v7  ;;  %v1160_v23 = vsub.f32 %v2333_v61, %v1126_v11  ;;  %2007 = vpow2.f32 %v1178_v21 }
 0x45d   : > { %v1182_v26 = vmul.f32 1.442695, %v1160_v23 }
 0x45e   : > { %v1388_v14 = vpop.permute.xlu1 %1387 }
 0x45f   : > { %1242 = vadd.xlane.f32.xlu0 %v1241_v8  ;;  %1938 = vmatprep.subr.bf16.mxu0 %v1388_v14  ;;  %v2400_v27 = vpop.eup %2005 }
 0x460   : > { %1939 = vmatpush3.bf16.msra.mxu0 %v1388_v14  ;;  %v1205_v52 = vsel %vm1105_vm3, %v2400_v27, 0.0 }
 0x465   : > { %v2405_v33 = vpop.eup %2007 }
 0x467   : > { %1391 = vrot.lane.b32.xlu1 %v2264_v59, %s2064_s27  ;;  %v1170_v59 = vmul.f32 1.442695, %v1154_v18 }
 0x469   : > { %2009 = vpow2.f32 %v1170_v59 }
 0x46a   : > { %2011 = vpow2.f32 %v1182_v26 }
 0x46b   : > { %1393 = vrot.lane.b32.xlu1 %v2266_v62, %s2064_s27  ;;  %v1123_v62 = vpop.xlane.xlu0 %1122 }
 0x46c   : > { %v1159_v53 = vsub.f32 %v2343_v3, %v1123_v62  ;;  %v1214_v3 = vsel %vm1105_vm3, %v2405_v33, 0.0 }
 0x46e   : > { %v1180_v61 = vmul.f32 1.442695, %v1159_v53 }
 0x46f   : > { %v1129_v29 = vpop.xlane.xlu0 %1128 }
 0x470   : > { %v1161_v34 = vsub.f32 %v2339_v1, %v1129_v29 }
 0x472   : > { %v1184_v55 = vmul.f32 1.442695, %v1161_v34 }
 0x473   : > { %v2407_v38 = vpop.eup %2009 }
 0x474   : > { %v2411_v31 = vpop.eup %2011  ;;  %v1202_v36 = vsel %vm1105_vm3, %v2407_v38, 0.0 }
 0x475   : > { %1389 = vrot.lane.b32.xlu0 %v2260_v37, %s2064_s27  ;;  %v1174_v37 = vmul.f32 1.442695, %v1156_v24  ;;  %v1220_v39 = vsel %vm1105_vm3, %v2411_v31, 0.0 }
 0x477   : > { %2013 = vpow2.f32 %v1174_v37 }
 0x478   : > { %2015 = vpow2.f32 %v1176_v0 }
 0x479   : > { %2017 = vpow2.f32 %v1180_v61 }
 0x47a   : > { %2019 = vpow2.f32 %v1184_v55 }
 0x481   : > { %v2415_v1 = vpop.eup %2013 }
 0x482   : > { %v1208_v35 = vsel %vm1105_vm3, %v2415_v1, 0.0  ;;  %v2421_v43 = vpop.eup %2015 }
 0x483   : > { %v1211_v44 = vsel %vm1105_vm3, %v2421_v43, 0.0  ;;  %v2425_v41 = vpop.eup %2017 }
 0x484   : > { %v1217_v48 = vsel %vm1105_vm3, %v2425_v41, 0.0  ;;  %v2429_v51 = vpop.eup %2019 }
 0x485   : > { %v1223_v45 = vsel %vm1105_vm3, %v2429_v51, 0.0 }
 0x48f   : > { %1206 = vadd.xlane.f32.xlu1 %v1205_v52 }
 0x493   : > { %1215 = vadd.xlane.f32.xlu1 %v1214_v3 }
 0x494   : > { %1203 = vadd.xlane.f32.xlu0 %v1202_v36 }
 0x497   : > { %1221 = vadd.xlane.f32.xlu1 %v1220_v39 }
 0x498   : > { %1209 = vadd.xlane.f32.xlu0 %v1208_v35 }
 0x49c   : > { %1212 = vadd.xlane.f32.xlu0 %v1211_v44 }
 0x4a0   : > { %1218 = vadd.xlane.f32.xlu0 %v1217_v48 }
 0x4a4   : > { %1224 = vadd.xlane.f32.xlu0 %v1223_v45 }
 0x4a8   : > { %1294 = vrot.lane.b32.xlu1 %v2216_v10, %s2064_s27 }
 0x4ac   : > { %1298 = vrot.lane.b32.xlu1 %v2237_v20, %s2064_s27 }
 0x4b0   : > { %1300 = vrot.lane.b32.xlu1 %v2232_v17, %s2064_s27 }
 0x4ba   : > { %1296 = vrot.lane.b32.xlu0 %v2209_v6, %s2064_s27 }
 0x4d7   : > { %v1234_v56 = vpop.xlane.xlu1 %1233 }
 0x4db   : > { %v1228_v63 = vpop.xlane.xlu1 %1227 }
 0x4dc   : > { %2021 = vrcp.f32 %v1228_v63 }
 0x4df   : > { %v1246_v4 = vpop.xlane.xlu1 %1245 }
 0x4e0   : > { %v1237_v2 = vpop.xlane.xlu0 %1236 }
 0x4e3   : > { %v1240_v14 = vpop.xlane.xlu1 %1239 }
 0x4e4   : > { %v1231_v7 = vpop.xlane.xlu0 %1230 }
 0x4e5   : > { %2023 = vrcp.f32 %v1231_v7 }
 0x4e6   : > { %2025 = vrcp.f32 %v1237_v2  ;;  %v2022_v20 = vpop.eup %2021 }
 0x4e7   : > { %2027 = vrcp.f32 %v1234_v56  ;;  %v1392_v17 = vpop.permute.xlu1 %1391  ;;  %v1274_v6 = vmul.f32 %v2022_v20, %v2359_v40 }
 0x4e8   : > { %v1249_v11 = vpop.xlane.xlu0 %1248  ;;  %2029 = vrcp.f32 %v1240_v14 }
 0x4eb   : > { %v1394_v21 = vpop.permute.xlu1 %1393 }
 0x4ec   : > { %v1243_v10 = vpop.xlane.xlu0 %1242 }
 0x4ed   : > { %2031 = vrcp.f32 %v1243_v10 }
 0x4ee   : > { %2033 = vrcp.f32 %v1249_v11 }
 0x4ef   : > { %v2024_v8 = vpop.eup %2023  ;;  %2035 = vrcp.f32 %v1246_v4 }
 0x4f0   : > { %v1390_v9 = vpop.permute.xlu0 %1389  ;;  %v1275_v12 = vmul.f32 %v2024_v8, %v2371_v58  ;;  %v2026_v16 = vpop.eup %2025 }
 0x4f1   : > { %1940 = vmatprep.subr.bf16.mxu0 %v1390_v9  ;;  %v2028_v18 = vpop.eup %2027  ;;  %v1277_v59 = vmul.f32 %v2026_v16, %v2365_v47 }
 0x4f2   : > { %1941 = vmatpush3.bf16.msra.mxu0 %v1390_v9  ;;  %v1286_v15 = vpack.c.bf16 %v1275_v12, %v1274_v6  ;;  %v2030_v19 = vpop.eup %2029  ;;  %v1276_v58 = vmul.f32 %v2028_v18, %v2353_v30 }
 0x4f3   : > { %1942 = vmatprep.subr.bf16.mxu0 %v1392_v17  ;;  %v1278_v24 = vmul.f32 %v2030_v19, %v2373_v60 }
 0x4f4   : > { %1946 = vmatprep.mubr.msk.bf16.mxu0 %vm1105_vm3, %v1286_v15  ;;  %v1287_v62 = vpack.c.bf16 %v1277_v59, %v1276_v58 }
 0x4f6   : > { %1943 = vmatpush3.bf16.msra.mxu0 %v1392_v17 }
 0x4f7   : > { %v2032_v23 = vpop.eup %2031  ;;  %1944 = vmatprep.subr.bf16.mxu0 %v1394_v21 }
 0x4f8   : > { %v1279_v40 = vmul.f32 %v2032_v23, %v2383_v13  ;;  %v2034_v26 = vpop.eup %2033 }
 0x4f9   : > { %v2036_v57 = vpop.eup %2035  ;;  %v1281_v0 = vmul.f32 %v2034_v26, %v2379_v5 }
 0x4fa   : > { %1945 = vmatpush3.bf16.msra.mxu0 %v1394_v21  ;;  %v1288_v37 = vpack.c.bf16 %v1279_v40, %v1278_v24  ;;  %v1280_v47 = vmul.f32 %v2036_v57, %v2363_v49 }
 0x4fc   : > { %v1289_v53 = vpack.c.bf16 %v1281_v0, %v1280_v47 }
 0x4fd   : > { %1947 = vmatmul.mubr.msk.bf16.vlgmr.msra.gmra.mrb[24].mxu0 %vm1105_vm3, %v1287_v62  ;;  %v1795_v62 = vld [vmem:[%s2541_s9] ss:$0 sm:$0xff] }
 0x4fe   : > { %1950 = vmatprep.mubr.msk.bf16.mxu0 %vm1105_vm3, %v1288_v37  ;;  %v1796_v37 = vld [vmem:[%s2542_s10] ss:$0 sm:$0xff] }
 0x505   : > { %1951 = vmatmul.mubr.msk.bf16.gmra.mrb[28].mxu0 %vm1105_vm3, %v1289_v53 }
 0x51c   : > { %v1207_v13 = vpop.xlane.xlu1 %1206 }
 0x51d   : > { %2037 = vrcp.f32 %v1207_v13 }
 0x520   : > { %v1216_v30 = vpop.xlane.xlu1 %1215 }
 0x521   : > { %v1204_v29 = vpop.xlane.xlu0 %1203 }
 0x522   : > { %2039 = vrcp.f32 %v1204_v29 }
 0x524   : > { %v1222_v60 = vpop.xlane.xlu1 %1221 }
 0x525   : > { %v1210_v61 = vpop.xlane.xlu0 %1209 }
 0x527   : > { %v2038_v55 = vpop.eup %2037 }
 0x528   : > { %v1295_v34 = vpop.permute.xlu1 %1294  ;;  %v1267_v49 = vmul.f32 %v2038_v55, %v2400_v27 }
 0x529   : > { %v1213_v52 = vpop.xlane.xlu0 %1212  ;;  %1922 = vmatprep.subr.bf16.mxu1 %v1295_v34 }
 0x52a   : > { %1923 = vmatpush3.bf16.msra.mxu1 %v1295_v34  ;;  %2041 = vrcp.f32 %v1213_v52 }
 0x52c   : > { %v2040_v3 = vpop.eup %2039  ;;  %v1299_v44 = vpop.permute.xlu1 %1298 }
 0x52d   : > { %v1219_v36 = vpop.xlane.xlu0 %1218  ;;  %v1266_v5 = vmul.f32 %v2040_v3, %v2407_v38 }
 0x52e   : > { %2043 = vrcp.f32 %v1219_v36 }
 0x52f   : > { %v1282_v39 = vpack.c.bf16 %v1267_v49, %v1266_v5  ;;  %2045 = vrcp.f32 %v1210_v61 }
 0x530   : > { %2047 = vrcp.f32 %v1216_v30  ;;  %v1301_v63 = vpop.permute.xlu1 %1300 }
 0x531   : > { %1930 = vmatprep.mubr.msk.bf16.mxu1 %vm1105_vm3, %v1282_v39  ;;  %v1225_v35 = vpop.xlane.xlu0 %1224 }
 0x532   : > { %2049 = vrcp.f32 %v1225_v35 }
 0x533   : > { %2051 = vrcp.f32 %v1222_v60 }
 0x534   : > { %v2042_v45 = vpop.eup %2041 }
 0x535   : > { %v1297_v48 = vpop.permute.xlu0 %1296  ;;  %v1269_v2 = vmul.f32 %v2042_v45, %v2421_v43 }
 0x536   : > { %1924 = vmatprep.subr.bf16.mxu1 %v1297_v48 }
 0x537   : > { %1925 = vmatpush3.bf16.msra.mxu1 %v1297_v48 }
 0x538   : > { %1926 = vmatprep.subr.bf16.mxu1 %v1299_v44  ;;  %v2044_v56 = vpop.eup %2043 }
 0x539   : > { %v2046_v38 = vpop.eup %2045  ;;  %v1271_v4 = vmul.f32 %v2044_v56, %v2425_v41 }
 0x53a   : > { %v2048_v27 = vpop.eup %2047  ;;  %v1268_v7 = vmul.f32 %v2046_v38, %v2415_v1  ;;  %v1988_v1 = vld [vmem:[%s2543_s11] sm:$0xff]  }
 0x53b   : > { %1927 = vmatpush3.bf16.msra.mxu1 %v1299_v44  ;;  %v1270_v11 = vmul.f32 %v2048_v27, %v2405_v33 }
 0x53c   : > { %1928 = vmatprep.subr.bf16.mxu1 %v1301_v63  ;;  %v1283_v14 = vpack.c.bf16 %v1269_v2, %v1268_v7  ;;  %v2050_v10 = vpop.eup %2049 }
 0x53d   : > { %v1284_v20 = vpack.c.bf16 %v1271_v4, %v1270_v11  ;;  %v2052_v8 = vpop.eup %2051  ;;  %v1273_v17 = vmul.f32 %v2050_v10, %v2429_v51 }
 0x53e   : > { %v1272_v43 = vmul.f32 %v2052_v8, %v2411_v31 }
 0x53f   : > { %1929 = vmatpush3.bf16.msra.mxu1 %v1301_v63 }
 0x540   : > { %v1285_v9 = vpack.c.bf16 %v1273_v17, %v1272_v43  ;;  %1954 = vmatprep.subr.bf16.mxu1 %v1988_v1 }
 0x542   : > { %1931 = vmatmul.mubr.msk.bf16.vlgmr.msra.gmra.mrb[16].mxu1 %vm1105_vm3, %v1283_v14 }
 0x543   : > { %1934 = vmatprep.mubr.msk.bf16.mxu1 %vm1105_vm3, %v1284_v20  ;;  %1955 = vmatpush3.bf16.msra.mxu1 %v1988_v1 }
 0x54a   : > { %1935 = vmatmul.mubr.msk.bf16.gmra.mrb[20].mxu1 %vm1105_vm3, %v1285_v9 }
 0x5d0   : > { %v1948_v33 = vpop.f32.mrb[24].mxu0 }
 0x5d1   : > { %v1445_v41 = vpop.f32.mrb[25].mxu0 }
 0x5d2   : > { %1484 = vrot.lane.b32.xlu0 %v1445_v41, %s2065_s25  ;;  %v1949_v6 = vpop.f32.mrb[26].mxu0 }
 0x5d3   : > { %v1448_v12 = vpop.f32.mrb[27].mxu0 }
 0x5d4   : > { %1486 = vrot.lane.b32.xlu1 %v1448_v12, %s2065_s25 }
 0x5d6   : > { %1488 = vrot.lane.b32.xlu0 %v1948_v33, %s2065_s25 }
 0x5d8   : > { %1490 = vrot.lane.b32.xlu1 %v1949_v6, %s2065_s25  ;;  %v1952_v51 = vpop.f32.mrb[28].mxu0 }
 0x5d9   : > { %v1461_v31 = vpop.f32.mrb[29].mxu0 }
 0x5da   : > { %1492 = vrot.lane.b32.xlu0 %v1461_v31, %s2065_s25  ;;  %v1953_v15 = vpop.f32.mrb[30].mxu0 }
 0x5db   : > { %v1464_v16 = vpop.f32.mrb[31].mxu0 }
 0x5dc   : > { %1494 = vrot.lane.b32.xlu1 %v1464_v16, %s2065_s25 }
 0x5de   : > { %1496 = vrot.lane.b32.xlu0 %v1952_v51, %s2065_s25 }
 0x5e0   : > { %1498 = vrot.lane.b32.xlu1 %v1953_v15, %s2065_s25  ;;  %v1766_v15 = vld [vmem:[%s2534_s2] ss:$0 sm:$0xff] }
 0x5e1   : > { %v573_v16 = vmul.f32 %v2188_v22, %v1766_v15  ;;  %v1803_v22 = vld [vmem:[%s2545_s13] ss:$0 sm:$0xff] }
 0x615   : > { %v1932_v18 = vpop.f32.mrb[16].mxu1 }
 0x616   : > { %v1352_v19 = vpop.f32.mrb[17].mxu1 }
 0x617   : > { %v1933_v21 = vpop.f32.mrb[18].mxu1 }
 0x618   : > { %v1355_v23 = vpop.f32.mrb[19].mxu1 }
 0x61d   : > { %v1936_v59 = vpop.f32.mrb[20].mxu1 }
 0x61e   : > { %v1368_v40 = vpop.f32.mrb[21].mxu1 }
 0x61f   : > { %v1937_v58 = vpop.f32.mrb[22].mxu1 }
 0x620   : > { %v1371_v24 = vpop.f32.mrb[23].mxu1 }
 0x644   : > { %v1485_v26 = vpop.permute.xlu0 %1484 }
 0x645   : > { %v1508_v57 = vsel %vm482_vm1, %v1352_v19, %v1485_v26  ;;  %v571_v19 = vmul.f32 %v1766_v15, %v2190_v25 }
 0x646   : > { %v1523_v0 = vmul.f32 %v1795_v62, %v1508_v57  ;;  %v1487_v47 = vpop.permute.xlu1 %1486 }
 0x647   : > { %v1509_v53 = vsel %vm482_vm1, %v1355_v23, %v1487_v47  ;;  %v572_v23 = vmul.f32 %v1766_v15, %v2194_v32  ;;  %v577_v47 = vmul.f32 %v2196_v42, %v1766_v15  ;;  %v576_v42 = vmul.f32 %v1766_v15, %v2202_v54 }
 0x648   : > { %v1538_v13 = vadd.f32 %v1796_v37, %v1523_v0  ;;  %v1524_v30 = vmul.f32 %v1795_v62, %v1509_v53  ;;  %v1489_v29 = vpop.permute.xlu0 %1488 }
 0x649   : > { %v1510_v60 = vsel %vm482_vm1, %v1932_v18, %v1489_v29  ;;  %v1767_v18 = vld [vmem:[%s2535_s3] ss:$0 sm:$0xff] }
 0x64a   : > { %v1539_v61 = vadd.f32 %v1796_v37, %v1524_v30  ;;  %v1525_v34 = vmul.f32 %v1795_v62, %v1510_v60  ;;  %v1491_v52 = vpop.permute.xlu1 %1490  ;;  %v1546_v3 = vmax.f32 %v1538_v13, 0.0  ;;  %v587_v26 = vadd.f32 %v1767_v18, %v572_v23 }
 0x64b   : > { %v1511_v55 = vsel %vm482_vm1, %v1933_v21, %v1491_v52  ;;  %v574_v21 = vmul.f32 %v2192_v28, %v1766_v15  ;;  %v575_v60 = vmul.f32 %v1766_v15, %v2198_v46  ;;  %v591_v54 = vadd.f32 %v1767_v18, %v576_v42 }
 0x64c   : > { %v1547_v36 = vmax.f32 %v1539_v61, 0.0  ;;  %v1540_v5 = vadd.f32 %v1796_v37, %v1525_v34  ;;  %v1526_v49 = vmul.f32 %v1795_v62, %v1511_v55  ;;  %v1493_v39 = vpop.permute.xlu0 %1492  ;;  %v595_v52 = vmax.f32 %v587_v26, 0.0 }
 0x64d   : > { %v1512_v35 = vsel %vm482_vm1, %v1368_v40, %v1493_v39  ;;  %v1802_v40 = vld [vmem:[%s2544_s12] ss:$0 sm:$0xff]  ;;  %v578_v55 = vmul.f32 %v2200_v50, %v1766_v15  ;;  %v590_v50 = vadd.f32 %v1767_v18, %v575_v60 }
 0x64e   : > { %v1554_v44 = vpack.c.bf16 %v1547_v36, %v1546_v3  ;;  %v1541_v48 = vadd.f32 %v1796_v37, %v1526_v49  ;;  %v1527_v45 = vmul.f32 %v1795_v62, %v1512_v35  ;;  %v1495_v56 = vpop.permute.xlu1 %1494  ;;  %v1548_v63 = vmax.f32 %v1540_v5, 0.0 }
 0x64f   : > { %v1513_v38 = vsel %vm482_vm1, %v1371_v24, %v1495_v56  ;;  %v589_v24 = vadd.f32 %v1767_v18, %v574_v21  ;;  %v592_v49 = vadd.f32 %v1767_v18, %v577_v47  ;;  %v593_v56 = vadd.f32 %v1767_v18, %v578_v55 }
 0x650   : > { %v1549_v27 = vmax.f32 %v1541_v48, 0.0  ;;  %v1542_v2 = vadd.f32 %v1796_v37, %v1527_v45  ;;  %v1528_v4 = vmul.f32 %v1795_v62, %v1513_v38  ;;  %1956 = vmatprep.mubr.msk.bf16.mxu1 %vm721_vm2, %v1554_v44  ;;  %v1497_v7 = vpop.permute.xlu0 %1496 }
 0x651   : > { %v1514_v11 = vsel %vm482_vm1, %v1936_v59, %v1497_v7  ;;  %v588_v59 = vadd.f32 %v1767_v18, %v573_v16  ;;  %v597_v29 = vmax.f32 %v589_v24, 0.0 }
 0x652   : > { %v1555_v14 = vpack.c.bf16 %v1549_v27, %v1548_v63  ;;  %v1543_v10 = vadd.f32 %v1796_v37, %v1528_v4  ;;  %v1529_v20 = vmul.f32 %v1795_v62, %v1514_v11  ;;  %v1499_v8 = vpop.permute.xlu1 %1498  ;;  %v1550_v43 = vmax.f32 %v1542_v2, 0.0 }
 0x653   : > { %v1515_v17 = vsel %vm482_vm1, %v1937_v58, %v1499_v8  ;;  %v586_v58 = vadd.f32 %v1767_v18, %v571_v19  ;;  %v596_v25 = vmax.f32 %v588_v59, 0.0  ;;  %v600_v11 = vmax.f32 %v592_v49, 0.0 }
 0x654   : > { %v1551_v9 = vmax.f32 %v1543_v10, 0.0  ;;  %v1544_v1 = vadd.f32 %v1796_v37, %v1529_v20  ;;  %v1530_v33 = vmul.f32 %v1795_v62, %v1515_v17  ;;  %1957 = vmatmul.mubr.msk.bf16.vlgmr.msra.gmra.mrb[24].mxu1 %vm721_vm2, %v1555_v14  ;;  %v598_v8 = vmax.f32 %v590_v50, 0.0 }
 0x655   : > { %v594_v32 = vmax.f32 %v586_v58, 0.0 }
 0x656   : > { %v1556_v41 = vpack.c.bf16 %v1551_v9, %v1550_v43  ;;  %v1545_v6 = vadd.f32 %v1796_v37, %v1530_v33  ;;  %v1552_v12 = vmax.f32 %v1544_v1, 0.0  ;;  %v601_v9 = vmax.f32 %v593_v56, 0.0 }
 0x658   : > { %v1553_v51 = vmax.f32 %v1545_v6, 0.0  ;;  %1960 = vmatprep.mubr.msk.bf16.mxu1 %vm721_vm2, %v1556_v41  ;;  %v599_v41 = vmax.f32 %v591_v54, 0.0 }
 0x65a   : > { %v1557_v31 = vpack.c.bf16 %v1553_v51, %v1552_v12 }
 0x65c   : > { %1961 = vmatmul.mubr.msk.bf16.gmra.mrb[28].mxu1 %vm721_vm2, %v1557_v31 }
 0x727   : > { %v1958_v62 = vpop.f32.mrb[24].mxu1 }
 0x728   : > { %v1652_v37 = vmul.f32 %v1958_v62, %v1802_v40  ;;  %v1612_v57 = vpop.f32.mrb[25].mxu1 }
 0x729   : > { %v1650_v28 = vmul.f32 %v1802_v40, %v1612_v57  ;;  %v1959_v0 = vpop.f32.mrb[26].mxu1 }
 0x72a   : > { %v1667_v53 = vadd.f32 %v1803_v22, %v1652_v37  ;;  %v1653_v13 = vmul.f32 %v1959_v0, %v1802_v40  ;;  %v1615_v30 = vpop.f32.mrb[27].mxu1 }
 0x72b   : > { %v1665_v61 = vadd.f32 %v1803_v22, %v1650_v28  ;;  %v1651_v34 = vmul.f32 %v1802_v40, %v1615_v30 }
 0x72c   : > { %v1675_v3 = vadd.f32 %v1667_v53, %v596_v25  ;;  %v1668_v36 = vadd.f32 %v1803_v22, %v1653_v13 }
 0x72d   : > { %v1673_v5 = vadd.f32 %v1665_v61, %v594_v32  ;;  %v1666_v46 = vadd.f32 %v1803_v22, %v1651_v34 }
 0x72e   : > { %v1683_v39 = vmax.f32 %v1675_v3, 0.0  ;;  %v1676_v35 = vadd.f32 %v1668_v36, %v597_v29 }
 0x72f   : > { %v1681_v44 = vmax.f32 %v1673_v5, 0.0  ;;  %v1674_v48 = vadd.f32 %v1666_v46, %v595_v52  ;;  %v1962_v45 = vpop.f32.mrb[28].mxu1 }
 0x730   : > { %1692 = vst.msk [vmem:[%s2510_s28 + $0x10] sm:$0xff] %vm1689_vm4, %v1683_v39  ;;  %v1684_v38 = vmax.f32 %v1676_v35, 0.0  ;;  %v1656_v63 = vmul.f32 %v1962_v45, %v1802_v40  ;;  %v1628_v27 = vpop.f32.mrb[29].mxu1 }
 0x731   : > { %1690 = vst.msk [vmem:[%s2510_s28] sm:$0xff] %vm1689_vm4, %v1681_v44  ;;  %v1682_v2 = vmax.f32 %v1674_v48, 0.0  ;;  %v1654_v4 = vmul.f32 %v1802_v40, %v1628_v27  ;;  %v1963_v7 = vpop.f32.mrb[30].mxu1 }
 0x732   : > { %1693 = vst.msk [vmem:[%s2510_s28 + $0x18] sm:$0xff] %vm1689_vm4, %v1684_v38  ;;  %v1671_v14 = vadd.f32 %v1803_v22, %v1656_v63  ;;  %v1657_v10 = vmul.f32 %v1963_v7, %v1802_v40  ;;  %v1631_v20 = vpop.f32.mrb[31].mxu1 }
 0x733   : > { %1691 = vst.msk [vmem:[%s2510_s28 + $0x8] sm:$0xff] %vm1689_vm4, %v1682_v2  ;;  %v1669_v17 = vadd.f32 %v1803_v22, %v1654_v4  ;;  %v1655_v43 = vmul.f32 %v1802_v40, %v1631_v20 }
 0x734   : > { %v1679_v1 = vadd.f32 %v1671_v14, %v600_v11  ;;  %v1672_v33 = vadd.f32 %v1803_v22, %v1657_v10 }
 0x735   : > { %v1677_v6 = vadd.f32 %v1669_v17, %v598_v8  ;;  %v1670_v12 = vadd.f32 %v1803_v22, %v1655_v43 }
 0x736   : > { %v1687_v51 = vmax.f32 %v1679_v1, 0.0  ;;  %v1680_v31 = vadd.f32 %v1672_v33, %v601_v9 }
 0x737   : > { %v1685_v15 = vmax.f32 %v1677_v6, 0.0  ;;  %v1678_v16 = vadd.f32 %v1670_v12, %v599_v41 }
 0x738   : > { %1696 = vst.msk [vmem:[%s2510_s28 + $0x30] sm:$0xff] %vm1689_vm4, %v1687_v51  ;;  %v1688_v18 = vmax.f32 %v1680_v31, 0.0 }
 0x739   : > { %1694 = vst.msk [vmem:[%s2510_s28 + $0x20] sm:$0xff] %vm1689_vm4, %v1685_v15  ;;  %v1686_v19 = vmax.f32 %v1678_v16, 0.0 }
 0x73a   : > { %1697 = vst.msk [vmem:[%s2510_s28 + $0x38] sm:$0xff] %vm1689_vm4, %v1688_v18 }
 0x73b   : > { %1695 = vst.msk [vmem:[%s2510_s28 + $0x28] sm:$0xff] %vm1689_vm4, %v1686_v19 }
 0x73c PF: > { %s24_s29 = sadd.s32 1, %s2059_s29  }
 0x73d   : > { %p21_p4 = scmp.ge.s32.totalorder %s24_s29, 4  }
 0x73f   :  { %23 = sbr.rel (!%p21_p4) target bundleno = 1 (0x1), region = 106 }

// kernel: tpu_custom_call.1
= control target key start
LH: loop header
LB: loop body
LE: loop exit
PB: predicated region body
PF: predicated region fallthrough
CT: control target
= control target key end

     0   :  { %s2141_s29 = smov 0   ;;  %s2532_s0 = inlined_call_operand.vmem [shape: f32[2,64,8], index: 0, kind: input, shape index: {}]   ;;  %s2533_s1 = inlined_call_operand.vmem [shape: bf16[8,32], index: 1, kind: input, shape index: {}]   ;;  %s2534_s2 = inlined_call_operand.vmem [shape: f32[1,32], index: 2, kind: input, shape index: {}]   ;;  %s2535_s3 = inlined_call_operand.vmem [shape: f32[1,32], index: 3, kind: input, shape index: {}]   ;;  %s2536_s4 = inlined_call_operand.vmem [shape: bf16[8,16], index: 4, kind: input, shape index: {}]   ;;  %s2537_s5 = inlined_call_operand.vmem [shape: f32[1,16], index: 5, kind: input, shape index: {}]   ;;  %s2538_s6 = inlined_call_operand.vmem [shape: f32[1,16], index: 6, kind: input, shape index: {}]   ;;  %s2539_s7 = inlined_call_operand.vmem [shape: bf16[16,48], index: 7, kind: input, shape index: {}]   ;;  %s2540_s8 = inlined_call_operand.vmem [shape: f32[64,8], index: 8, kind: input, shape index: {}]   ;;  %s2541_s9 = inlined_call_operand.vmem [shape: f32[1,16], index: 9, kind: input, shape index: {}]   ;;  %s2542_s10 = inlined_call_operand.vmem [shape: f32[1,16], index: 10, kind: input, shape index: {}]   ;;  %s2543_s11 = inlined_call_operand.vmem [shape: bf16[16,32], index: 11, kind: input, shape index: {}]   ;;  %s2544_s12 = inlined_call_operand.vmem [shape: f32[1,32], index: 12, kind: input, shape index: {}]   ;;  %s2545_s13 = inlined_call_operand.vmem [shape: f32[1,32], index: 13, kind: input, shape index: {}]   ;;  %s2546_s14 = inlined_call_operand.vmem [shape: f32[2,64,32], index: 14, kind: output, shape index: {}]  }
   0x1 LB: > { %s1753_s30 = sadd.s32 4294967295, %s2059_s29   ;;  %p1757_p0 = scmp.ge.s32.totalorder %s2059_s29, 1  ;;  %s2059_s29 = sphi %s2141_s29, %s24_s29  }
   0x2   : > { %p412_p1 = scmp.lt.s32.totalorder %s2059_s29, 3 }
   0x4   : > { %p413_p2 = pnand %p1757_p0, %p412_p1 }
   0x5   : > { %vm495_vm0 = vcmask (!%p413_p2), 1043456   ;;  %v602_v0 = vld [vmem:[%s2536_s4] sm:$0xf] (!%p413_p2)  ;;  %p458_p3 = scmp.lt.s32.totalorder (!%p413_p2), %s1753_s30, 1  ;;  %vm482_vm1 = vcmask (!%p413_p2), 64512   ;;  %s2061_s27 = smov (!%p413_p2), 16  }
   0x6   : > { %416 = sbr.rel (%p413_p2) target bundleno = 1852 (0x73c), region = 76  ;;  %v1987_v1 = vld [vmem:[%s2539_s7] sm:$0xff] (!%p413_p2)   ;;  %1965 = vmatprep.subr.msk.bf16.mxu1 (!%p413_p2), %vm495_vm0, %v602_v0  ;;  %v604_v2 = vsel (!%p413_p2), %vm495_vm0, %v602_v0, 0  ;;  %v832_v18 = vld [vmem:[%s2540_s8 + $0x8] sm:$0xff] (!%p413_p2)  ;;  %vm721_vm2 = vcmask (!%p413_p2), 130048   ;;  %s2062_s20 = smov (!%p413_p2), 120  }
   0x7   : > { %v481_v3 = vld [vmem:[%s2533_s1] sm:$0xf] (!%p413_p2)  ;;  %1871 = vmatpush3.bf16.msra.mxu1 (!%p413_p2), %v604_v2  ;;  %vm1105_vm3 = vcmask (!%p413_p2), 523264   ;;  %s2065_s25 = smov (!%p413_p2), 8   ;;  %vm1689_vm4 = vcmask (!%p413_p2), 261120  }
   0x8   : > { %1964 = vmatprep.subr.msk.bf16.mxu0 (!%p413_p2), %vm495_vm0, %v481_v3  ;;  %v497_v4 = vsel (!%p413_p2), %vm495_vm0, %v481_v3, 0  ;;  %v831_v17 = vld [vmem:[%s2540_s8] sm:$0xff] (!%p413_p2) }
   0x9   : > { %1861 = vmatpush3.bf16.msra.mxu0 (!%p413_p2), %v497_v4  ;;  %847 = vrot.lane.b32.xlu1 (!%p413_p2), %v831_v17, %s2061_s27  ;;  %v1772_v19 = vld [vmem:[%s2537_s5] ss:$0 sm:$0xff] (!%p413_p2) }
   0xa   : > { %1880 = vmatprep.subr.bf16.mxu0 (!%p413_p2), %v1987_v1  ;;  %v1773_v21 = vld [vmem:[%s2538_s6] ss:$0 sm:$0xff] (!%p413_p2) }
   0xd   : > { %s2548_s30 = smov (!%p458_p3, %s1753_s30), 1  ;;  %849 = vrot.lane.b32.xlu1 %v832_v18, %s2061_s27  ;;  %v833_v18 = vld [vmem:[%s2540_s8 + $0x10] sm:$0xff] }
   0xe   : > { %s1806_s21 = sshll.u32 %s2548_s30, 6 }
   0xf   : > { %s462_s24 = scalar_lea.vmem %s2532_s0, %s1806_s21  ;;  %s2510_s28 = scalar_lea.vmem %s2546_s14, %s1806_s21 }
  0x10   : > { %v469_v5 = vld [vmem:[%s462_s24] sm:$0xff]  ;;  %v470_v6 = vld [vmem:[%s462_s24 + $0x8] sm:$0xff]  ;;  %v471_v7 = vld [vmem:[%s462_s24 + $0x10] sm:$0xff] }
  0x11   : > { %v477_v8 = vpack.c.bf16 %v470_v6, %v469_v5  ;;  %v472_v9 = vld [vmem:[%s462_s24 + $0x18] sm:$0xff]  ;;  %v473_v10 = vld [vmem:[%s462_s24 + $0x20] sm:$0xff]  ;;  %v474_v11 = vld [vmem:[%s462_s24 + $0x28] sm:$0xff] }
  0x12   : > { %v478_v12 = vpack.c.bf16 %v472_v9, %v471_v7  ;;  %v479_v13 = vpack.c.bf16 %v474_v11, %v473_v10  ;;  %v475_v14 = vld [vmem:[%s462_s24 + $0x30] sm:$0xff]  ;;  %v476_v15 = vld [vmem:[%s462_s24 + $0x38] sm:$0xff] }
  0x13   : > { %1872 = vmatprep.mubr.msk.bf16.mxu1 %vm482_vm1, %v477_v8  ;;  %1862 = vmatprep.mubr.msk.bf16.mxu0 %vm482_vm1, %v477_v8  ;;  %v480_v16 = vpack.c.bf16 %v476_v15, %v475_v14  ;;  %v834_v11 = vld [vmem:[%s2540_s8 + $0x18] sm:$0xff] }
  0x14   : > { %1873 = vmatmul.mubr.msk.bf16.vlgmr.msra.gmra.mrb[0].mxu1 %vm482_vm1, %v478_v12  ;;  %1863 = vmatmul.mubr.msk.bf16.vlgmr.msra.gmra.mrb[0].mxu0 %vm482_vm1, %v478_v12 }
  0x15   : > { %1876 = vmatprep.mubr.msk.bf16.mxu1 %vm482_vm1, %v479_v13  ;;  %1881 = vmatpush3.bf16.msra.mxu0 %v1987_v1 }
  0x16   : > { %1866 = vmatprep.mubr.msk.bf16.mxu0 %vm482_vm1, %v479_v13  ;;  %v836_v13 = vld [vmem:[%s2540_s8 + $0x28] sm:$0xff] }
  0x1c   : > { %1877 = vmatmul.mubr.msk.bf16.gmra.mrb[4].mxu1 %vm482_vm1, %v480_v16  ;;  %1867 = vmatmul.mubr.msk.bf16.gmra.mrb[4].mxu0 %vm482_vm1, %v480_v16 }
  0x7b   : > { %v848_v1 = vpop.permute.xlu1 %847 }
  0x7f   : > { %v850_v4 = vpop.permute.xlu1 %849 }
  0xe7   : > { %v1874_v20 = vpop.f32.mrb[0].mxu1  ;;  %v2188_v22 = vpop.f32.mrb[0].mxu0 }
  0xe8   : > { %v680_v23 = vmul.f32 %v1874_v20, %v1772_v19  ;;  %v640_v24 = vpop.f32.mrb[1].mxu1  ;;  %v2190_v25 = vpop.f32.mrb[1].mxu0 }
  0xe9   : > { %v678_v26 = vmul.f32 %v1772_v19, %v640_v24  ;;  %v1875_v27 = vpop.f32.mrb[2].mxu1  ;;  %v2192_v28 = vpop.f32.mrb[2].mxu0  ;;  %v837_v24 = vld [vmem:[%s2540_s8 + $0x30] sm:$0xff] }
  0xea   : > { %v695_v29 = vadd.f32 %v1773_v21, %v680_v23  ;;  %v681_v30 = vmul.f32 %v1875_v27, %v1772_v19  ;;  %v643_v31 = vpop.f32.mrb[3].mxu1  ;;  %v2194_v32 = vpop.f32.mrb[3].mxu0  ;;  %v838_v23 = vld [vmem:[%s2540_s8 + $0x38] sm:$0xff] }
  0xeb   : > { %v693_v33 = vadd.f32 %v1773_v21, %v678_v26  ;;  %v679_v34 = vmul.f32 %v1772_v19, %v643_v31 }
  0xec   : > { %v696_v35 = vadd.f32 %v1773_v21, %v681_v30  ;;  %v703_v37 = vmax.f32 %v695_v29, 0.0 }
  0xed   : > { %v694_v36 = vadd.f32 %v1773_v21, %v679_v34  ;;  %v701_v39 = vmax.f32 %v693_v33, 0.0 }
  0xee   : > { %v704_v38 = vmax.f32 %v696_v35, 0.0 }
  0xef   : > { %v702_v40 = vmax.f32 %v694_v36, 0.0  ;;  %v1878_v41 = vpop.f32.mrb[4].mxu1  ;;  %v2196_v42 = vpop.f32.mrb[4].mxu0 }
  0xf0   : > { %v710_v43 = vpack.c.bf16 %v704_v38, %v703_v37  ;;  %v684_v44 = vmul.f32 %v1878_v41, %v1772_v19  ;;  %v656_v45 = vpop.f32.mrb[5].mxu1  ;;  %v2198_v46 = vpop.f32.mrb[5].mxu0 }
  0xf1   : > { %v709_v47 = vpack.c.bf16 %v702_v40, %v701_v39  ;;  %v682_v48 = vmul.f32 %v1772_v19, %v656_v45  ;;  %v1879_v49 = vpop.f32.mrb[6].mxu1  ;;  %v2200_v50 = vpop.f32.mrb[6].mxu0 }
  0xf2   : > { %v699_v51 = vadd.f32 %v1773_v21, %v684_v44  ;;  %v685_v52 = vmul.f32 %v1879_v49, %v1772_v19  ;;  %v659_v53 = vpop.f32.mrb[7].mxu1  ;;  %v2202_v54 = vpop.f32.mrb[7].mxu0 }
  0xf3   : > { %v697_v55 = vadd.f32 %v1773_v21, %v682_v48  ;;  %1882 = vmatprep.mubr.msk.bf16.mxu0 %vm721_vm2, %v709_v47  ;;  %v683_v56 = vmul.f32 %v1772_v19, %v659_v53 }
  0xf4   : > { %v707_v57 = vmax.f32 %v699_v51, 0.0  ;;  %v700_v58 = vadd.f32 %v1773_v21, %v685_v52  ;;  %1883 = vmatmul.mubr.msk.bf16.vlgmr.msra.gmra.mrb[8].mxu0 %vm721_vm2, %v710_v43 }
  0xf5   : > { %v705_v59 = vmax.f32 %v697_v55, 0.0  ;;  %v698_v60 = vadd.f32 %v1773_v21, %v683_v56  ;;  %v835_v21 = vld [vmem:[%s2540_s8 + $0x20] sm:$0xff] }
  0xf6   : > { %v708_v61 = vmax.f32 %v700_v58, 0.0 }
  0xf7   : > { %v706_v62 = vmax.f32 %v698_v60, 0.0 }
  0xf8   : > { %v712_v63 = vpack.c.bf16 %v708_v61, %v707_v57 }
  0xf9   : > { %v711_v0 = vpack.c.bf16 %v706_v62, %v705_v59 }
  0xfb   : > { %1886 = vmatprep.mubr.msk.bf16.mxu0 %vm721_vm2, %v711_v0 }
  0xfc   : > { %1887 = vmatmul.mubr.msk.bf16.gmra.mrb[12].mxu0 %vm721_vm2, %v712_v63 }
 0x1c7   : > { %v1884_v2 = vpop.f32.mrb[8].mxu0 }
 0x1c8   : > { %v768_v3 = vpop.f32.mrb[9].mxu0 }
 0x1c9   : > { %807 = vrot.lane.b32.xlu0 %v768_v3, %s2062_s20  ;;  %v1885_v5 = vpop.f32.mrb[10].mxu0  ;;  %v2212_v8 = vadd.f32 %v848_v1, %v768_v3 }
 0x1ca   : > { %v2209_v6 = vpack.c.bf16 %v1885_v5, %v1884_v2  ;;  %813 = vrot.lane.b32.xlu1 %v1885_v5, %s2062_s20  ;;  %v771_v7 = vpop.f32.mrb[11].mxu0 }
 0x1cb   : > { %v2214_v9 = vadd.f32 %v850_v4, %v771_v7  ;;  %v2216_v10 = vpack.c.bf16 %v771_v7, %v768_v3 }
 0x1cd   : > { %809 = vrot.lane.b32.xlu0 %v771_v7, %s2062_s20  ;;  %1898 = vmatprep.mubr.msk.bf16.mxu1 %vm482_vm1, %v2216_v10  ;;  %v895_v12 = vpack.c.bf16 %v2214_v9, %v2212_v8 }
 0x1ce   : > { %853 = vrot.lane.b32.xlu1 %v834_v11, %s2061_s27 }
 0x1cf   : > { %v1888_v14 = vpop.f32.mrb[12].mxu0 }
 0x1d0   : > { %v784_v15 = vpop.f32.mrb[13].mxu0 }
 0x1d1   : > { %811 = vrot.lane.b32.xlu0 %v1884_v2, %s2062_s20  ;;  %v1889_v16 = vpop.f32.mrb[14].mxu0 }
 0x1d2   : > { %857 = vrot.lane.b32.xlu1 %v836_v13, %s2061_s27  ;;  %v2232_v17 = vpack.c.bf16 %v1889_v16, %v1888_v14  ;;  %v787_v19 = vpop.f32.mrb[15].mxu0 }
 0x1d3   : > { %v2237_v20 = vpack.c.bf16 %v787_v19, %v784_v15 }
 0x1d5   : > { %851 = vrot.lane.b32.xlu0 %v833_v18, %s2061_s27 }
 0x1d6   : > { %817 = vrot.lane.b32.xlu1 %v787_v19, %s2062_s20 }
 0x1d9   : > { %855 = vrot.lane.b32.xlu0 %v835_v21, %s2061_s27 }
 0x1da   : > { %821 = vrot.lane.b32.xlu1 %v1889_v16, %s2062_s20 }
 0x1dd   : > { %815 = vrot.lane.b32.xlu0 %v784_v15, %s2062_s20 }
 0x1de   : > { %861 = vrot.lane.b32.xlu1 %v838_v23, %s2061_s27 }
 0x1e1   : > { %819 = vrot.lane.b32.xlu0 %v1888_v14, %s2062_s20  ;;  %s2063_s20 = smov 112  }
 0x1e5   : > { %859 = vrot.lane.b32.xlu0 %v837_v24, %s2061_s27  ;;  %s2064_s27 = smov 96  }
 0x23b   : > { %v808_v26 = vpop.permute.xlu0 %807 }
 0x23c   : > { %v814_v27 = vpop.permute.xlu1 %813  ;;  %v879_v30 = vadd.f32 %v848_v1, %v808_v26 }
 0x23f   : > { %v810_v29 = vpop.permute.xlu0 %809 }
 0x240   : > { %v880_v31 = vadd.f32 %v850_v4, %v810_v29  ;;  %v2256_v33 = vpack.c.bf16 %v810_v29, %v808_v26  ;;  %v854_v34 = vpop.permute.xlu1 %853 }
 0x241   : > { %v874_v40 = vadd.f32 %v1885_v5, %v854_v34  ;;  %v882_v41 = vadd.f32 %v854_v34, %v814_v27 }
 0x242   : > { %v899_v35 = vpack.c.bf16 %v880_v31, %v879_v30  ;;  %1914 = vmatprep.mubr.msk.bf16.mxu0 %vm482_vm1, %v2256_v33 }
 0x243   : > { %v812_v36 = vpop.permute.xlu0 %811 }
 0x244   : > { %v2260_v37 = vpack.c.bf16 %v814_v27, %v812_v36  ;;  %v858_v38 = vpop.permute.xlu1 %857  ;;  %1008 = vrot.lane.b32.xlu0 %v899_v35, %s2063_s20 }
 0x245   : > { %v876_v51 = vadd.f32 %v858_v38, %v787_v19 }
 0x247   : > { %v852_v39 = vpop.permute.xlu0 %851 }
 0x248   : > { %v873_v43 = vadd.f32 %v1884_v2, %v852_v39  ;;  %v881_v44 = vadd.f32 %v852_v39, %v812_v36  ;;  %v818_v45 = vpop.permute.xlu1 %817 }
 0x249   : > { %v884_v57 = vadd.f32 %v858_v38, %v818_v45 }
 0x24a   : > { %v896_v47 = vpack.c.bf16 %v874_v40, %v873_v43  ;;  %v900_v48 = vpack.c.bf16 %v882_v41, %v881_v44 }
 0x24b   : > { %v856_v49 = vpop.permute.xlu0 %855 }
 0x24c   : > { %v875_v52 = vadd.f32 %v856_v49, %v784_v15  ;;  %1010 = vrot.lane.b32.xlu1 %v900_v48, %s2063_s20  ;;  %v822_v55 = vpop.permute.xlu1 %821 }
 0x24e   : > { %v897_v53 = vpack.c.bf16 %v876_v51, %v875_v52 }
 0x24f   : > { %v816_v56 = vpop.permute.xlu0 %815 }
 0x250   : > { %v883_v58 = vadd.f32 %v856_v49, %v816_v56  ;;  %v2264_v59 = vpack.c.bf16 %v818_v45, %v816_v56  ;;  %v862_v63 = vpop.permute.xlu1 %861 }
 0x251   : > { %v878_v1 = vadd.f32 %v1889_v16, %v862_v63  ;;  %v886_v2 = vadd.f32 %v862_v63, %v822_v55 }
 0x252   : > { %v901_v60 = vpack.c.bf16 %v884_v57, %v883_v58 }
 0x253   : > { %v820_v61 = vpop.permute.xlu0 %819 }
 0x254   : > { %v2266_v62 = vpack.c.bf16 %v822_v55, %v820_v61  ;;  %1012 = vrot.lane.b32.xlu0 %v901_v60, %s2063_s20 }
 0x257   : > { %v860_v0 = vpop.permute.xlu0 %859 }
 0x258   : > { %v877_v3 = vadd.f32 %v1888_v14, %v860_v0  ;;  %v885_v4 = vadd.f32 %v860_v0, %v820_v61  ;;  %907 = vrot.lane.b32.xlu0 %v895_v12, %s2063_s20 }
 0x25a   : > { %v898_v5 = vpack.c.bf16 %v878_v1, %v877_v3  ;;  %v902_v7 = vpack.c.bf16 %v886_v2, %v885_v4 }
 0x25c   : > { %1014 = vrot.lane.b32.xlu1 %v902_v7, %s2063_s20  ;;  %911 = vrot.lane.b32.xlu0 %v897_v53, %s2063_s20 }
 0x260   : > { %909 = vrot.lane.b32.xlu1 %v896_v47, %s2063_s20 }
 0x264   : > { %913 = vrot.lane.b32.xlu1 %v898_v5, %s2063_s20 }
 0x2b6   : > { %v1009_v11 = vpop.permute.xlu0 %1008 }
 0x2b7   : > { %v1029_v13 = vsel %vm482_vm1, %v1009_v11, 0  ;;  %1970 = vmatprep.subr.msk.bf16.mxu0 %vm482_vm1, %v1009_v11 }
 0x2b8   : > { %1907 = vmatpush3.bf16.xpose.msra.mxu0 %v1029_v13 }
 0x2be   : > { %v1011_v14 = vpop.permute.xlu1 %1010 }
 0x2bf   : > { %v1032_v8 = vsel %vm482_vm1, %v1011_v14, 0  ;;  %1971 = vmatprep.subr.msk.bf16.mxu0 %vm482_vm1, %v1011_v14 }
 0x2c0   : > { %1909 = vmatpush3.bf16.xpose.msra.mxu0 %v1032_v8 }
 0x2c6   : > { %v1013_v9 = vpop.permute.xlu0 %1012 }
 0x2c7   : > { %v1035_v12 = vsel %vm482_vm1, %v1013_v9, 0  ;;  %1972 = vmatprep.subr.msk.bf16.mxu0 %vm482_vm1, %v1013_v9 }
 0x2c8   : > { %1911 = vmatpush3.bf16.xpose.msra.mxu0 %v1035_v12 }
 0x2ca   : > { %v908_v15 = vpop.permute.xlu0 %907 }
 0x2cb   : > { %v928_v16 = vsel %vm482_vm1, %v908_v15, 0  ;;  %1966 = vmatprep.subr.msk.bf16.mxu1 %vm482_vm1, %v908_v15 }
 0x2cc   : > { %1891 = vmatpush3.bf16.xpose.msra.mxu1 %v928_v16 }
 0x2ce   : > { %v1015_v18 = vpop.permute.xlu1 %1014  ;;  %v912_v24 = vpop.permute.xlu0 %911 }
 0x2cf   : > { %v1038_v19 = vsel %vm482_vm1, %v1015_v18, 0  ;;  %1973 = vmatprep.subr.msk.bf16.mxu0 %vm482_vm1, %v1015_v18  ;;  %v934_v26 = vsel %vm482_vm1, %v912_v24, 0 }
 0x2d0   : > { %1913 = vmatpush3.bf16.xpose.msra.mxu0 %v1038_v19 }
 0x2d2   : > { %v910_v21 = vpop.permute.xlu1 %909 }
 0x2d3   : > { %v931_v23 = vsel %vm482_vm1, %v910_v21, 0  ;;  %1967 = vmatprep.subr.msk.bf16.mxu1 %vm482_vm1, %v910_v21 }
 0x2d4   : > { %1893 = vmatpush3.bf16.xpose.msra.mxu1 %v931_v23 }
 0x2d5   : > { %1968 = vmatprep.subr.msk.bf16.mxu1 %vm482_vm1, %v912_v24 }
 0x2d6   : > { %v914_v27 = vpop.permute.xlu1 %913 }
 0x2d7   : > { %1915 = vmatmul.mubr.msk.bf16.vlgmr.msra.gmra.mrb[16].mxu0 %vm482_vm1, %v2260_v37  ;;  %v937_v29 = vsel %vm482_vm1, %v914_v27, 0 }
 0x2d8   : > { %1918 = vmatprep.mubr.msk.bf16.mxu0 %vm482_vm1, %v2264_v59 }
 0x2dc   : > { %1895 = vmatpush3.bf16.xpose.msra.mxu1 %v934_v26 }
 0x2dd   : > { %1969 = vmatprep.subr.msk.bf16.mxu1 %vm482_vm1, %v914_v27 }
 0x2df   : > { %1919 = vmatmul.mubr.msk.bf16.gmra.mrb[20].mxu0 %vm482_vm1, %v2266_v62 }
 0x2e4   : > { %1897 = vmatpush3.bf16.xpose.msra.mxu1 %v937_v29 }
 0x2eb   : > { %1899 = vmatmul.mubr.msk.bf16.vlgmr.msra.gmra.mrb[8].mxu1 %vm482_vm1, %v2209_v6 }
 0x2ec   : > { %1902 = vmatprep.mubr.msk.bf16.mxu1 %vm482_vm1, %v2237_v20 }
 0x2f3   : > { %1903 = vmatmul.mubr.msk.bf16.gmra.mrb[12].mxu1 %vm482_vm1, %v2232_v17 }
 0x3aa   : > { %v1916_v30 = vpop.f32.mrb[16].mxu0 }
 0x3ab   : > { %v1074_v31 = vpop.f32.mrb[17].mxu0  ;;  %v1136_v34 = vsel %vm1105_vm3, %v1916_v30, -inf }
 0x3ac   : > { %v1917_v35 = vpop.f32.mrb[18].mxu0  ;;  %1137 = vmax.xlane.f32.xlu0 %v1136_v34  ;;  %v1130_v39 = vsel %vm1105_vm3, %v1074_v31, -inf }
 0x3ad   : > { %v1077_v36 = vpop.f32.mrb[19].mxu0  ;;  %v1139_v44 = vsel %vm1105_vm3, %v1917_v35, -inf }
 0x3ae   : > { %v1133_v38 = vsel %vm1105_vm3, %v1077_v36, -inf }
 0x3af   : > { %1134 = vmax.xlane.f32.xlu1 %v1133_v38 }
 0x3b0   : > { %1131 = vmax.xlane.f32.xlu0 %v1130_v39 }
 0x3b2   : > { %v1920_v40 = vpop.f32.mrb[20].mxu0 }
 0x3b3   : > { %v1090_v41 = vpop.f32.mrb[21].mxu0  ;;  %v1148_v43 = vsel %vm1105_vm3, %v1920_v40, -inf }
 0x3b4   : > { %1149 = vmax.xlane.f32.xlu1 %v1148_v43  ;;  %v2310_v45 = vpop.f32.mrb[22].mxu0  ;;  %1140 = vmax.xlane.f32.xlu0 %v1139_v44  ;;  %v1142_v49 = vsel %vm1105_vm3, %v1090_v41, -inf }
 0x3b5   : > { %v2312_v47 = vpop.f32.mrb[23].mxu0  ;;  %v1151_v51 = vsel %vm1105_vm3, %v2310_v45, -inf }
 0x3b6   : > { %v1145_v48 = vsel %vm1105_vm3, %v2312_v47, -inf }
 0x3b8   : > { %1143 = vmax.xlane.f32.xlu1 %v1142_v49  ;;  %1146 = vmax.xlane.f32.xlu0 %v1145_v48 }
 0x3bc   : > { %1152 = vmax.xlane.f32.xlu0 %v1151_v51 }
 0x3be   : > { %v2319_v52 = vpop.f32.mrb[8].mxu1 }
 0x3bf   : > { %v2321_v53 = vpop.f32.mrb[9].mxu1  ;;  %v1112_v60 = vsel %vm1105_vm3, %v2319_v52, -inf }
 0x3c0   : > { %v2323_v55 = vpop.f32.mrb[10].mxu1  ;;  %v1106_v56 = vsel %vm1105_vm3, %v2321_v53, -inf }
 0x3c1   : > { %1107 = vmax.xlane.f32.xlu1 %v1106_v56  ;;  %v2327_v57 = vpop.f32.mrb[11].mxu1  ;;  %v1115_v63 = vsel %vm1105_vm3, %v2323_v55, -inf }
 0x3c2   : > { %v1109_v58 = vsel %vm1105_vm3, %v2327_v57, -inf }
 0x3c3   : > { %1110 = vmax.xlane.f32.xlu0 %v1109_v58 }
 0x3c5   : > { %1113 = vmax.xlane.f32.xlu1 %v1112_v60 }
 0x3c6   : > { %v2333_v61 = vpop.f32.mrb[12].mxu1 }
 0x3c7   : > { %1116 = vmax.xlane.f32.xlu0 %v1115_v63  ;;  %v2337_v0 = vpop.f32.mrb[13].mxu1  ;;  %v1124_v5 = vsel %vm1105_vm3, %v2333_v61, -inf }
 0x3c8   : > { %v2339_v1 = vpop.f32.mrb[14].mxu1  ;;  %v1118_v2 = vsel %vm1105_vm3, %v2337_v0, -inf }
 0x3c9   : > { %1119 = vmax.xlane.f32.xlu1 %v1118_v2  ;;  %v2343_v3 = vpop.f32.mrb[15].mxu1  ;;  %v1127_v7 = vsel %vm1105_vm3, %v2339_v1, -inf }
 0x3ca   : > { %v1121_v4 = vsel %vm1105_vm3, %v2343_v3, -inf }
 0x3cb   : > { %1122 = vmax.xlane.f32.xlu0 %v1121_v4 }
 0x3cd   : > { %1125 = vmax.xlane.f32.xlu1 %v1124_v5 }
 0x3cf   : > { %1128 = vmax.xlane.f32.xlu0 %v1127_v7 }
 0x3de   : > { %1387 = vrot.lane.b32.xlu1 %v2256_v33, %s2064_s27 }
 0x439   : > { %v1138_v11 = vpop.xlane.xlu0 %1137 }
 0x43a   : > { %v1164_v13 = vsub.f32 %v1916_v30, %v1138_v11 }
 0x43c   : > { %v1190_v14 = vmul.f32 1.442695, %v1164_v13  ;;  %v1135_v8 = vpop.xlane.xlu1 %1134 }
 0x43d   : > { %v1132_v9 = vpop.xlane.xlu0 %1131  ;;  %v1163_v16 = vsub.f32 %v1077_v36, %v1135_v8 }
 0x43e   : > { %1989 = vpow2.f32 %v1190_v14  ;;  %v1162_v12 = vsub.f32 %v1074_v31, %v1132_v9 }
 0x43f   : > { %v1188_v27 = vmul.f32 1.442695, %v1163_v16 }
 0x440   : > { %v1186_v15 = vmul.f32 1.442695, %v1162_v12 }
 0x441   : > { %v1150_v18 = vpop.xlane.xlu1 %1149  ;;  %v1141_v19 = vpop.xlane.xlu0 %1140 }
 0x442   : > { %1991 = vpow2.f32 %v1186_v15  ;;  %v1168_v21 = vsub.f32 %v1920_v40, %v1150_v18  ;;  %v1165_v23 = vsub.f32 %v1917_v35, %v1141_v19 }
 0x444   : > { %v1198_v24 = vmul.f32 1.442695, %v1168_v21  ;;  %v1192_v26 = vmul.f32 1.442695, %v1165_v23 }
 0x445   : > { %v1144_v29 = vpop.xlane.xlu1 %1143  ;;  %v1147_v34 = vpop.xlane.xlu0 %1146 }
 0x446   : > { %1993 = vpow2.f32 %v1198_v24  ;;  %v1166_v33 = vsub.f32 %v1090_v41, %v1144_v29  ;;  %v1167_v31 = vsub.f32 %v2312_v47, %v1147_v34 }
 0x447   : > { %1995 = vpow2.f32 %v1192_v26 }
 0x448   : > { %v2353_v30 = vpop.eup %1989  ;;  %v1194_v38 = vmul.f32 1.442695, %v1166_v33  ;;  %1997 = vpow2.f32 %v1188_v27  ;;  %v1196_v44 = vmul.f32 1.442695, %v1167_v31 }
 0x449   : > { %v1153_v36 = vpop.xlane.xlu0 %1152  ;;  %v1232_v39 = vsel %vm1105_vm3, %v2353_v30, 0.0 }
 0x44a   : > { %1999 = vpow2.f32 %v1194_v38  ;;  %v1169_v35 = vsub.f32 %v2310_v45, %v1153_v36  ;;  %1233 = vadd.xlane.f32.xlu1 %v1232_v39 }
 0x44c   : > { %v2359_v40 = vpop.eup %1991  ;;  %v1200_v43 = vmul.f32 1.442695, %v1169_v35 }
 0x44d   : > { %v1226_v41 = vsel %vm1105_vm3, %v2359_v40, 0.0 }
 0x44e   : > { %2001 = vpow2.f32 %v1200_v43  ;;  %v1108_v48 = vpop.xlane.xlu1 %1107  ;;  %1227 = vadd.xlane.f32.xlu1 %v1226_v41 }
 0x44f   : > { %2003 = vpow2.f32 %v1196_v44  ;;  %v1154_v18 = vsub.f32 %v2321_v53, %v1108_v48 }
 0x450   : > { %v2363_v49 = vpop.eup %1993  ;;  %v1111_v9 = vpop.xlane.xlu0 %1110 }
 0x451   : > { %v2365_v47 = vpop.eup %1995  ;;  %v1244_v51 = vsel %vm1105_vm3, %v2363_v49, 0.0  ;;  %v1155_v12 = vsub.f32 %v2327_v57, %v1111_v9 }
 0x452   : > { %v1114_v45 = vpop.xlane.xlu1 %1113  ;;  %1245 = vadd.xlane.f32.xlu1 %v1244_v51  ;;  %v1235_v56 = vsel %vm1105_vm3, %v2365_v47, 0.0  ;;  %v2371_v58 = vpop.eup %1997 }
 0x453   : > { %1236 = vadd.xlane.f32.xlu0 %v1235_v56  ;;  %v1229_v4 = vsel %vm1105_vm3, %v2371_v58, 0.0  ;;  %v1172_v15 = vmul.f32 1.442695, %v1155_v12  ;;  %v1156_v24 = vsub.f32 %v2319_v52, %v1114_v45 }
 0x454   : > { %v2373_v60 = vpop.eup %1999  ;;  %v1117_v19 = vpop.xlane.xlu0 %1116 }
 0x455   : > { %v1238_v63 = vsel %vm1105_vm3, %v2373_v60, 0.0  ;;  %2005 = vpow2.f32 %v1172_v15  ;;  %v1157_v57 = vsub.f32 %v2323_v55, %v1117_v19 }
 0x456   : > { %v1120_v2 = vpop.xlane.xlu1 %1119  ;;  %1239 = vadd.xlane.f32.xlu1 %v1238_v63 }
 0x457   : > { %1230 = vadd.xlane.f32.xlu0 %v1229_v4  ;;  %v1158_v16 = vsub.f32 %v2337_v0, %v1120_v2  ;;  %v1176_v0 = vmul.f32 1.442695, %v1157_v57 }
 0x458   : > { %v2379_v5 = vpop.eup %2001 }
 0x459   : > { %v1247_v7 = vsel %vm1105_vm3, %v2379_v5, 0.0  ;;  %v2383_v13 = vpop.eup %2003  ;;  %v1178_v21 = vmul.f32 1.442695, %v1158_v16 }
 0x45a   : > { %v1126_v11 = vpop.xlane.xlu1 %1125  ;;  %v1241_v8 = vsel %vm1105_vm3, %v2383_v13, 0.0 }
 0x45b   : > { %1248 = vadd.xlane.f32.xlu0 %v1247_v7  ;;  %v1160_v23 = vsub.f32 %v2333_v61, %v1126_v11  ;;  %2007 = vpow2.f32 %v1178_v21 }
 0x45d   : > { %v1182_v26 = vmul.f32 1.442695, %v1160_v23 }
 0x45e   : > { %v1388_v14 = vpop.permute.xlu1 %1387 }
 0x45f   : > { %1242 = vadd.xlane.f32.xlu0 %v1241_v8  ;;  %1938 = vmatprep.subr.bf16.mxu0 %v1388_v14  ;;  %v2400_v27 = vpop.eup %2005 }
 0x460   : > { %1939 = vmatpush3.bf16.msra.mxu0 %v1388_v14  ;;  %v1205_v52 = vsel %vm1105_vm3, %v2400_v27, 0.0 }
 0x465   : > { %v2405_v33 = vpop.eup %2007 }
 0x467   : > { %1391 = vrot.lane.b32.xlu1 %v2264_v59, %s2064_s27  ;;  %v1170_v59 = vmul.f32 1.442695, %v1154_v18 }
 0x469   : > { %2009 = vpow2.f32 %v1170_v59 }
 0x46a   : > { %2011 = vpow2.f32 %v1182_v26 }
 0x46b   : > { %1393 = vrot.lane.b32.xlu1 %v2266_v62, %s2064_s27  ;;  %v1123_v62 = vpop.xlane.xlu0 %1122 }
 0x46c   : > { %v1159_v53 = vsub.f32 %v2343_v3, %v1123_v62  ;;  %v1214_v3 = vsel %vm1105_vm3, %v2405_v33, 0.0 }
 0x46e   : > { %v1180_v61 = vmul.f32 1.442695, %v1159_v53 }
 0x46f   : > { %v1129_v29 = vpop.xlane.xlu0 %1128 }
 0x470   : > { %v1161_v34 = vsub.f32 %v2339_v1, %v1129_v29 }
 0x472   : > { %v1184_v55 = vmul.f32 1.442695, %v1161_v34 }
 0x473   : > { %v2407_v38 = vpop.eup %2009 }
 0x474   : > { %v2411_v31 = vpop.eup %2011  ;;  %v1202_v36 = vsel %vm1105_vm3, %v2407_v38, 0.0 }
 0x475   : > { %1389 = vrot.lane.b32.xlu0 %v2260_v37, %s2064_s27  ;;  %v1174_v37 = vmul.f32 1.442695, %v1156_v24  ;;  %v1220_v39 = vsel %vm1105_vm3, %v2411_v31, 0.0 }
 0x477   : > { %2013 = vpow2.f32 %v1174_v37 }
 0x478   : > { %2015 = vpow2.f32 %v1176_v0 }
 0x479   : > { %2017 = vpow2.f32 %v1180_v61 }
 0x47a   : > { %2019 = vpow2.f32 %v1184_v55 }
 0x481   : > { %v2415_v1 = vpop.eup %2013 }
 0x482   : > { %v1208_v35 = vsel %vm1105_vm3, %v2415_v1, 0.0  ;;  %v2421_v43 = vpop.eup %2015 }
 0x483   : > { %v1211_v44 = vsel %vm1105_vm3, %v2421_v43, 0.0  ;;  %v2425_v41 = vpop.eup %2017 }
 0x484   : > { %v1217_v48 = vsel %vm1105_vm3, %v2425_v41, 0.0  ;;  %v2429_v51 = vpop.eup %2019 }
 0x485   : > { %v1223_v45 = vsel %vm1105_vm3, %v2429_v51, 0.0 }
 0x48f   : > { %1206 = vadd.xlane.f32.xlu1 %v1205_v52 }
 0x493   : > { %1215 = vadd.xlane.f32.xlu1 %v1214_v3 }
 0x494   : > { %1203 = vadd.xlane.f32.xlu0 %v1202_v36 }
 0x497   : > { %1221 = vadd.xlane.f32.xlu1 %v1220_v39 }
 0x498   : > { %1209 = vadd.xlane.f32.xlu0 %v1208_v35 }
 0x49c   : > { %1212 = vadd.xlane.f32.xlu0 %v1211_v44 }
 0x4a0   : > { %1218 = vadd.xlane.f32.xlu0 %v1217_v48 }
 0x4a4   : > { %1224 = vadd.xlane.f32.xlu0 %v1223_v45 }
 0x4a8   : > { %1294 = vrot.lane.b32.xlu1 %v2216_v10, %s2064_s27 }
 0x4ac   : > { %1298 = vrot.lane.b32.xlu1 %v2237_v20, %s2064_s27 }
 0x4b0   : > { %1300 = vrot.lane.b32.xlu1 %v2232_v17, %s2064_s27 }
 0x4ba   : > { %1296 = vrot.lane.b32.xlu0 %v2209_v6, %s2064_s27 }
 0x4d7   : > { %v1234_v56 = vpop.xlane.xlu1 %1233 }
 0x4db   : > { %v1228_v63 = vpop.xlane.xlu1 %1227 }
 0x4dc   : > { %2021 = vrcp.f32 %v1228_v63 }
 0x4df   : > { %v1246_v4 = vpop.xlane.xlu1 %1245 }
 0x4e0   : > { %v1237_v2 = vpop.xlane.xlu0 %1236 }
 0x4e3   : > { %v1240_v14 = vpop.xlane.xlu1 %1239 }
 0x4e4   : > { %v1231_v7 = vpop.xlane.xlu0 %1230 }
 0x4e5   : > { %2023 = vrcp.f32 %v1231_v7 }
 0x4e6   : > { %2025 = vrcp.f32 %v1237_v2  ;;  %v2022_v20 = vpop.eup %2021 }
 0x4e7   : > { %2027 = vrcp.f32 %v1234_v56  ;;  %v1392_v17 = vpop.permute.xlu1 %1391  ;;  %v1274_v6 = vmul.f32 %v2022_v20, %v2359_v40 }
 0x4e8   : > { %v1249_v11 = vpop.xlane.xlu0 %1248  ;;  %2029 = vrcp.f32 %v1240_v14 }
 0x4eb   : > { %v1394_v21 = vpop.permute.xlu1 %1393 }
 0x4ec   : > { %v1243_v10 = vpop.xlane.xlu0 %1242 }
 0x4ed   : > { %2031 = vrcp.f32 %v1243_v10 }
 0x4ee   : > { %2033 = vrcp.f32 %v1249_v11 }
 0x4ef   : > { %v2024_v8 = vpop.eup %2023  ;;  %2035 = vrcp.f32 %v1246_v4 }
 0x4f0   : > { %v1390_v9 = vpop.permute.xlu0 %1389  ;;  %v1275_v12 = vmul.f32 %v2024_v8, %v2371_v58  ;;  %v2026_v16 = vpop.eup %2025 }
 0x4f1   : > { %1940 = vmatprep.subr.bf16.mxu0 %v1390_v9  ;;  %v2028_v18 = vpop.eup %2027  ;;  %v1277_v59 = vmul.f32 %v2026_v16, %v2365_v47 }
 0x4f2   : > { %1941 = vmatpush3.bf16.msra.mxu0 %v1390_v9  ;;  %v1286_v15 = vpack.c.bf16 %v1275_v12, %v1274_v6  ;;  %v2030_v19 = vpop.eup %2029  ;;  %v1276_v58 = vmul.f32 %v2028_v18, %v2353_v30 }
 0x4f3   : > { %1942 = vmatprep.subr.bf16.mxu0 %v1392_v17  ;;  %v1278_v24 = vmul.f32 %v2030_v19, %v2373_v60 }
 0x4f4   : > { %1946 = vmatprep.mubr.msk.bf16.mxu0 %vm1105_vm3, %v1286_v15  ;;  %v1287_v62 = vpack.c.bf16 %v1277_v59, %v1276_v58 }
 0x4f6   : > { %1943 = vmatpush3.bf16.msra.mxu0 %v1392_v17 }
 0x4f7   : > { %v2032_v23 = vpop.eup %2031  ;;  %1944 = vmatprep.subr.bf16.mxu0 %v1394_v21 }
 0x4f8   : > { %v1279_v40 = vmul.f32 %v2032_v23, %v2383_v13  ;;  %v2034_v26 = vpop.eup %2033 }
 0x4f9   : > { %v2036_v57 = vpop.eup %2035  ;;  %v1281_v0 = vmul.f32 %v2034_v26, %v2379_v5 }
 0x4fa   : > { %1945 = vmatpush3.bf16.msra.mxu0 %v1394_v21  ;;  %v1288_v37 = vpack.c.bf16 %v1279_v40, %v1278_v24  ;;  %v1280_v47 = vmul.f32 %v2036_v57, %v2363_v49 }
 0x4fc   : > { %v1289_v53 = vpack.c.bf16 %v1281_v0, %v1280_v47 }
 0x4fd   : > { %1947 = vmatmul.mubr.msk.bf16.vlgmr.msra.gmra.mrb[24].mxu0 %vm1105_vm3, %v1287_v62  ;;  %v1795_v62 = vld [vmem:[%s2541_s9] ss:$0 sm:$0xff] }
 0x4fe   : > { %1950 = vmatprep.mubr.msk.bf16.mxu0 %vm1105_vm3, %v1288_v37  ;;  %v1796_v37 = vld [vmem:[%s2542_s10] ss:$0 sm:$0xff] }
 0x505   : > { %1951 = vmatmul.mubr.msk.bf16.gmra.mrb[28].mxu0 %vm1105_vm3, %v1289_v53 }
 0x51c   : > { %v1207_v13 = vpop.xlane.xlu1 %1206 }
 0x51d   : > { %2037 = vrcp.f32 %v1207_v13 }
 0x520   : > { %v1216_v30 = vpop.xlane.xlu1 %1215 }
 0x521   : > { %v1204_v29 = vpop.xlane.xlu0 %1203 }
 0x522   : > { %2039 = vrcp.f32 %v1204_v29 }
 0x524   : > { %v1222_v60 = vpop.xlane.xlu1 %1221 }
 0x525   : > { %v1210_v61 = vpop.xlane.xlu0 %1209 }
 0x527   : > { %v2038_v55 = vpop.eup %2037 }
 0x528   : > { %v1295_v34 = vpop.permute.xlu1 %1294  ;;  %v1267_v49 = vmul.f32 %v2038_v55, %v2400_v27 }
 0x529   : > { %v1213_v52 = vpop.xlane.xlu0 %1212  ;;  %1922 = vmatprep.subr.bf16.mxu1 %v1295_v34 }
 0x52a   : > { %1923 = vmatpush3.bf16.msra.mxu1 %v1295_v34  ;;  %2041 = vrcp.f32 %v1213_v52 }
 0x52c   : > { %v2040_v3 = vpop.eup %2039  ;;  %v1299_v44 = vpop.permute.xlu1 %1298 }
 0x52d   : > { %v1219_v36 = vpop.xlane.xlu0 %1218  ;;  %v1266_v5 = vmul.f32 %v2040_v3, %v2407_v38 }
 0x52e   : > { %2043 = vrcp.f32 %v1219_v36 }
 0x52f   : > { %v1282_v39 = vpack.c.bf16 %v1267_v49, %v1266_v5  ;;  %2045 = vrcp.f32 %v1210_v61 }
 0x530   : > { %2047 = vrcp.f32 %v1216_v30  ;;  %v1301_v63 = vpop.permute.xlu1 %1300 }
 0x531   : > { %1930 = vmatprep.mubr.msk.bf16.mxu1 %vm1105_vm3, %v1282_v39  ;;  %v1225_v35 = vpop.xlane.xlu0 %1224 }
 0x532   : > { %2049 = vrcp.f32 %v1225_v35 }
 0x533   : > { %2051 = vrcp.f32 %v1222_v60 }
 0x534   : > { %v2042_v45 = vpop.eup %2041 }
 0x535   : > { %v1297_v48 = vpop.permute.xlu0 %1296  ;;  %v1269_v2 = vmul.f32 %v2042_v45, %v2421_v43 }
 0x536   : > { %1924 = vmatprep.subr.bf16.mxu1 %v1297_v48 }
 0x537   : > { %1925 = vmatpush3.bf16.msra.mxu1 %v1297_v48 }
 0x538   : > { %1926 = vmatprep.subr.bf16.mxu1 %v1299_v44  ;;  %v2044_v56 = vpop.eup %2043 }
 0x539   : > { %v2046_v38 = vpop.eup %2045  ;;  %v1271_v4 = vmul.f32 %v2044_v56, %v2425_v41 }
 0x53a   : > { %v2048_v27 = vpop.eup %2047  ;;  %v1268_v7 = vmul.f32 %v2046_v38, %v2415_v1  ;;  %v1988_v1 = vld [vmem:[%s2543_s11] sm:$0xff]  }
 0x53b   : > { %1927 = vmatpush3.bf16.msra.mxu1 %v1299_v44  ;;  %v1270_v11 = vmul.f32 %v2048_v27, %v2405_v33 }
 0x53c   : > { %1928 = vmatprep.subr.bf16.mxu1 %v1301_v63  ;;  %v1283_v14 = vpack.c.bf16 %v1269_v2, %v1268_v7  ;;  %v2050_v10 = vpop.eup %2049 }
 0x53d   : > { %v1284_v20 = vpack.c.bf16 %v1271_v4, %v1270_v11  ;;  %v2052_v8 = vpop.eup %2051  ;;  %v1273_v17 = vmul.f32 %v2050_v10, %v2429_v51 }
 0x53e   : > { %v1272_v43 = vmul.f32 %v2052_v8, %v2411_v31 }
 0x53f   : > { %1929 = vmatpush3.bf16.msra.mxu1 %v1301_v63 }
 0x540   : > { %v1285_v9 = vpack.c.bf16 %v1273_v17, %v1272_v43  ;;  %1954 = vmatprep.subr.bf16.mxu1 %v1988_v1 }
 0x542   : > { %1931 = vmatmul.mubr.msk.bf16.vlgmr.msra.gmra.mrb[16].mxu1 %vm1105_vm3, %v1283_v14 }
 0x543   : > { %1934 = vmatprep.mubr.msk.bf16.mxu1 %vm1105_vm3, %v1284_v20  ;;  %1955 = vmatpush3.bf16.msra.mxu1 %v1988_v1 }
 0x54a   : > { %1935 = vmatmul.mubr.msk.bf16.gmra.mrb[20].mxu1 %vm1105_vm3, %v1285_v9 }
 0x5d0   : > { %v1948_v33 = vpop.f32.mrb[24].mxu0 }
 0x5d1   : > { %v1445_v41 = vpop.f32.mrb[25].mxu0 }
 0x5d2   : > { %1484 = vrot.lane.b32.xlu0 %v1445_v41, %s2065_s25  ;;  %v1949_v6 = vpop.f32.mrb[26].mxu0 }
 0x5d3   : > { %v1448_v12 = vpop.f32.mrb[27].mxu0 }
 0x5d4   : > { %1486 = vrot.lane.b32.xlu1 %v1448_v12, %s2065_s25 }
 0x5d6   : > { %1488 = vrot.lane.b32.xlu0 %v1948_v33, %s2065_s25 }
 0x5d8   : > { %1490 = vrot.lane.b32.xlu1 %v1949_v6, %s2065_s25  ;;  %v1952_v51 = vpop.f32.mrb[28].mxu0 }
 0x5d9   : > { %v1461_v31 = vpop.f32.mrb[29].mxu0 }
 0x5da   : > { %1492 = vrot.lane.b32.xlu0 %v1461_v31, %s2065_s25  ;;  %v1953_v15 = vpop.f32.mrb[30].mxu0 }
 0x5db   : > { %v1464_v16 = vpop.f32.mrb[31].mxu0 }
 0x5dc   : > { %1494 = vrot.lane.b32.xlu1 %v1464_v16, %s2065_s25 }
 0x5de   : > { %1496 = vrot.lane.b32.xlu0 %v1952_v51, %s2065_s25 }
 0x5e0   : > { %1498 = vrot.lane.b32.xlu1 %v1953_v15, %s2065_s25  ;;  %v1766_v15 = vld [vmem:[%s2534_s2] ss:$0 sm:$0xff] }
 0x5e1   : > { %v573_v16 = vmul.f32 %v2188_v22, %v1766_v15  ;;  %v1803_v22 = vld [vmem:[%s2545_s13] ss:$0 sm:$0xff] }
 0x615   : > { %v1932_v18 = vpop.f32.mrb[16].mxu1 }
 0x616   : > { %v1352_v19 = vpop.f32.mrb[17].mxu1 }
 0x617   : > { %v1933_v21 = vpop.f32.mrb[18].mxu1 }
 0x618   : > { %v1355_v23 = vpop.f32.mrb[19].mxu1 }
 0x61d   : > { %v1936_v59 = vpop.f32.mrb[20].mxu1 }
 0x61e   : > { %v1368_v40 = vpop.f32.mrb[21].mxu1 }
 0x61f   : > { %v1937_v58 = vpop.f32.mrb[22].mxu1 }
 0x620   : > { %v1371_v24 = vpop.f32.mrb[23].mxu1 }
 0x644   : > { %v1485_v26 = vpop.permute.xlu0 %1484 }
 0x645   : > { %v1508_v57 = vsel %vm482_vm1, %v1352_v19, %v1485_v26  ;;  %v571_v19 = vmul.f32 %v1766_v15, %v2190_v25 }
 0x646   : > { %v1523_v0 = vmul.f32 %v1795_v62, %v1508_v57  ;;  %v1487_v47 = vpop.permute.xlu1 %1486 }
 0x647   : > { %v1509_v53 = vsel %vm482_vm1, %v1355_v23, %v1487_v47  ;;  %v572_v23 = vmul.f32 %v1766_v15, %v2194_v32  ;;  %v577_v47 = vmul.f32 %v2196_v42, %v1766_v15  ;;  %v576_v42 = vmul.f32 %v1766_v15, %v2202_v54 }
 0x648   : > { %v1538_v13 = vadd.f32 %v1796_v37, %v1523_v0  ;;  %v1524_v30 = vmul.f32 %v1795_v62, %v1509_v53  ;;  %v1489_v29 = vpop.permute.xlu0 %1488 }
 0x649   : > { %v1510_v60 = vsel %vm482_vm1, %v1932_v18, %v1489_v29  ;;  %v1767_v18 = vld [vmem:[%s2535_s3] ss:$0 sm:$0xff] }
 0x64a   : > { %v1539_v61 = vadd.f32 %v1796_v37, %v1524_v30  ;;  %v1525_v34 = vmul.f32 %v1795_v62, %v1510_v60  ;;  %v1491_v52 = vpop.permute.xlu1 %1490  ;;  %v1546_v3 = vmax.f32 %v1538_v13, 0.0  ;;  %v587_v26 = vadd.f32 %v1767_v18, %v572_v23 }
 0x64b   : > { %v1511_v55 = vsel %vm482_vm1, %v1933_v21, %v1491_v52  ;;  %v574_v21 = vmul.f32 %v2192_v28, %v1766_v15  ;;  %v575_v60 = vmul.f32 %v1766_v15, %v2198_v46  ;;  %v591_v54 = vadd.f32 %v1767_v18, %v576_v42 }
 0x64c   : > { %v1547_v36 = vmax.f32 %v1539_v61, 0.0  ;;  %v1540_v5 = vadd.f32 %v1796_v37, %v1525_v34  ;;  %v1526_v49 = vmul.f32 %v1795_v62, %v1511_v55  ;;  %v1493_v39 = vpop.permute.xlu0 %1492  ;;  %v595_v52 = vmax.f32 %v587_v26, 0.0 }
 0x64d   : > { %v1512_v35 = vsel %vm482_vm1, %v1368_v40, %v1493_v39  ;;  %v1802_v40 = vld [vmem:[%s2544_s12] ss:$0 sm:$0xff]  ;;  %v578_v55 = vmul.f32 %v2200_v50, %v1766_v15  ;;  %v590_v50 = vadd.f32 %v1767_v18, %v575_v60 }
 0x64e   : > { %v1554_v44 = vpack.c.bf16 %v1547_v36, %v1546_v3  ;;  %v1541_v48 = vadd.f32 %v1796_v37, %v1526_v49  ;;  %v1527_v45 = vmul.f32 %v1795_v62, %v1512_v35  ;;  %v1495_v56 = vpop.permute.xlu1 %1494  ;;  %v1548_v63 = vmax.f32 %v1540_v5, 0.0 }
 0x64f   : > { %v1513_v38 = vsel %vm482_vm1, %v1371_v24, %v1495_v56  ;;  %v589_v24 = vadd.f32 %v1767_v18, %v574_v21  ;;  %v592_v49 = vadd.f32 %v1767_v18, %v577_v47  ;;  %v593_v56 = vadd.f32 %v1767_v18, %v578_v55 }
 0x650   : > { %v1549_v27 = vmax.f32 %v1541_v48, 0.0  ;;  %v1542_v2 = vadd.f32 %v1796_v37, %v1527_v45  ;;  %v1528_v4 = vmul.f32 %v1795_v62, %v1513_v38  ;;  %1956 = vmatprep.mubr.msk.bf16.mxu1 %vm721_vm2, %v1554_v44  ;;  %v1497_v7 = vpop.permute.xlu0 %1496 }
 0x651   : > { %v1514_v11 = vsel %vm482_vm1, %v1936_v59, %v1497_v7  ;;  %v588_v59 = vadd.f32 %v1767_v18, %v573_v16  ;;  %v597_v29 = vmax.f32 %v589_v24, 0.0 }
 0x652   : > { %v1555_v14 = vpack.c.bf16 %v1549_v27, %v1548_v63  ;;  %v1543_v10 = vadd.f32 %v1796_v37, %v1528_v4  ;;  %v1529_v20 = vmul.f32 %v1795_v62, %v1514_v11  ;;  %v1499_v8 = vpop.permute.xlu1 %1498  ;;  %v1550_v43 = vmax.f32 %v1542_v2, 0.0 }
 0x653   : > { %v1515_v17 = vsel %vm482_vm1, %v1937_v58, %v1499_v8  ;;  %v586_v58 = vadd.f32 %v1767_v18, %v571_v19  ;;  %v596_v25 = vmax.f32 %v588_v59, 0.0  ;;  %v600_v11 = vmax.f32 %v592_v49, 0.0 }
 0x654   : > { %v1551_v9 = vmax.f32 %v1543_v10, 0.0  ;;  %v1544_v1 = vadd.f32 %v1796_v37, %v1529_v20  ;;  %v1530_v33 = vmul.f32 %v1795_v62, %v1515_v17  ;;  %1957 = vmatmul.mubr.msk.bf16.vlgmr.msra.gmra.mrb[24].mxu1 %vm721_vm2, %v1555_v14  ;;  %v598_v8 = vmax.f32 %v590_v50, 0.0 }
 0x655   : > { %v594_v32 = vmax.f32 %v586_v58, 0.0 }
 0x656   : > { %v1556_v41 = vpack.c.bf16 %v1551_v9, %v1550_v43  ;;  %v1545_v6 = vadd.f32 %v1796_v37, %v1530_v33  ;;  %v1552_v12 = vmax.f32 %v1544_v1, 0.0  ;;  %v601_v9 = vmax.f32 %v593_v56, 0.0 }
 0x658   : > { %v1553_v51 = vmax.f32 %v1545_v6, 0.0  ;;  %1960 = vmatprep.mubr.msk.bf16.mxu1 %vm721_vm2, %v1556_v41  ;;  %v599_v41 = vmax.f32 %v591_v54, 0.0 }
 0x65a   : > { %v1557_v31 = vpack.c.bf16 %v1553_v51, %v1552_v12 }
 0x65c   : > { %1961 = vmatmul.mubr.msk.bf16.gmra.mrb[28].mxu1 %vm721_vm2, %v1557_v31 }
 0x727   : > { %v1958_v62 = vpop.f32.mrb[24].mxu1 }
 0x728   : > { %v1652_v37 = vmul.f32 %v1958_v62, %v1802_v40  ;;  %v1612_v57 = vpop.f32.mrb[25].mxu1 }
 0x729   : > { %v1650_v28 = vmul.f32 %v1802_v40, %v1612_v57  ;;  %v1959_v0 = vpop.f32.mrb[26].mxu1 }
 0x72a   : > { %v1667_v53 = vadd.f32 %v1803_v22, %v1652_v37  ;;  %v1653_v13 = vmul.f32 %v1959_v0, %v1802_v40  ;;  %v1615_v30 = vpop.f32.mrb[27].mxu1 }
 0x72b   : > { %v1665_v61 = vadd.f32 %v1803_v22, %v1650_v28  ;;  %v1651_v34 = vmul.f32 %v1802_v40, %v1615_v30 }
 0x72c   : > { %v1675_v3 = vadd.f32 %v1667_v53, %v596_v25  ;;  %v1668_v36 = vadd.f32 %v1803_v22, %v1653_v13 }
 0x72d   : > { %v1673_v5 = vadd.f32 %v1665_v61, %v594_v32  ;;  %v1666_v46 = vadd.f32 %v1803_v22, %v1651_v34 }
 0x72e   : > { %v1683_v39 = vmax.f32 %v1675_v3, 0.0  ;;  %v1676_v35 = vadd.f32 %v1668_v36, %v597_v29 }
 0x72f   : > { %v1681_v44 = vmax.f32 %v1673_v5, 0.0  ;;  %v1674_v48 = vadd.f32 %v1666_v46, %v595_v52  ;;  %v1962_v45 = vpop.f32.mrb[28].mxu1 }
 0x730   : > { %1692 = vst.msk [vmem:[%s2510_s28 + $0x10] sm:$0xff] %vm1689_vm4, %v1683_v39  ;;  %v1684_v38 = vmax.f32 %v1676_v35, 0.0  ;;  %v1656_v63 = vmul.f32 %v1962_v45, %v1802_v40  ;;  %v1628_v27 = vpop.f32.mrb[29].mxu1 }
 0x731   : > { %1690 = vst.msk [vmem:[%s2510_s28] sm:$0xff] %vm1689_vm4, %v1681_v44  ;;  %v1682_v2 = vmax.f32 %v1674_v48, 0.0  ;;  %v1654_v4 = vmul.f32 %v1802_v40, %v1628_v27  ;;  %v1963_v7 = vpop.f32.mrb[30].mxu1 }
 0x732   : > { %1693 = vst.msk [vmem:[%s2510_s28 + $0x18] sm:$0xff] %vm1689_vm4, %v1684_v38  ;;  %v1671_v14 = vadd.f32 %v1803_v22, %v1656_v63  ;;  %v1657_v10 = vmul.f32 %v1963_v7, %v1802_v40  ;;  %v1631_v20 = vpop.f32.mrb[31].mxu1 }
 0x733   : > { %1691 = vst.msk [vmem:[%s2510_s28 + $0x8] sm:$0xff] %vm1689_vm4, %v1682_v2  ;;  %v1669_v17 = vadd.f32 %v1803_v22, %v1654_v4  ;;  %v1655_v43 = vmul.f32 %v1802_v40, %v1631_v20 }
 0x734   : > { %v1679_v1 = vadd.f32 %v1671_v14, %v600_v11  ;;  %v1672_v33 = vadd.f32 %v1803_v22, %v1657_v10 }
 0x735   : > { %v1677_v6 = vadd.f32 %v1669_v17, %v598_v8  ;;  %v1670_v12 = vadd.f32 %v1803_v22, %v1655_v43 }
 0x736   : > { %v1687_v51 = vmax.f32 %v1679_v1, 0.0  ;;  %v1680_v31 = vadd.f32 %v1672_v33, %v601_v9 }
 0x737   : > { %v1685_v15 = vmax.f32 %v1677_v6, 0.0  ;;  %v1678_v16 = vadd.f32 %v1670_v12, %v599_v41 }
 0x738   : > { %1696 = vst.msk [vmem:[%s2510_s28 + $0x30] sm:$0xff] %vm1689_vm4, %v1687_v51  ;;  %v1688_v18 = vmax.f32 %v1680_v31, 0.0 }
 0x739   : > { %1694 = vst.msk [vmem:[%s2510_s28 + $0x20] sm:$0xff] %vm1689_vm4, %v1685_v15  ;;  %v1686_v19 = vmax.f32 %v1678_v16, 0.0 }
 0x73a   : > { %1697 = vst.msk [vmem:[%s2510_s28 + $0x38] sm:$0xff] %vm1689_vm4, %v1688_v18 }
 0x73b   : > { %1695 = vst.msk [vmem:[%s2510_s28 + $0x28] sm:$0xff] %vm1689_vm4, %v1686_v19 }
 0x73c PF: > { %s24_s29 = sadd.s32 1, %s2059_s29  }
 0x73d   : > { %p21_p4 = scmp.ge.s32.totalorder %s24_s29, 4  }
 0x73f   :  { %23 = sbr.rel (!%p21_p4) target bundleno = 1 (0x1), region = 106 }

</bundles_post_ra>
